<compile_context>
chip_gen: v6e
topology: v6e:2x2x1
jax: 0.10.0
libtpu: 0.0.40
codegen_flags: <defaults>
</compile_context>

<pallas_src>
import math

import jax
import jax.numpy as jnp
from jax.experimental import pallas as pl
from jax.experimental.pallas import tpu as pltpu

# ----------------------------- model hyper-params (small, synthetic) -----------
BATCH = 2
IN_CHANS = 4
IMG = 16
PATCH = 4
NUM_PATCHES = (IMG // PATCH) ** 2          # 16
SEQ = NUM_PATCHES + 1                      # 17 (cls token prepended)
EMBED = 32
HEADS = 4
HEAD_DIM = EMBED // HEADS                  # 8
FFN = 4 * EMBED                            # 128
LAYERS = 2
LN_EPS = 1e-5
CPP = IN_CHANS * PATCH * PATCH             # 64 (flattened patch)


# ----------------------------- in-kernel helpers --------------------------------
def _ln(x, g, b):
    # LayerNorm over the last (lane) dim; g, b broadcast from (1, D).
    mu = jnp.mean(x, axis=-1, keepdims=True)
    var = jnp.mean((x - mu) ** 2, axis=-1, keepdims=True)
    return (x - mu) * jax.lax.rsqrt(var + LN_EPS) * g + b


def _gelu_tanh(y):
    c = math.sqrt(2.0 / math.pi)
    return 0.5 * y * (1.0 + jnp.tanh(c * (y + 0.044715 * y * (y * y))))


# ----------------------------- fused forward kernel -----------------------------
def _beit3_fused_kernel(
    patches_ref,              # (1, SEQ, CPP)   row 0 is zero (cls placeholder)
    patch_w_ref,              # (CPP, EMBED)
    emb_bias_ref,             # (SEQ, EMBED)    row0 = cls+pos0 ; rows1.. = patch_b+pos
    ln1_g_ref, ln1_b_ref,     # (L, 1, EMBED)
    wqkv_ref, bqkv_ref,       # (L, EMBED, 3*EMBED), (L, 1, 3*EMBED)
    inner_g_ref, inner_b_ref, # (L, 1, EMBED)
    wo_ref, bo_ref,           # (L, EMBED, EMBED), (L, 1, EMBED)
    ln2_g_ref, ln2_b_ref,     # (L, 1, EMBED)
    w1_ref, b1_ref,           # (L, EMBED, FFN), (L, 1, FFN)
    ffn_g_ref, ffn_b_ref,     # (L, 1, FFN)
    w2_ref, b2_ref,           # (L, FFN, EMBED), (L, 1, EMBED)
    fcn_g_ref, fcn_b_ref,     # (1, EMBED)
    out_ref,                  # (1, 1, EMBED)
    attn_scratch,             # VMEM (SEQ, EMBED) — per-head output merge buffer
):
    # ---- vision embedding: patch matmul + (cls | patch_b) + pos embed, fused ----
    x = jnp.dot(patches_ref[0], patch_w_ref[...],
                preferred_element_type=jnp.float32) + emb_bias_ref[...]      # (S, D)

    scale = float(HEAD_DIM) ** -0.5
    for l in range(LAYERS):
        # ---- self-attention block (pre-norm, subln) ----
        h = _ln(x, ln1_g_ref[l], ln1_b_ref[l])                               # (S, D)
        qkv = (jnp.dot(h, wqkv_ref[l], preferred_element_type=jnp.float32)
               + bqkv_ref[l])                                                # (S, 3D)
        q = qkv[:, 0:EMBED] * scale
        k = qkv[:, EMBED:2 * EMBED]
        v = qkv[:, 2 * EMBED:3 * EMBED]

        # per-head attention; heads merged through VMEM scratch (no minor-dim concat)
        for hd in range(HEADS):
            lo, hi = hd * HEAD_DIM, (hd + 1) * HEAD_DIM
            qh = q[:, lo:hi]
            kh = k[:, lo:hi]
            vh = v[:, lo:hi]
            s = jax.lax.dot_general(qh, kh, (((1,), (1,)), ((), ())),
                                    preferred_element_type=jnp.float32)      # (S, S)
            s = s - jnp.max(s, axis=-1, keepdims=True)
            p = jnp.exp(s)
            p = p * pl.reciprocal(jnp.sum(p, axis=-1, keepdims=True), approx=True)
            attn_scratch[:, lo:hi] = jnp.dot(p, vh,
                                             preferred_element_type=jnp.float32)

        attn = attn_scratch[...]                                             # (S, D)
        attn = _ln(attn, inner_g_ref[l], inner_b_ref[l])
        attn = (jnp.dot(attn, wo_ref[l], preferred_element_type=jnp.float32)
                + bo_ref[l])
        x = x + attn

        # ---- FFN block (pre-norm, subln) ----
        h = _ln(x, ln2_g_ref[l], ln2_b_ref[l])
        h = jnp.dot(h, w1_ref[l], preferred_element_type=jnp.float32) + b1_ref[l]
        h = _gelu_tanh(h)
        h = _ln(h, ffn_g_ref[l], ffn_b_ref[l])
        h = jnp.dot(h, w2_ref[l], preferred_element_type=jnp.float32) + b2_ref[l]
        x = x + h

    # ---- head: drop cls token via masked mean (no slice copy) + fc_norm ----
    row = jax.lax.broadcasted_iota(jnp.int32, (SEQ, EMBED), 0)
    mask = (row >= 1).astype(jnp.float32)
    m = jnp.sum(x * mask, axis=0, keepdims=True) * (1.0 / float(NUM_PATCHES))  # (1, D)
    out_ref[0] = _ln(m, fcn_g_ref[...], fcn_b_ref[...])


# ----------------------------- wrapper -------------------------------------------
def _const_spec(arr):
    # whole-array block, re-used (same index) for every grid step
    if arr.ndim == 2:
        return pl.BlockSpec(arr.shape, lambda b: (0, 0))
    return pl.BlockSpec(arr.shape, lambda b: (0, 0, 0))


def _pack_params(params):
    layers = params["layers"]

    def stack(name, shape):
        return jnp.stack([lp[name].reshape(shape) for lp in layers], axis=0)

    return dict(
        ln1_g=stack("ln1_g", (1, EMBED)), ln1_b=stack("ln1_b", (1, EMBED)),
        wqkv=jnp.stack([jnp.concatenate([lp["wq"], lp["wk"], lp["wv"]], axis=1)
                        for lp in layers], axis=0),
        bqkv=jnp.stack([jnp.concatenate([lp["bq"], lp["bk"], lp["bv"]])
                        .reshape(1, 3 * EMBED) for lp in layers], axis=0),
        inner_g=stack("inner_ln_g", (1, EMBED)), inner_b=stack("inner_ln_b", (1, EMBED)),
        wo=stack("wo", (EMBED, EMBED)), bo=stack("bo", (1, EMBED)),
        ln2_g=stack("ln2_g", (1, EMBED)), ln2_b=stack("ln2_b", (1, EMBED)),
        w1=stack("w1", (EMBED, FFN)), b1=stack("b1", (1, FFN)),
        ffn_g=stack("ffn_ln_g", (1, FFN)), ffn_b=stack("ffn_ln_b", (1, FFN)),
        w2=stack("w2", (FFN, EMBED)), b2=stack("b2", (1, EMBED)),
    )


def beit3_backbone_forward(params, image):
    B, C, H, W = image.shape
    hp, wp = H // PATCH, W // PATCH

    # patch extraction (glue): NCHW -> (B, Np, C*P*P) matching conv2d(k=s=P) weight layout
    pt = image.reshape(B, C, hp, PATCH, wp, PATCH)
    pt = pt.transpose(0, 2, 4, 1, 3, 5).reshape(B, hp * wp, CPP)
    # prepend a zero row so the patch matmul directly produces SEQ rows (row 0 = cls slot)
    patches = jnp.concatenate([jnp.zeros((B, 1, CPP), jnp.float32), pt], axis=1)

    # fold cls token, patch-embed bias and positional embedding into one (S, D) bias
    pos = params["pos_embed"][0]                                            # (S, D)
    emb_bias = jnp.concatenate(
        [params["cls_token"].reshape(1, EMBED) + pos[0:1],
         params["patch_b"].reshape(1, EMBED) + pos[1:]], axis=0)            # (S, D)

    pk = _pack_params(params)
    consts = [
        params["patch_w"], emb_bias,
        pk["ln1_g"], pk["ln1_b"], pk["wqkv"], pk["bqkv"],
        pk["inner_g"], pk["inner_b"], pk["wo"], pk["bo"],
        pk["ln2_g"], pk["ln2_b"], pk["w1"], pk["b1"],
        pk["ffn_g"], pk["ffn_b"], pk["w2"], pk["b2"],
        params["fc_norm_g"].reshape(1, EMBED),
        params["fc_norm_b"].reshape(1, EMBED),
    ]

    out = pl.pallas_call(
        _beit3_fused_kernel,
        out_shape=jax.ShapeDtypeStruct((B, 1, EMBED), jnp.float32),
        grid=(B,),
        in_specs=[pl.BlockSpec((1, SEQ, CPP), lambda b: (b, 0, 0))]
                 + [_const_spec(a) for a in consts],
        out_specs=pl.BlockSpec((1, 1, EMBED), lambda b: (b, 0, 0)),
        scratch_shapes=[pltpu.VMEM((SEQ, EMBED), jnp.float32)],
        compiler_params=pltpu.CompilerParams(dimension_semantics=("parallel",)),
    )(patches, *consts)
    return out.reshape(B, EMBED)


# ----------------------------- parameters (deterministic, synthetic) ------------
def _trunc_normal(key, shape, std=0.02):
    return std * jax.random.truncated_normal(key, -2.0, 2.0, shape, jnp.float32)


def init_params(key):
    keys = iter(jax.random.split(key, 64))
    p = {}
    # patch-embed conv (E, C, P, P) flattened to (C*P*P, E) for matmul
    p["patch_w"] = _trunc_normal(next(keys), (CPP, EMBED))
    p["patch_b"] = jnp.zeros((EMBED,), jnp.float32)
    p["cls_token"] = _trunc_normal(next(keys), (1, 1, EMBED))
    p["pos_embed"] = _trunc_normal(next(keys), (1, SEQ, EMBED))
    layers = []
    for _ in range(LAYERS):
        lp = {
            "ln1_g": jnp.ones((EMBED,), jnp.float32),
            "ln1_b": jnp.zeros((EMBED,), jnp.float32),
            "wq": _trunc_normal(next(keys), (EMBED, EMBED)),
            "bq": jnp.zeros((EMBED,), jnp.float32),
            "wk": _trunc_normal(next(keys), (EMBED, EMBED)),
            "bk": jnp.zeros((EMBED,), jnp.float32),
            "wv": _trunc_normal(next(keys), (EMBED, EMBED)),
            "bv": jnp.zeros((EMBED,), jnp.float32),
            "inner_ln_g": jnp.ones((EMBED,), jnp.float32),   # subln inner_attn_ln
            "inner_ln_b": jnp.zeros((EMBED,), jnp.float32),
            "wo": _trunc_normal(next(keys), (EMBED, EMBED)),
            "bo": jnp.zeros((EMBED,), jnp.float32),
            "ln2_g": jnp.ones((EMBED,), jnp.float32),
            "ln2_b": jnp.zeros((EMBED,), jnp.float32),
            "w1": _trunc_normal(next(keys), (EMBED, FFN)),
            "b1": jnp.zeros((FFN,), jnp.float32),
            "ffn_ln_g": jnp.ones((FFN,), jnp.float32),       # subln ffn_layernorm
            "ffn_ln_b": jnp.zeros((FFN,), jnp.float32),
            "w2": _trunc_normal(next(keys), (FFN, EMBED)),
            "b2": jnp.zeros((EMBED,), jnp.float32),
        }
        layers.append(lp)
    p["layers"] = layers
    p["fc_norm_g"] = jnp.ones((EMBED,), jnp.float32)
    p["fc_norm_b"] = jnp.zeros((EMBED,), jnp.float32)
    return p


# ----------------------------- main ---------------------------------------------
if __name__ == "__main__":
    key = jax.random.PRNGKey(0)
    k_img, k_par = jax.random.split(key)
    image = jax.random.normal(k_img, (BATCH, IN_CHANS, IMG, IMG), jnp.float32)
    params = init_params(k_par)

    fwd = jax.jit(beit3_backbone_forward)
    feature = fwd(params, image)
    feature = jax.block_until_ready(feature)

    assert feature.shape == (BATCH, EMBED), feature.shape
    assert jnp.all(jnp.isfinite(feature))
    print("KERNEL_OK")
</pallas_src>

<mosaic_0001>
module attributes {stable_mosaic.version = 11 : i64} {
  func.func @_beit3_fused_kernel(%arg0: i32, %arg1: memref<1x17x64xf32, #tpu.memory_space<vmem>>, %arg2: memref<64x32xf32, #tpu.memory_space<vmem>>, %arg3: memref<17x32xf32, #tpu.memory_space<vmem>>, %arg4: memref<2x1x32xf32, #tpu.memory_space<vmem>>, %arg5: memref<2x1x32xf32, #tpu.memory_space<vmem>>, %arg6: memref<2x32x96xf32, #tpu.memory_space<vmem>>, %arg7: memref<2x1x96xf32, #tpu.memory_space<vmem>>, %arg8: memref<2x1x32xf32, #tpu.memory_space<vmem>>, %arg9: memref<2x1x32xf32, #tpu.memory_space<vmem>>, %arg10: memref<2x32x32xf32, #tpu.memory_space<vmem>>, %arg11: memref<2x1x32xf32, #tpu.memory_space<vmem>>, %arg12: memref<2x1x32xf32, #tpu.memory_space<vmem>>, %arg13: memref<2x1x32xf32, #tpu.memory_space<vmem>>, %arg14: memref<2x32x128xf32, #tpu.memory_space<vmem>>, %arg15: memref<2x1x128xf32, #tpu.memory_space<vmem>>, %arg16: memref<2x1x128xf32, #tpu.memory_space<vmem>>, %arg17: memref<2x1x128xf32, #tpu.memory_space<vmem>>, %arg18: memref<2x128x32xf32, #tpu.memory_space<vmem>>, %arg19: memref<2x1x32xf32, #tpu.memory_space<vmem>>, %arg20: memref<1x32xf32, #tpu.memory_space<vmem>>, %arg21: memref<1x32xf32, #tpu.memory_space<vmem>>, %arg22: memref<1x1x32xf32, #tpu.memory_space<vmem>>, %arg23: memref<17x32xf32, #tpu.memory_space<vmem>>) attributes {dimension_semantics = [#tpu.dimension_semantics<parallel>], iteration_bounds = array<i64: 2>, scalar_prefetch = 0 : i64, scratch_operands = 1 : i64, tpu.core_type = #tpu.core_type<tc>, window_params = [{transform_indices = @transform_0, window_bounds = array<i64: 1, 17, 64>}, {pipeline_mode = #tpu.pipeline_mode<synchronous>, transform_indices = @transform_1, window_bounds = array<i64: 64, 32>}, {pipeline_mode = #tpu.pipeline_mode<synchronous>, transform_indices = @transform_2, window_bounds = array<i64: 17, 32>}, {pipeline_mode = #tpu.pipeline_mode<synchronous>, transform_indices = @transform_3, window_bounds = array<i64: 2, 1, 32>}, {pipeline_mode = #tpu.pipeline_mode<synchronous>, transform_indices = @transform_4, window_bounds = array<i64: 2, 1, 32>}, {pipeline_mode = #tpu.pipeline_mode<synchronous>, transform_indices = @transform_5, window_bounds = array<i64: 2, 32, 96>}, {pipeline_mode = #tpu.pipeline_mode<synchronous>, transform_indices = @transform_6, window_bounds = array<i64: 2, 1, 96>}, {pipeline_mode = #tpu.pipeline_mode<synchronous>, transform_indices = @transform_7, window_bounds = array<i64: 2, 1, 32>}, {pipeline_mode = #tpu.pipeline_mode<synchronous>, transform_indices = @transform_8, window_bounds = array<i64: 2, 1, 32>}, {pipeline_mode = #tpu.pipeline_mode<synchronous>, transform_indices = @transform_9, window_bounds = array<i64: 2, 32, 32>}, {pipeline_mode = #tpu.pipeline_mode<synchronous>, transform_indices = @transform_10, window_bounds = array<i64: 2, 1, 32>}, {pipeline_mode = #tpu.pipeline_mode<synchronous>, transform_indices = @transform_11, window_bounds = array<i64: 2, 1, 32>}, {pipeline_mode = #tpu.pipeline_mode<synchronous>, transform_indices = @transform_12, window_bounds = array<i64: 2, 1, 32>}, {pipeline_mode = #tpu.pipeline_mode<synchronous>, transform_indices = @transform_13, window_bounds = array<i64: 2, 32, 128>}, {pipeline_mode = #tpu.pipeline_mode<synchronous>, transform_indices = @transform_14, window_bounds = array<i64: 2, 1, 128>}, {pipeline_mode = #tpu.pipeline_mode<synchronous>, transform_indices = @transform_15, window_bounds = array<i64: 2, 1, 128>}, {pipeline_mode = #tpu.pipeline_mode<synchronous>, transform_indices = @transform_16, window_bounds = array<i64: 2, 1, 128>}, {pipeline_mode = #tpu.pipeline_mode<synchronous>, transform_indices = @transform_17, window_bounds = array<i64: 2, 128, 32>}, {pipeline_mode = #tpu.pipeline_mode<synchronous>, transform_indices = @transform_18, window_bounds = array<i64: 2, 1, 32>}, {pipeline_mode = #tpu.pipeline_mode<synchronous>, transform_indices = @transform_19, window_bounds = array<i64: 1, 32>}, {pipeline_mode = #tpu.pipeline_mode<synchronous>, transform_indices = @transform_20, window_bounds = array<i64: 1, 32>}, {transform_indices = @transform_21, window_bounds = array<i64: 1, 1, 32>}]} {
    %c0 = arith.constant 0 : index
    %c0_0 = arith.constant 0 : index
    %c0_1 = arith.constant 0 : index
    %0 = vector.load %arg1[%c0, %c0_0, %c0_1] : memref<1x17x64xf32, #tpu.memory_space<vmem>>, vector<1x17x64xf32>
    %1 = vector.shape_cast %0 : vector<1x17x64xf32> to vector<17x64xf32>
    %c0_2 = arith.constant 0 : index
    %c0_3 = arith.constant 0 : index
    %2 = vector.load %arg2[%c0_2, %c0_3] : memref<64x32xf32, #tpu.memory_space<vmem>>, vector<64x32xf32>
    %cst = arith.constant dense<0.000000e+00> : vector<17x32xf32>
    %3 = tpu.matmul %1, %2, %cst {dimension_numbers = #tpu.dot_dimension_numbers<[1], [0], [0], [1], [0, 0, 1, 1], [], []>} : vector<17x64xf32>, vector<64x32xf32>, vector<17x32xf32> -> vector<17x32xf32>
    %c0_4 = arith.constant 0 : index
    %c0_5 = arith.constant 0 : index
    %4 = vector.load %arg3[%c0_4, %c0_5] : memref<17x32xf32, #tpu.memory_space<vmem>>, vector<17x32xf32>
    %5 = arith.addf %3, %4 : vector<17x32xf32>
    %c0_6 = arith.constant 0 : index
    %c0_7 = arith.constant 0 : index
    %c0_8 = arith.constant 0 : index
    %6 = vector.load %arg4[%c0_6, %c0_7, %c0_8] : memref<2x1x32xf32, #tpu.memory_space<vmem>>, vector<1x1x32xf32>
    %7 = vector.shape_cast %6 : vector<1x1x32xf32> to vector<1x32xf32>
    %c0_9 = arith.constant 0 : index
    %c0_10 = arith.constant 0 : index
    %c0_11 = arith.constant 0 : index
    %8 = vector.load %arg5[%c0_9, %c0_10, %c0_11] : memref<2x1x32xf32, #tpu.memory_space<vmem>>, vector<1x1x32xf32>
    %9 = vector.shape_cast %8 : vector<1x1x32xf32> to vector<1x32xf32>
    %cst_12 = arith.constant dense<0.000000e+00> : vector<17xf32>
    %10 = vector.multi_reduction <add>, %5, %cst_12 [1] : vector<17x32xf32> to vector<17xf32>
    %11 = vector.shape_cast %10 : vector<17xf32> to vector<17x1xf32>
    %cst_13 = arith.constant 3.200000e+01 : f32
    %12 = vector.broadcast %cst_13 : f32 to vector<17x1xf32>
    %13 = arith.divf %11, %12 : vector<17x1xf32>
    %14 = vector.broadcast %13 : vector<17x1xf32> to vector<17x32xf32>
    %15 = arith.subf %5, %14 : vector<17x32xf32>
    %16 = arith.mulf %15, %15 : vector<17x32xf32>
    %cst_14 = arith.constant dense<0.000000e+00> : vector<17xf32>
    %17 = vector.multi_reduction <add>, %16, %cst_14 [1] : vector<17x32xf32> to vector<17xf32>
    %18 = vector.shape_cast %17 : vector<17xf32> to vector<17x1xf32>
    %cst_15 = arith.constant 3.200000e+01 : f32
    %19 = vector.broadcast %cst_15 : f32 to vector<17x1xf32>
    %20 = arith.divf %18, %19 : vector<17x1xf32>
    %21 = vector.broadcast %13 : vector<17x1xf32> to vector<17x32xf32>
    %22 = arith.subf %5, %21 : vector<17x32xf32>
    %cst_16 = arith.constant 9.99999974E-6 : f32
    %23 = vector.broadcast %cst_16 : f32 to vector<17x1xf32>
    %24 = arith.addf %20, %23 : vector<17x1xf32>
    %25 = math.rsqrt %24 : vector<17x1xf32>
    %26 = vector.broadcast %25 : vector<17x1xf32> to vector<17x32xf32>
    %27 = arith.mulf %22, %26 : vector<17x32xf32>
    %28 = vector.broadcast %7 : vector<1x32xf32> to vector<17x32xf32>
    %29 = arith.mulf %27, %28 : vector<17x32xf32>
    %30 = vector.broadcast %9 : vector<1x32xf32> to vector<17x32xf32>
    %31 = arith.addf %29, %30 : vector<17x32xf32>
    %c0_17 = arith.constant 0 : index
    %c0_18 = arith.constant 0 : index
    %c0_19 = arith.constant 0 : index
    %32 = vector.load %arg6[%c0_17, %c0_18, %c0_19] : memref<2x32x96xf32, #tpu.memory_space<vmem>>, vector<1x32x96xf32>
    %33 = vector.shape_cast %32 : vector<1x32x96xf32> to vector<32x96xf32>
    %cst_20 = arith.constant dense<0.000000e+00> : vector<17x96xf32>
    %34 = tpu.matmul %31, %33, %cst_20 {dimension_numbers = #tpu.dot_dimension_numbers<[1], [0], [0], [1], [0, 0, 1, 1], [], []>} : vector<17x32xf32>, vector<32x96xf32>, vector<17x96xf32> -> vector<17x96xf32>
    %c0_21 = arith.constant 0 : index
    %c0_22 = arith.constant 0 : index
    %c0_23 = arith.constant 0 : index
    %35 = vector.load %arg7[%c0_21, %c0_22, %c0_23] : memref<2x1x96xf32, #tpu.memory_space<vmem>>, vector<1x1x96xf32>
    %36 = vector.shape_cast %35 : vector<1x1x96xf32> to vector<1x96xf32>
    %37 = vector.broadcast %36 : vector<1x96xf32> to vector<17x96xf32>
    %38 = arith.addf %34, %37 : vector<17x96xf32>
    %39 = vector.extract_strided_slice %38 {offsets = [0, 0], sizes = [17, 32], strides = [1, 1]} : vector<17x96xf32> to vector<17x32xf32>
    %cst_24 = arith.constant 0.353553385 : f32
    %40 = vector.broadcast %cst_24 : f32 to vector<17x32xf32>
    %41 = arith.mulf %39, %40 : vector<17x32xf32>
    %42 = vector.extract_strided_slice %38 {offsets = [0, 32], sizes = [17, 32], strides = [1, 1]} : vector<17x96xf32> to vector<17x32xf32>
    %43 = vector.extract_strided_slice %38 {offsets = [0, 64], sizes = [17, 32], strides = [1, 1]} : vector<17x96xf32> to vector<17x32xf32>
    %44 = vector.extract_strided_slice %41 {offsets = [0, 0], sizes = [17, 8], strides = [1, 1]} : vector<17x32xf32> to vector<17x8xf32>
    %45 = vector.extract_strided_slice %42 {offsets = [0, 0], sizes = [17, 8], strides = [1, 1]} : vector<17x32xf32> to vector<17x8xf32>
    %46 = vector.extract_strided_slice %43 {offsets = [0, 0], sizes = [17, 8], strides = [1, 1]} : vector<17x32xf32> to vector<17x8xf32>
    %cst_25 = arith.constant dense<0.000000e+00> : vector<17x17xf32>
    %47 = tpu.matmul %44, %45, %cst_25 {dimension_numbers = #tpu.dot_dimension_numbers<[1], [1], [0], [0], [0, 0, 1, 0], [], []>} : vector<17x8xf32>, vector<17x8xf32>, vector<17x17xf32> -> vector<17x17xf32>
    %cst_26 = arith.constant dense<0xFF800000> : vector<17xf32>
    %48 = vector.multi_reduction <maximumf>, %47, %cst_26 [1] : vector<17x17xf32> to vector<17xf32>
    %49 = vector.shape_cast %48 : vector<17xf32> to vector<17x1xf32>
    %50 = vector.broadcast %49 : vector<17x1xf32> to vector<17x17xf32>
    %51 = arith.subf %47, %50 : vector<17x17xf32>
    %52 = math.exp %51 : vector<17x17xf32>
    %cst_27 = arith.constant dense<0.000000e+00> : vector<17xf32>
    %53 = vector.multi_reduction <add>, %52, %cst_27 [1] : vector<17x17xf32> to vector<17xf32>
    %54 = vector.shape_cast %53 : vector<17xf32> to vector<17x1xf32>
    %55 = tpu.reciprocal %54 {approx = true} : vector<17x1xf32> -> vector<17x1xf32>
    %56 = vector.broadcast %55 : vector<17x1xf32> to vector<17x17xf32>
    %57 = arith.mulf %52, %56 : vector<17x17xf32>
    %cst_28 = arith.constant dense<0.000000e+00> : vector<17x8xf32>
    %58 = tpu.matmul %57, %46, %cst_28 {dimension_numbers = #tpu.dot_dimension_numbers<[1], [0], [0], [1], [0, 0, 1, 1], [], []>} : vector<17x17xf32>, vector<17x8xf32>, vector<17x8xf32> -> vector<17x8xf32>
    %c0_29 = arith.constant 0 : index
    %c0_30 = arith.constant 0 : index
    %59 = vector.load %arg23[%c0_29, %c0_30] : memref<17x32xf32, #tpu.memory_space<vmem>>, vector<17x8xf32>
    tpu.vector_store %arg23[%c0_29, %c0_30], %58 {strides = array<i32>} : memref<17x32xf32, #tpu.memory_space<vmem>>, vector<17x8xf32>,
    %60 = vector.extract_strided_slice %41 {offsets = [0, 8], sizes = [17, 8], strides = [1, 1]} : vector<17x32xf32> to vector<17x8xf32>
    %61 = vector.extract_strided_slice %42 {offsets = [0, 8], sizes = [17, 8], strides = [1, 1]} : vector<17x32xf32> to vector<17x8xf32>
    %62 = vector.extract_strided_slice %43 {offsets = [0, 8], sizes = [17, 8], strides = [1, 1]} : vector<17x32xf32> to vector<17x8xf32>
    %cst_31 = arith.constant dense<0.000000e+00> : vector<17x17xf32>
    %63 = tpu.matmul %60, %61, %cst_31 {dimension_numbers = #tpu.dot_dimension_numbers<[1], [1], [0], [0], [0, 0, 1, 0], [], []>} : vector<17x8xf32>, vector<17x8xf32>, vector<17x17xf32> -> vector<17x17xf32>
    %cst_32 = arith.constant dense<0xFF800000> : vector<17xf32>
    %64 = vector.multi_reduction <maximumf>, %63, %cst_32 [1] : vector<17x17xf32> to vector<17xf32>
    %65 = vector.shape_cast %64 : vector<17xf32> to vector<17x1xf32>
    %66 = vector.broadcast %65 : vector<17x1xf32> to vector<17x17xf32>
    %67 = arith.subf %63, %66 : vector<17x17xf32>
    %68 = math.exp %67 : vector<17x17xf32>
    %cst_33 = arith.constant dense<0.000000e+00> : vector<17xf32>
    %69 = vector.multi_reduction <add>, %68, %cst_33 [1] : vector<17x17xf32> to vector<17xf32>
    %70 = vector.shape_cast %69 : vector<17xf32> to vector<17x1xf32>
    %71 = tpu.reciprocal %70 {approx = true} : vector<17x1xf32> -> vector<17x1xf32>
    %72 = vector.broadcast %71 : vector<17x1xf32> to vector<17x17xf32>
    %73 = arith.mulf %68, %72 : vector<17x17xf32>
    %cst_34 = arith.constant dense<0.000000e+00> : vector<17x8xf32>
    %74 = tpu.matmul %73, %62, %cst_34 {dimension_numbers = #tpu.dot_dimension_numbers<[1], [0], [0], [1], [0, 0, 1, 1], [], []>} : vector<17x17xf32>, vector<17x8xf32>, vector<17x8xf32> -> vector<17x8xf32>
    %c0_35 = arith.constant 0 : index
    %c8 = arith.constant 8 : index
    %75 = vector.load %arg23[%c0_35, %c8] : memref<17x32xf32, #tpu.memory_space<vmem>>, vector<17x8xf32>
    tpu.vector_store %arg23[%c0_35, %c8], %74 {strides = array<i32>} : memref<17x32xf32, #tpu.memory_space<vmem>>, vector<17x8xf32>,
    %76 = vector.extract_strided_slice %41 {offsets = [0, 16], sizes = [17, 8], strides = [1, 1]} : vector<17x32xf32> to vector<17x8xf32>
    %77 = vector.extract_strided_slice %42 {offsets = [0, 16], sizes = [17, 8], strides = [1, 1]} : vector<17x32xf32> to vector<17x8xf32>
    %78 = vector.extract_strided_slice %43 {offsets = [0, 16], sizes = [17, 8], strides = [1, 1]} : vector<17x32xf32> to vector<17x8xf32>
    %cst_36 = arith.constant dense<0.000000e+00> : vector<17x17xf32>
    %79 = tpu.matmul %76, %77, %cst_36 {dimension_numbers = #tpu.dot_dimension_numbers<[1], [1], [0], [0], [0, 0, 1, 0], [], []>} : vector<17x8xf32>, vector<17x8xf32>, vector<17x17xf32> -> vector<17x17xf32>
    %cst_37 = arith.constant dense<0xFF800000> : vector<17xf32>
    %80 = vector.multi_reduction <maximumf>, %79, %cst_37 [1] : vector<17x17xf32> to vector<17xf32>
    %81 = vector.shape_cast %80 : vector<17xf32> to vector<17x1xf32>
    %82 = vector.broadcast %81 : vector<17x1xf32> to vector<17x17xf32>
    %83 = arith.subf %79, %82 : vector<17x17xf32>
    %84 = math.exp %83 : vector<17x17xf32>
    %cst_38 = arith.constant dense<0.000000e+00> : vector<17xf32>
    %85 = vector.multi_reduction <add>, %84, %cst_38 [1] : vector<17x17xf32> to vector<17xf32>
    %86 = vector.shape_cast %85 : vector<17xf32> to vector<17x1xf32>
    %87 = tpu.reciprocal %86 {approx = true} : vector<17x1xf32> -> vector<17x1xf32>
    %88 = vector.broadcast %87 : vector<17x1xf32> to vector<17x17xf32>
    %89 = arith.mulf %84, %88 : vector<17x17xf32>
    %cst_39 = arith.constant dense<0.000000e+00> : vector<17x8xf32>
    %90 = tpu.matmul %89, %78, %cst_39 {dimension_numbers = #tpu.dot_dimension_numbers<[1], [0], [0], [1], [0, 0, 1, 1], [], []>} : vector<17x17xf32>, vector<17x8xf32>, vector<17x8xf32> -> vector<17x8xf32>
    %c0_40 = arith.constant 0 : index
    %c16 = arith.constant 16 : index
    %91 = vector.load %arg23[%c0_40, %c16] : memref<17x32xf32, #tpu.memory_space<vmem>>, vector<17x8xf32>
    tpu.vector_store %arg23[%c0_40, %c16], %90 {strides = array<i32>} : memref<17x32xf32, #tpu.memory_space<vmem>>, vector<17x8xf32>,
    %92 = vector.extract_strided_slice %41 {offsets = [0, 24], sizes = [17, 8], strides = [1, 1]} : vector<17x32xf32> to vector<17x8xf32>
    %93 = vector.extract_strided_slice %42 {offsets = [0, 24], sizes = [17, 8], strides = [1, 1]} : vector<17x32xf32> to vector<17x8xf32>
    %94 = vector.extract_strided_slice %43 {offsets = [0, 24], sizes = [17, 8], strides = [1, 1]} : vector<17x32xf32> to vector<17x8xf32>
    %cst_41 = arith.constant dense<0.000000e+00> : vector<17x17xf32>
    %95 = tpu.matmul %92, %93, %cst_41 {dimension_numbers = #tpu.dot_dimension_numbers<[1], [1], [0], [0], [0, 0, 1, 0], [], []>} : vector<17x8xf32>, vector<17x8xf32>, vector<17x17xf32> -> vector<17x17xf32>
    %cst_42 = arith.constant dense<0xFF800000> : vector<17xf32>
    %96 = vector.multi_reduction <maximumf>, %95, %cst_42 [1] : vector<17x17xf32> to vector<17xf32>
    %97 = vector.shape_cast %96 : vector<17xf32> to vector<17x1xf32>
    %98 = vector.broadcast %97 : vector<17x1xf32> to vector<17x17xf32>
    %99 = arith.subf %95, %98 : vector<17x17xf32>
    %100 = math.exp %99 : vector<17x17xf32>
    %cst_43 = arith.constant dense<0.000000e+00> : vector<17xf32>
    %101 = vector.multi_reduction <add>, %100, %cst_43 [1] : vector<17x17xf32> to vector<17xf32>
    %102 = vector.shape_cast %101 : vector<17xf32> to vector<17x1xf32>
    %103 = tpu.reciprocal %102 {approx = true} : vector<17x1xf32> -> vector<17x1xf32>
    %104 = vector.broadcast %103 : vector<17x1xf32> to vector<17x17xf32>
    %105 = arith.mulf %100, %104 : vector<17x17xf32>
    %cst_44 = arith.constant dense<0.000000e+00> : vector<17x8xf32>
    %106 = tpu.matmul %105, %94, %cst_44 {dimension_numbers = #tpu.dot_dimension_numbers<[1], [0], [0], [1], [0, 0, 1, 1], [], []>} : vector<17x17xf32>, vector<17x8xf32>, vector<17x8xf32> -> vector<17x8xf32>
    %c0_45 = arith.constant 0 : index
    %c24 = arith.constant 24 : index
    %107 = vector.load %arg23[%c0_45, %c24] : memref<17x32xf32, #tpu.memory_space<vmem>>, vector<17x8xf32>
    tpu.vector_store %arg23[%c0_45, %c24], %106 {strides = array<i32>} : memref<17x32xf32, #tpu.memory_space<vmem>>, vector<17x8xf32>,
    %c0_46 = arith.constant 0 : index
    %c0_47 = arith.constant 0 : index
    %108 = vector.load %arg23[%c0_46, %c0_47] : memref<17x32xf32, #tpu.memory_space<vmem>>, vector<17x32xf32>
    %c0_48 = arith.constant 0 : index
    %c0_49 = arith.constant 0 : index
    %c0_50 = arith.constant 0 : index
    %109 = vector.load %arg8[%c0_48, %c0_49, %c0_50] : memref<2x1x32xf32, #tpu.memory_space<vmem>>, vector<1x1x32xf32>
    %110 = vector.shape_cast %109 : vector<1x1x32xf32> to vector<1x32xf32>
    %c0_51 = arith.constant 0 : index
    %c0_52 = arith.constant 0 : index
    %c0_53 = arith.constant 0 : index
    %111 = vector.load %arg9[%c0_51, %c0_52, %c0_53] : memref<2x1x32xf32, #tpu.memory_space<vmem>>, vector<1x1x32xf32>
    %112 = vector.shape_cast %111 : vector<1x1x32xf32> to vector<1x32xf32>
    %cst_54 = arith.constant dense<0.000000e+00> : vector<17xf32>
    %113 = vector.multi_reduction <add>, %108, %cst_54 [1] : vector<17x32xf32> to vector<17xf32>
    %114 = vector.shape_cast %113 : vector<17xf32> to vector<17x1xf32>
    %cst_55 = arith.constant 3.200000e+01 : f32
    %115 = vector.broadcast %cst_55 : f32 to vector<17x1xf32>
    %116 = arith.divf %114, %115 : vector<17x1xf32>
    %117 = vector.broadcast %116 : vector<17x1xf32> to vector<17x32xf32>
    %118 = arith.subf %108, %117 : vector<17x32xf32>
    %119 = arith.mulf %118, %118 : vector<17x32xf32>
    %cst_56 = arith.constant dense<0.000000e+00> : vector<17xf32>
    %120 = vector.multi_reduction <add>, %119, %cst_56 [1] : vector<17x32xf32> to vector<17xf32>
    %121 = vector.shape_cast %120 : vector<17xf32> to vector<17x1xf32>
    %cst_57 = arith.constant 3.200000e+01 : f32
    %122 = vector.broadcast %cst_57 : f32 to vector<17x1xf32>
    %123 = arith.divf %121, %122 : vector<17x1xf32>
    %124 = vector.broadcast %116 : vector<17x1xf32> to vector<17x32xf32>
    %125 = arith.subf %108, %124 : vector<17x32xf32>
    %cst_58 = arith.constant 9.99999974E-6 : f32
    %126 = vector.broadcast %cst_58 : f32 to vector<17x1xf32>
    %127 = arith.addf %123, %126 : vector<17x1xf32>
    %128 = math.rsqrt %127 : vector<17x1xf32>
    %129 = vector.broadcast %128 : vector<17x1xf32> to vector<17x32xf32>
    %130 = arith.mulf %125, %129 : vector<17x32xf32>
    %131 = vector.broadcast %110 : vector<1x32xf32> to vector<17x32xf32>
    %132 = arith.mulf %130, %131 : vector<17x32xf32>
    %133 = vector.broadcast %112 : vector<1x32xf32> to vector<17x32xf32>
    %134 = arith.addf %132, %133 : vector<17x32xf32>
    %c0_59 = arith.constant 0 : index
    %c0_60 = arith.constant 0 : index
    %c0_61 = arith.constant 0 : index
    %135 = vector.load %arg10[%c0_59, %c0_60, %c0_61] : memref<2x32x32xf32, #tpu.memory_space<vmem>>, vector<1x32x32xf32>
    %136 = vector.shape_cast %135 : vector<1x32x32xf32> to vector<32x32xf32>
    %cst_62 = arith.constant dense<0.000000e+00> : vector<17x32xf32>
    %137 = tpu.matmul %134, %136, %cst_62 {dimension_numbers = #tpu.dot_dimension_numbers<[1], [0], [0], [1], [0, 0, 1, 1], [], []>} : vector<17x32xf32>, vector<32x32xf32>, vector<17x32xf32> -> vector<17x32xf32>
    %c0_63 = arith.constant 0 : index
    %c0_64 = arith.constant 0 : index
    %c0_65 = arith.constant 0 : index
    %138 = vector.load %arg11[%c0_63, %c0_64, %c0_65] : memref<2x1x32xf32, #tpu.memory_space<vmem>>, vector<1x1x32xf32>
    %139 = vector.shape_cast %138 : vector<1x1x32xf32> to vector<1x32xf32>
    %140 = vector.broadcast %139 : vector<1x32xf32> to vector<17x32xf32>
    %141 = arith.addf %137, %140 : vector<17x32xf32>
    %142 = arith.addf %5, %141 : vector<17x32xf32>
    %c0_66 = arith.constant 0 : index
    %c0_67 = arith.constant 0 : index
    %c0_68 = arith.constant 0 : index
    %143 = vector.load %arg12[%c0_66, %c0_67, %c0_68] : memref<2x1x32xf32, #tpu.memory_space<vmem>>, vector<1x1x32xf32>
    %144 = vector.shape_cast %143 : vector<1x1x32xf32> to vector<1x32xf32>
    %c0_69 = arith.constant 0 : index
    %c0_70 = arith.constant 0 : index
    %c0_71 = arith.constant 0 : index
    %145 = vector.load %arg13[%c0_69, %c0_70, %c0_71] : memref<2x1x32xf32, #tpu.memory_space<vmem>>, vector<1x1x32xf32>
    %146 = vector.shape_cast %145 : vector<1x1x32xf32> to vector<1x32xf32>
    %cst_72 = arith.constant dense<0.000000e+00> : vector<17xf32>
    %147 = vector.multi_reduction <add>, %142, %cst_72 [1] : vector<17x32xf32> to vector<17xf32>
    %148 = vector.shape_cast %147 : vector<17xf32> to vector<17x1xf32>
    %cst_73 = arith.constant 3.200000e+01 : f32
    %149 = vector.broadcast %cst_73 : f32 to vector<17x1xf32>
    %150 = arith.divf %148, %149 : vector<17x1xf32>
    %151 = vector.broadcast %150 : vector<17x1xf32> to vector<17x32xf32>
    %152 = arith.subf %142, %151 : vector<17x32xf32>
    %153 = arith.mulf %152, %152 : vector<17x32xf32>
    %cst_74 = arith.constant dense<0.000000e+00> : vector<17xf32>
    %154 = vector.multi_reduction <add>, %153, %cst_74 [1] : vector<17x32xf32> to vector<17xf32>
    %155 = vector.shape_cast %154 : vector<17xf32> to vector<17x1xf32>
    %cst_75 = arith.constant 3.200000e+01 : f32
    %156 = vector.broadcast %cst_75 : f32 to vector<17x1xf32>
    %157 = arith.divf %155, %156 : vector<17x1xf32>
    %158 = vector.broadcast %150 : vector<17x1xf32> to vector<17x32xf32>
    %159 = arith.subf %142, %158 : vector<17x32xf32>
    %cst_76 = arith.constant 9.99999974E-6 : f32
    %160 = vector.broadcast %cst_76 : f32 to vector<17x1xf32>
    %161 = arith.addf %157, %160 : vector<17x1xf32>
    %162 = math.rsqrt %161 : vector<17x1xf32>
    %163 = vector.broadcast %162 : vector<17x1xf32> to vector<17x32xf32>
    %164 = arith.mulf %159, %163 : vector<17x32xf32>
    %165 = vector.broadcast %144 : vector<1x32xf32> to vector<17x32xf32>
    %166 = arith.mulf %164, %165 : vector<17x32xf32>
    %167 = vector.broadcast %146 : vector<1x32xf32> to vector<17x32xf32>
    %168 = arith.addf %166, %167 : vector<17x32xf32>
    %c0_77 = arith.constant 0 : index
    %c0_78 = arith.constant 0 : index
    %c0_79 = arith.constant 0 : index
    %169 = vector.load %arg14[%c0_77, %c0_78, %c0_79] : memref<2x32x128xf32, #tpu.memory_space<vmem>>, vector<1x32x128xf32>
    %170 = vector.shape_cast %169 : vector<1x32x128xf32> to vector<32x128xf32>
    %cst_80 = arith.constant dense<0.000000e+00> : vector<17x128xf32>
    %171 = tpu.matmul %168, %170, %cst_80 {dimension_numbers = #tpu.dot_dimension_numbers<[1], [0], [0], [1], [0, 0, 1, 1], [], []>} : vector<17x32xf32>, vector<32x128xf32>, vector<17x128xf32> -> vector<17x128xf32>
    %c0_81 = arith.constant 0 : index
    %c0_82 = arith.constant 0 : index
    %c0_83 = arith.constant 0 : index
    %172 = vector.load %arg15[%c0_81, %c0_82, %c0_83] : memref<2x1x128xf32, #tpu.memory_space<vmem>>, vector<1x1x128xf32>
    %173 = vector.shape_cast %172 : vector<1x1x128xf32> to vector<1x128xf32>
    %174 = vector.broadcast %173 : vector<1x128xf32> to vector<17x128xf32>
    %175 = arith.addf %171, %174 : vector<17x128xf32>
    %cst_84 = arith.constant 5.000000e-01 : f32
    %176 = vector.broadcast %cst_84 : f32 to vector<17x128xf32>
    %177 = arith.mulf %176, %175 : vector<17x128xf32>
    %cst_85 = arith.constant 4.471500e-02 : f32
    %178 = vector.broadcast %cst_85 : f32 to vector<17x128xf32>
    %179 = arith.mulf %178, %175 : vector<17x128xf32>
    %180 = arith.mulf %175, %175 : vector<17x128xf32>
    %181 = arith.mulf %179, %180 : vector<17x128xf32>
    %182 = arith.addf %175, %181 : vector<17x128xf32>
    %cst_86 = arith.constant 0.797884583 : f32
    %183 = vector.broadcast %cst_86 : f32 to vector<17x128xf32>
    %184 = arith.mulf %183, %182 : vector<17x128xf32>
    %185 = math.tanh %184 : vector<17x128xf32>
    %cst_87 = arith.constant 1.000000e+00 : f32
    %186 = vector.broadcast %cst_87 : f32 to vector<17x128xf32>
    %187 = arith.addf %186, %185 : vector<17x128xf32>
    %188 = arith.mulf %177, %187 : vector<17x128xf32>
    %c0_88 = arith.constant 0 : index
    %c0_89 = arith.constant 0 : index
    %c0_90 = arith.constant 0 : index
    %189 = vector.load %arg16[%c0_88, %c0_89, %c0_90] : memref<2x1x128xf32, #tpu.memory_space<vmem>>, vector<1x1x128xf32>
    %190 = vector.shape_cast %189 : vector<1x1x128xf32> to vector<1x128xf32>
    %c0_91 = arith.constant 0 : index
    %c0_92 = arith.constant 0 : index
    %c0_93 = arith.constant 0 : index
    %191 = vector.load %arg17[%c0_91, %c0_92, %c0_93] : memref<2x1x128xf32, #tpu.memory_space<vmem>>, vector<1x1x128xf32>
    %192 = vector.shape_cast %191 : vector<1x1x128xf32> to vector<1x128xf32>
    %cst_94 = arith.constant dense<0.000000e+00> : vector<17xf32>
    %193 = vector.multi_reduction <add>, %188, %cst_94 [1] : vector<17x128xf32> to vector<17xf32>
    %194 = vector.shape_cast %193 : vector<17xf32> to vector<17x1xf32>
    %cst_95 = arith.constant 1.280000e+02 : f32
    %195 = vector.broadcast %cst_95 : f32 to vector<17x1xf32>
    %196 = arith.divf %194, %195 : vector<17x1xf32>
    %197 = vector.broadcast %196 : vector<17x1xf32> to vector<17x128xf32>
    %198 = arith.subf %188, %197 : vector<17x128xf32>
    %199 = arith.mulf %198, %198 : vector<17x128xf32>
    %cst_96 = arith.constant dense<0.000000e+00> : vector<17xf32>
    %200 = vector.multi_reduction <add>, %199, %cst_96 [1] : vector<17x128xf32> to vector<17xf32>
    %201 = vector.shape_cast %200 : vector<17xf32> to vector<17x1xf32>
    %cst_97 = arith.constant 1.280000e+02 : f32
    %202 = vector.broadcast %cst_97 : f32 to vector<17x1xf32>
    %203 = arith.divf %201, %202 : vector<17x1xf32>
    %204 = vector.broadcast %196 : vector<17x1xf32> to vector<17x128xf32>
    %205 = arith.subf %188, %204 : vector<17x128xf32>
    %cst_98 = arith.constant 9.99999974E-6 : f32
    %206 = vector.broadcast %cst_98 : f32 to vector<17x1xf32>
    %207 = arith.addf %203, %206 : vector<17x1xf32>
    %208 = math.rsqrt %207 : vector<17x1xf32>
    %209 = vector.broadcast %208 : vector<17x1xf32> to vector<17x128xf32>
    %210 = arith.mulf %205, %209 : vector<17x128xf32>
    %211 = vector.broadcast %190 : vector<1x128xf32> to vector<17x128xf32>
    %212 = arith.mulf %210, %211 : vector<17x128xf32>
    %213 = vector.broadcast %192 : vector<1x128xf32> to vector<17x128xf32>
    %214 = arith.addf %212, %213 : vector<17x128xf32>
    %c0_99 = arith.constant 0 : index
    %c0_100 = arith.constant 0 : index
    %c0_101 = arith.constant 0 : index
    %215 = vector.load %arg18[%c0_99, %c0_100, %c0_101] : memref<2x128x32xf32, #tpu.memory_space<vmem>>, vector<1x128x32xf32>
    %216 = vector.shape_cast %215 : vector<1x128x32xf32> to vector<128x32xf32>
    %cst_102 = arith.constant dense<0.000000e+00> : vector<17x32xf32>
    %217 = tpu.matmul %214, %216, %cst_102 {dimension_numbers = #tpu.dot_dimension_numbers<[1], [0], [0], [1], [0, 0, 1, 1], [], []>} : vector<17x128xf32>, vector<128x32xf32>, vector<17x32xf32> -> vector<17x32xf32>
    %c0_103 = arith.constant 0 : index
    %c0_104 = arith.constant 0 : index
    %c0_105 = arith.constant 0 : index
    %218 = vector.load %arg19[%c0_103, %c0_104, %c0_105] : memref<2x1x32xf32, #tpu.memory_space<vmem>>, vector<1x1x32xf32>
    %219 = vector.shape_cast %218 : vector<1x1x32xf32> to vector<1x32xf32>
    %220 = vector.broadcast %219 : vector<1x32xf32> to vector<17x32xf32>
    %221 = arith.addf %217, %220 : vector<17x32xf32>
    %222 = arith.addf %142, %221 : vector<17x32xf32>
    %c1 = arith.constant 1 : index
    %c0_106 = arith.constant 0 : index
    %c0_107 = arith.constant 0 : index
    %223 = vector.load %arg4[%c1, %c0_106, %c0_107] : memref<2x1x32xf32, #tpu.memory_space<vmem>>, vector<1x1x32xf32>
    %224 = vector.shape_cast %223 : vector<1x1x32xf32> to vector<1x32xf32>
    %c1_108 = arith.constant 1 : index
    %c0_109 = arith.constant 0 : index
    %c0_110 = arith.constant 0 : index
    %225 = vector.load %arg5[%c1_108, %c0_109, %c0_110] : memref<2x1x32xf32, #tpu.memory_space<vmem>>, vector<1x1x32xf32>
    %226 = vector.shape_cast %225 : vector<1x1x32xf32> to vector<1x32xf32>
    %cst_111 = arith.constant dense<0.000000e+00> : vector<17xf32>
    %227 = vector.multi_reduction <add>, %222, %cst_111 [1] : vector<17x32xf32> to vector<17xf32>
    %228 = vector.shape_cast %227 : vector<17xf32> to vector<17x1xf32>
    %cst_112 = arith.constant 3.200000e+01 : f32
    %229 = vector.broadcast %cst_112 : f32 to vector<17x1xf32>
    %230 = arith.divf %228, %229 : vector<17x1xf32>
    %231 = vector.broadcast %230 : vector<17x1xf32> to vector<17x32xf32>
    %232 = arith.subf %222, %231 : vector<17x32xf32>
    %233 = arith.mulf %232, %232 : vector<17x32xf32>
    %cst_113 = arith.constant dense<0.000000e+00> : vector<17xf32>
    %234 = vector.multi_reduction <add>, %233, %cst_113 [1] : vector<17x32xf32> to vector<17xf32>
    %235 = vector.shape_cast %234 : vector<17xf32> to vector<17x1xf32>
    %cst_114 = arith.constant 3.200000e+01 : f32
    %236 = vector.broadcast %cst_114 : f32 to vector<17x1xf32>
    %237 = arith.divf %235, %236 : vector<17x1xf32>
    %238 = vector.broadcast %230 : vector<17x1xf32> to vector<17x32xf32>
    %239 = arith.subf %222, %238 : vector<17x32xf32>
    %cst_115 = arith.constant 9.99999974E-6 : f32
    %240 = vector.broadcast %cst_115 : f32 to vector<17x1xf32>
    %241 = arith.addf %237, %240 : vector<17x1xf32>
    %242 = math.rsqrt %241 : vector<17x1xf32>
    %243 = vector.broadcast %242 : vector<17x1xf32> to vector<17x32xf32>
    %244 = arith.mulf %239, %243 : vector<17x32xf32>
    %245 = vector.broadcast %224 : vector<1x32xf32> to vector<17x32xf32>
    %246 = arith.mulf %244, %245 : vector<17x32xf32>
    %247 = vector.broadcast %226 : vector<1x32xf32> to vector<17x32xf32>
    %248 = arith.addf %246, %247 : vector<17x32xf32>
    %c1_116 = arith.constant 1 : index
    %c0_117 = arith.constant 0 : index
    %c0_118 = arith.constant 0 : index
    %249 = vector.load %arg6[%c1_116, %c0_117, %c0_118] : memref<2x32x96xf32, #tpu.memory_space<vmem>>, vector<1x32x96xf32>
    %250 = vector.shape_cast %249 : vector<1x32x96xf32> to vector<32x96xf32>
    %cst_119 = arith.constant dense<0.000000e+00> : vector<17x96xf32>
    %251 = tpu.matmul %248, %250, %cst_119 {dimension_numbers = #tpu.dot_dimension_numbers<[1], [0], [0], [1], [0, 0, 1, 1], [], []>} : vector<17x32xf32>, vector<32x96xf32>, vector<17x96xf32> -> vector<17x96xf32>
    %c1_120 = arith.constant 1 : index
    %c0_121 = arith.constant 0 : index
    %c0_122 = arith.constant 0 : index
    %252 = vector.load %arg7[%c1_120, %c0_121, %c0_122] : memref<2x1x96xf32, #tpu.memory_space<vmem>>, vector<1x1x96xf32>
    %253 = vector.shape_cast %252 : vector<1x1x96xf32> to vector<1x96xf32>
    %254 = vector.broadcast %253 : vector<1x96xf32> to vector<17x96xf32>
    %255 = arith.addf %251, %254 : vector<17x96xf32>
    %256 = vector.extract_strided_slice %255 {offsets = [0, 0], sizes = [17, 32], strides = [1, 1]} : vector<17x96xf32> to vector<17x32xf32>
    %cst_123 = arith.constant 0.353553385 : f32
    %257 = vector.broadcast %cst_123 : f32 to vector<17x32xf32>
    %258 = arith.mulf %256, %257 : vector<17x32xf32>
    %259 = vector.extract_strided_slice %255 {offsets = [0, 32], sizes = [17, 32], strides = [1, 1]} : vector<17x96xf32> to vector<17x32xf32>
    %260 = vector.extract_strided_slice %255 {offsets = [0, 64], sizes = [17, 32], strides = [1, 1]} : vector<17x96xf32> to vector<17x32xf32>
    %261 = vector.extract_strided_slice %258 {offsets = [0, 0], sizes = [17, 8], strides = [1, 1]} : vector<17x32xf32> to vector<17x8xf32>
    %262 = vector.extract_strided_slice %259 {offsets = [0, 0], sizes = [17, 8], strides = [1, 1]} : vector<17x32xf32> to vector<17x8xf32>
    %263 = vector.extract_strided_slice %260 {offsets = [0, 0], sizes = [17, 8], strides = [1, 1]} : vector<17x32xf32> to vector<17x8xf32>
    %cst_124 = arith.constant dense<0.000000e+00> : vector<17x17xf32>
    %264 = tpu.matmul %261, %262, %cst_124 {dimension_numbers = #tpu.dot_dimension_numbers<[1], [1], [0], [0], [0, 0, 1, 0], [], []>} : vector<17x8xf32>, vector<17x8xf32>, vector<17x17xf32> -> vector<17x17xf32>
    %cst_125 = arith.constant dense<0xFF800000> : vector<17xf32>
    %265 = vector.multi_reduction <maximumf>, %264, %cst_125 [1] : vector<17x17xf32> to vector<17xf32>
    %266 = vector.shape_cast %265 : vector<17xf32> to vector<17x1xf32>
    %267 = vector.broadcast %266 : vector<17x1xf32> to vector<17x17xf32>
    %268 = arith.subf %264, %267 : vector<17x17xf32>
    %269 = math.exp %268 : vector<17x17xf32>
    %cst_126 = arith.constant dense<0.000000e+00> : vector<17xf32>
    %270 = vector.multi_reduction <add>, %269, %cst_126 [1] : vector<17x17xf32> to vector<17xf32>
    %271 = vector.shape_cast %270 : vector<17xf32> to vector<17x1xf32>
    %272 = tpu.reciprocal %271 {approx = true} : vector<17x1xf32> -> vector<17x1xf32>
    %273 = vector.broadcast %272 : vector<17x1xf32> to vector<17x17xf32>
    %274 = arith.mulf %269, %273 : vector<17x17xf32>
    %cst_127 = arith.constant dense<0.000000e+00> : vector<17x8xf32>
    %275 = tpu.matmul %274, %263, %cst_127 {dimension_numbers = #tpu.dot_dimension_numbers<[1], [0], [0], [1], [0, 0, 1, 1], [], []>} : vector<17x17xf32>, vector<17x8xf32>, vector<17x8xf32> -> vector<17x8xf32>
    %c0_128 = arith.constant 0 : index
    %c0_129 = arith.constant 0 : index
    %276 = vector.load %arg23[%c0_128, %c0_129] : memref<17x32xf32, #tpu.memory_space<vmem>>, vector<17x8xf32>
    tpu.vector_store %arg23[%c0_128, %c0_129], %275 {strides = array<i32>} : memref<17x32xf32, #tpu.memory_space<vmem>>, vector<17x8xf32>,
    %277 = vector.extract_strided_slice %258 {offsets = [0, 8], sizes = [17, 8], strides = [1, 1]} : vector<17x32xf32> to vector<17x8xf32>
    %278 = vector.extract_strided_slice %259 {offsets = [0, 8], sizes = [17, 8], strides = [1, 1]} : vector<17x32xf32> to vector<17x8xf32>
    %279 = vector.extract_strided_slice %260 {offsets = [0, 8], sizes = [17, 8], strides = [1, 1]} : vector<17x32xf32> to vector<17x8xf32>
    %cst_130 = arith.constant dense<0.000000e+00> : vector<17x17xf32>
    %280 = tpu.matmul %277, %278, %cst_130 {dimension_numbers = #tpu.dot_dimension_numbers<[1], [1], [0], [0], [0, 0, 1, 0], [], []>} : vector<17x8xf32>, vector<17x8xf32>, vector<17x17xf32> -> vector<17x17xf32>
    %cst_131 = arith.constant dense<0xFF800000> : vector<17xf32>
    %281 = vector.multi_reduction <maximumf>, %280, %cst_131 [1] : vector<17x17xf32> to vector<17xf32>
    %282 = vector.shape_cast %281 : vector<17xf32> to vector<17x1xf32>
    %283 = vector.broadcast %282 : vector<17x1xf32> to vector<17x17xf32>
    %284 = arith.subf %280, %283 : vector<17x17xf32>
    %285 = math.exp %284 : vector<17x17xf32>
    %cst_132 = arith.constant dense<0.000000e+00> : vector<17xf32>
    %286 = vector.multi_reduction <add>, %285, %cst_132 [1] : vector<17x17xf32> to vector<17xf32>
    %287 = vector.shape_cast %286 : vector<17xf32> to vector<17x1xf32>
    %288 = tpu.reciprocal %287 {approx = true} : vector<17x1xf32> -> vector<17x1xf32>
    %289 = vector.broadcast %288 : vector<17x1xf32> to vector<17x17xf32>
    %290 = arith.mulf %285, %289 : vector<17x17xf32>
    %cst_133 = arith.constant dense<0.000000e+00> : vector<17x8xf32>
    %291 = tpu.matmul %290, %279, %cst_133 {dimension_numbers = #tpu.dot_dimension_numbers<[1], [0], [0], [1], [0, 0, 1, 1], [], []>} : vector<17x17xf32>, vector<17x8xf32>, vector<17x8xf32> -> vector<17x8xf32>
    %c0_134 = arith.constant 0 : index
    %c8_135 = arith.constant 8 : index
    %292 = vector.load %arg23[%c0_134, %c8_135] : memref<17x32xf32, #tpu.memory_space<vmem>>, vector<17x8xf32>
    tpu.vector_store %arg23[%c0_134, %c8_135], %291 {strides = array<i32>} : memref<17x32xf32, #tpu.memory_space<vmem>>, vector<17x8xf32>,
    %293 = vector.extract_strided_slice %258 {offsets = [0, 16], sizes = [17, 8], strides = [1, 1]} : vector<17x32xf32> to vector<17x8xf32>
    %294 = vector.extract_strided_slice %259 {offsets = [0, 16], sizes = [17, 8], strides = [1, 1]} : vector<17x32xf32> to vector<17x8xf32>
    %295 = vector.extract_strided_slice %260 {offsets = [0, 16], sizes = [17, 8], strides = [1, 1]} : vector<17x32xf32> to vector<17x8xf32>
    %cst_136 = arith.constant dense<0.000000e+00> : vector<17x17xf32>
    %296 = tpu.matmul %293, %294, %cst_136 {dimension_numbers = #tpu.dot_dimension_numbers<[1], [1], [0], [0], [0, 0, 1, 0], [], []>} : vector<17x8xf32>, vector<17x8xf32>, vector<17x17xf32> -> vector<17x17xf32>
    %cst_137 = arith.constant dense<0xFF800000> : vector<17xf32>
    %297 = vector.multi_reduction <maximumf>, %296, %cst_137 [1] : vector<17x17xf32> to vector<17xf32>
    %298 = vector.shape_cast %297 : vector<17xf32> to vector<17x1xf32>
    %299 = vector.broadcast %298 : vector<17x1xf32> to vector<17x17xf32>
    %300 = arith.subf %296, %299 : vector<17x17xf32>
    %301 = math.exp %300 : vector<17x17xf32>
    %cst_138 = arith.constant dense<0.000000e+00> : vector<17xf32>
    %302 = vector.multi_reduction <add>, %301, %cst_138 [1] : vector<17x17xf32> to vector<17xf32>
    %303 = vector.shape_cast %302 : vector<17xf32> to vector<17x1xf32>
    %304 = tpu.reciprocal %303 {approx = true} : vector<17x1xf32> -> vector<17x1xf32>
    %305 = vector.broadcast %304 : vector<17x1xf32> to vector<17x17xf32>
    %306 = arith.mulf %301, %305 : vector<17x17xf32>
    %cst_139 = arith.constant dense<0.000000e+00> : vector<17x8xf32>
    %307 = tpu.matmul %306, %295, %cst_139 {dimension_numbers = #tpu.dot_dimension_numbers<[1], [0], [0], [1], [0, 0, 1, 1], [], []>} : vector<17x17xf32>, vector<17x8xf32>, vector<17x8xf32> -> vector<17x8xf32>
    %c0_140 = arith.constant 0 : index
    %c16_141 = arith.constant 16 : index
    %308 = vector.load %arg23[%c0_140, %c16_141] : memref<17x32xf32, #tpu.memory_space<vmem>>, vector<17x8xf32>
    tpu.vector_store %arg23[%c0_140, %c16_141], %307 {strides = array<i32>} : memref<17x32xf32, #tpu.memory_space<vmem>>, vector<17x8xf32>,
    %309 = vector.extract_strided_slice %258 {offsets = [0, 24], sizes = [17, 8], strides = [1, 1]} : vector<17x32xf32> to vector<17x8xf32>
    %310 = vector.extract_strided_slice %259 {offsets = [0, 24], sizes = [17, 8], strides = [1, 1]} : vector<17x32xf32> to vector<17x8xf32>
    %311 = vector.extract_strided_slice %260 {offsets = [0, 24], sizes = [17, 8], strides = [1, 1]} : vector<17x32xf32> to vector<17x8xf32>
    %cst_142 = arith.constant dense<0.000000e+00> : vector<17x17xf32>
    %312 = tpu.matmul %309, %310, %cst_142 {dimension_numbers = #tpu.dot_dimension_numbers<[1], [1], [0], [0], [0, 0, 1, 0], [], []>} : vector<17x8xf32>, vector<17x8xf32>, vector<17x17xf32> -> vector<17x17xf32>
    %cst_143 = arith.constant dense<0xFF800000> : vector<17xf32>
    %313 = vector.multi_reduction <maximumf>, %312, %cst_143 [1] : vector<17x17xf32> to vector<17xf32>
    %314 = vector.shape_cast %313 : vector<17xf32> to vector<17x1xf32>
    %315 = vector.broadcast %314 : vector<17x1xf32> to vector<17x17xf32>
    %316 = arith.subf %312, %315 : vector<17x17xf32>
    %317 = math.exp %316 : vector<17x17xf32>
    %cst_144 = arith.constant dense<0.000000e+00> : vector<17xf32>
    %318 = vector.multi_reduction <add>, %317, %cst_144 [1] : vector<17x17xf32> to vector<17xf32>
    %319 = vector.shape_cast %318 : vector<17xf32> to vector<17x1xf32>
    %320 = tpu.reciprocal %319 {approx = true} : vector<17x1xf32> -> vector<17x1xf32>
    %321 = vector.broadcast %320 : vector<17x1xf32> to vector<17x17xf32>
    %322 = arith.mulf %317, %321 : vector<17x17xf32>
    %cst_145 = arith.constant dense<0.000000e+00> : vector<17x8xf32>
    %323 = tpu.matmul %322, %311, %cst_145 {dimension_numbers = #tpu.dot_dimension_numbers<[1], [0], [0], [1], [0, 0, 1, 1], [], []>} : vector<17x17xf32>, vector<17x8xf32>, vector<17x8xf32> -> vector<17x8xf32>
    %c0_146 = arith.constant 0 : index
    %c24_147 = arith.constant 24 : index
    %324 = vector.load %arg23[%c0_146, %c24_147] : memref<17x32xf32, #tpu.memory_space<vmem>>, vector<17x8xf32>
    tpu.vector_store %arg23[%c0_146, %c24_147], %323 {strides = array<i32>} : memref<17x32xf32, #tpu.memory_space<vmem>>, vector<17x8xf32>,
    %c0_148 = arith.constant 0 : index
    %c0_149 = arith.constant 0 : index
    %325 = vector.load %arg23[%c0_148, %c0_149] : memref<17x32xf32, #tpu.memory_space<vmem>>, vector<17x32xf32>
    %c1_150 = arith.constant 1 : index
    %c0_151 = arith.constant 0 : index
    %c0_152 = arith.constant 0 : index
    %326 = vector.load %arg8[%c1_150, %c0_151, %c0_152] : memref<2x1x32xf32, #tpu.memory_space<vmem>>, vector<1x1x32xf32>
    %327 = vector.shape_cast %326 : vector<1x1x32xf32> to vector<1x32xf32>
    %c1_153 = arith.constant 1 : index
    %c0_154 = arith.constant 0 : index
    %c0_155 = arith.constant 0 : index
    %328 = vector.load %arg9[%c1_153, %c0_154, %c0_155] : memref<2x1x32xf32, #tpu.memory_space<vmem>>, vector<1x1x32xf32>
    %329 = vector.shape_cast %328 : vector<1x1x32xf32> to vector<1x32xf32>
    %cst_156 = arith.constant dense<0.000000e+00> : vector<17xf32>
    %330 = vector.multi_reduction <add>, %325, %cst_156 [1] : vector<17x32xf32> to vector<17xf32>
    %331 = vector.shape_cast %330 : vector<17xf32> to vector<17x1xf32>
    %cst_157 = arith.constant 3.200000e+01 : f32
    %332 = vector.broadcast %cst_157 : f32 to vector<17x1xf32>
    %333 = arith.divf %331, %332 : vector<17x1xf32>
    %334 = vector.broadcast %333 : vector<17x1xf32> to vector<17x32xf32>
    %335 = arith.subf %325, %334 : vector<17x32xf32>
    %336 = arith.mulf %335, %335 : vector<17x32xf32>
    %cst_158 = arith.constant dense<0.000000e+00> : vector<17xf32>
    %337 = vector.multi_reduction <add>, %336, %cst_158 [1] : vector<17x32xf32> to vector<17xf32>
    %338 = vector.shape_cast %337 : vector<17xf32> to vector<17x1xf32>
    %cst_159 = arith.constant 3.200000e+01 : f32
    %339 = vector.broadcast %cst_159 : f32 to vector<17x1xf32>
    %340 = arith.divf %338, %339 : vector<17x1xf32>
    %341 = vector.broadcast %333 : vector<17x1xf32> to vector<17x32xf32>
    %342 = arith.subf %325, %341 : vector<17x32xf32>
    %cst_160 = arith.constant 9.99999974E-6 : f32
    %343 = vector.broadcast %cst_160 : f32 to vector<17x1xf32>
    %344 = arith.addf %340, %343 : vector<17x1xf32>
    %345 = math.rsqrt %344 : vector<17x1xf32>
    %346 = vector.broadcast %345 : vector<17x1xf32> to vector<17x32xf32>
    %347 = arith.mulf %342, %346 : vector<17x32xf32>
    %348 = vector.broadcast %327 : vector<1x32xf32> to vector<17x32xf32>
    %349 = arith.mulf %347, %348 : vector<17x32xf32>
    %350 = vector.broadcast %329 : vector<1x32xf32> to vector<17x32xf32>
    %351 = arith.addf %349, %350 : vector<17x32xf32>
    %c1_161 = arith.constant 1 : index
    %c0_162 = arith.constant 0 : index
    %c0_163 = arith.constant 0 : index
    %352 = vector.load %arg10[%c1_161, %c0_162, %c0_163] : memref<2x32x32xf32, #tpu.memory_space<vmem>>, vector<1x32x32xf32>
    %353 = vector.shape_cast %352 : vector<1x32x32xf32> to vector<32x32xf32>
    %cst_164 = arith.constant dense<0.000000e+00> : vector<17x32xf32>
    %354 = tpu.matmul %351, %353, %cst_164 {dimension_numbers = #tpu.dot_dimension_numbers<[1], [0], [0], [1], [0, 0, 1, 1], [], []>} : vector<17x32xf32>, vector<32x32xf32>, vector<17x32xf32> -> vector<17x32xf32>
    %c1_165 = arith.constant 1 : index
    %c0_166 = arith.constant 0 : index
    %c0_167 = arith.constant 0 : index
    %355 = vector.load %arg11[%c1_165, %c0_166, %c0_167] : memref<2x1x32xf32, #tpu.memory_space<vmem>>, vector<1x1x32xf32>
    %356 = vector.shape_cast %355 : vector<1x1x32xf32> to vector<1x32xf32>
    %357 = vector.broadcast %356 : vector<1x32xf32> to vector<17x32xf32>
    %358 = arith.addf %354, %357 : vector<17x32xf32>
    %359 = arith.addf %222, %358 : vector<17x32xf32>
    %c1_168 = arith.constant 1 : index
    %c0_169 = arith.constant 0 : index
    %c0_170 = arith.constant 0 : index
    %360 = vector.load %arg12[%c1_168, %c0_169, %c0_170] : memref<2x1x32xf32, #tpu.memory_space<vmem>>, vector<1x1x32xf32>
    %361 = vector.shape_cast %360 : vector<1x1x32xf32> to vector<1x32xf32>
    %c1_171 = arith.constant 1 : index
    %c0_172 = arith.constant 0 : index
    %c0_173 = arith.constant 0 : index
    %362 = vector.load %arg13[%c1_171, %c0_172, %c0_173] : memref<2x1x32xf32, #tpu.memory_space<vmem>>, vector<1x1x32xf32>
    %363 = vector.shape_cast %362 : vector<1x1x32xf32> to vector<1x32xf32>
    %cst_174 = arith.constant dense<0.000000e+00> : vector<17xf32>
    %364 = vector.multi_reduction <add>, %359, %cst_174 [1] : vector<17x32xf32> to vector<17xf32>
    %365 = vector.shape_cast %364 : vector<17xf32> to vector<17x1xf32>
    %cst_175 = arith.constant 3.200000e+01 : f32
    %366 = vector.broadcast %cst_175 : f32 to vector<17x1xf32>
    %367 = arith.divf %365, %366 : vector<17x1xf32>
    %368 = vector.broadcast %367 : vector<17x1xf32> to vector<17x32xf32>
    %369 = arith.subf %359, %368 : vector<17x32xf32>
    %370 = arith.mulf %369, %369 : vector<17x32xf32>
    %cst_176 = arith.constant dense<0.000000e+00> : vector<17xf32>
    %371 = vector.multi_reduction <add>, %370, %cst_176 [1] : vector<17x32xf32> to vector<17xf32>
    %372 = vector.shape_cast %371 : vector<17xf32> to vector<17x1xf32>
    %cst_177 = arith.constant 3.200000e+01 : f32
    %373 = vector.broadcast %cst_177 : f32 to vector<17x1xf32>
    %374 = arith.divf %372, %373 : vector<17x1xf32>
    %375 = vector.broadcast %367 : vector<17x1xf32> to vector<17x32xf32>
    %376 = arith.subf %359, %375 : vector<17x32xf32>
    %cst_178 = arith.constant 9.99999974E-6 : f32
    %377 = vector.broadcast %cst_178 : f32 to vector<17x1xf32>
    %378 = arith.addf %374, %377 : vector<17x1xf32>
    %379 = math.rsqrt %378 : vector<17x1xf32>
    %380 = vector.broadcast %379 : vector<17x1xf32> to vector<17x32xf32>
    %381 = arith.mulf %376, %380 : vector<17x32xf32>
    %382 = vector.broadcast %361 : vector<1x32xf32> to vector<17x32xf32>
    %383 = arith.mulf %381, %382 : vector<17x32xf32>
    %384 = vector.broadcast %363 : vector<1x32xf32> to vector<17x32xf32>
    %385 = arith.addf %383, %384 : vector<17x32xf32>
    %c1_179 = arith.constant 1 : index
    %c0_180 = arith.constant 0 : index
    %c0_181 = arith.constant 0 : index
    %386 = vector.load %arg14[%c1_179, %c0_180, %c0_181] : memref<2x32x128xf32, #tpu.memory_space<vmem>>, vector<1x32x128xf32>
    %387 = vector.shape_cast %386 : vector<1x32x128xf32> to vector<32x128xf32>
    %cst_182 = arith.constant dense<0.000000e+00> : vector<17x128xf32>
    %388 = tpu.matmul %385, %387, %cst_182 {dimension_numbers = #tpu.dot_dimension_numbers<[1], [0], [0], [1], [0, 0, 1, 1], [], []>} : vector<17x32xf32>, vector<32x128xf32>, vector<17x128xf32> -> vector<17x128xf32>
    %c1_183 = arith.constant 1 : index
    %c0_184 = arith.constant 0 : index
    %c0_185 = arith.constant 0 : index
    %389 = vector.load %arg15[%c1_183, %c0_184, %c0_185] : memref<2x1x128xf32, #tpu.memory_space<vmem>>, vector<1x1x128xf32>
    %390 = vector.shape_cast %389 : vector<1x1x128xf32> to vector<1x128xf32>
    %391 = vector.broadcast %390 : vector<1x128xf32> to vector<17x128xf32>
    %392 = arith.addf %388, %391 : vector<17x128xf32>
    %cst_186 = arith.constant 5.000000e-01 : f32
    %393 = vector.broadcast %cst_186 : f32 to vector<17x128xf32>
    %394 = arith.mulf %393, %392 : vector<17x128xf32>
    %cst_187 = arith.constant 4.471500e-02 : f32
    %395 = vector.broadcast %cst_187 : f32 to vector<17x128xf32>
    %396 = arith.mulf %395, %392 : vector<17x128xf32>
    %397 = arith.mulf %392, %392 : vector<17x128xf32>
    %398 = arith.mulf %396, %397 : vector<17x128xf32>
    %399 = arith.addf %392, %398 : vector<17x128xf32>
    %cst_188 = arith.constant 0.797884583 : f32
    %400 = vector.broadcast %cst_188 : f32 to vector<17x128xf32>
    %401 = arith.mulf %400, %399 : vector<17x128xf32>
    %402 = math.tanh %401 : vector<17x128xf32>
    %cst_189 = arith.constant 1.000000e+00 : f32
    %403 = vector.broadcast %cst_189 : f32 to vector<17x128xf32>
    %404 = arith.addf %403, %402 : vector<17x128xf32>
    %405 = arith.mulf %394, %404 : vector<17x128xf32>
    %c1_190 = arith.constant 1 : index
    %c0_191 = arith.constant 0 : index
    %c0_192 = arith.constant 0 : index
    %406 = vector.load %arg16[%c1_190, %c0_191, %c0_192] : memref<2x1x128xf32, #tpu.memory_space<vmem>>, vector<1x1x128xf32>
    %407 = vector.shape_cast %406 : vector<1x1x128xf32> to vector<1x128xf32>
    %c1_193 = arith.constant 1 : index
    %c0_194 = arith.constant 0 : index
    %c0_195 = arith.constant 0 : index
    %408 = vector.load %arg17[%c1_193, %c0_194, %c0_195] : memref<2x1x128xf32, #tpu.memory_space<vmem>>, vector<1x1x128xf32>
    %409 = vector.shape_cast %408 : vector<1x1x128xf32> to vector<1x128xf32>
    %cst_196 = arith.constant dense<0.000000e+00> : vector<17xf32>
    %410 = vector.multi_reduction <add>, %405, %cst_196 [1] : vector<17x128xf32> to vector<17xf32>
    %411 = vector.shape_cast %410 : vector<17xf32> to vector<17x1xf32>
    %cst_197 = arith.constant 1.280000e+02 : f32
    %412 = vector.broadcast %cst_197 : f32 to vector<17x1xf32>
    %413 = arith.divf %411, %412 : vector<17x1xf32>
    %414 = vector.broadcast %413 : vector<17x1xf32> to vector<17x128xf32>
    %415 = arith.subf %405, %414 : vector<17x128xf32>
    %416 = arith.mulf %415, %415 : vector<17x128xf32>
    %cst_198 = arith.constant dense<0.000000e+00> : vector<17xf32>
    %417 = vector.multi_reduction <add>, %416, %cst_198 [1] : vector<17x128xf32> to vector<17xf32>
    %418 = vector.shape_cast %417 : vector<17xf32> to vector<17x1xf32>
    %cst_199 = arith.constant 1.280000e+02 : f32
    %419 = vector.broadcast %cst_199 : f32 to vector<17x1xf32>
    %420 = arith.divf %418, %419 : vector<17x1xf32>
    %421 = vector.broadcast %413 : vector<17x1xf32> to vector<17x128xf32>
    %422 = arith.subf %405, %421 : vector<17x128xf32>
    %cst_200 = arith.constant 9.99999974E-6 : f32
    %423 = vector.broadcast %cst_200 : f32 to vector<17x1xf32>
    %424 = arith.addf %420, %423 : vector<17x1xf32>
    %425 = math.rsqrt %424 : vector<17x1xf32>
    %426 = vector.broadcast %425 : vector<17x1xf32> to vector<17x128xf32>
    %427 = arith.mulf %422, %426 : vector<17x128xf32>
    %428 = vector.broadcast %407 : vector<1x128xf32> to vector<17x128xf32>
    %429 = arith.mulf %427, %428 : vector<17x128xf32>
    %430 = vector.broadcast %409 : vector<1x128xf32> to vector<17x128xf32>
    %431 = arith.addf %429, %430 : vector<17x128xf32>
    %c1_201 = arith.constant 1 : index
    %c0_202 = arith.constant 0 : index
    %c0_203 = arith.constant 0 : index
    %432 = vector.load %arg18[%c1_201, %c0_202, %c0_203] : memref<2x128x32xf32, #tpu.memory_space<vmem>>, vector<1x128x32xf32>
    %433 = vector.shape_cast %432 : vector<1x128x32xf32> to vector<128x32xf32>
    %cst_204 = arith.constant dense<0.000000e+00> : vector<17x32xf32>
    %434 = tpu.matmul %431, %433, %cst_204 {dimension_numbers = #tpu.dot_dimension_numbers<[1], [0], [0], [1], [0, 0, 1, 1], [], []>} : vector<17x128xf32>, vector<128x32xf32>, vector<17x32xf32> -> vector<17x32xf32>
    %c1_205 = arith.constant 1 : index
    %c0_206 = arith.constant 0 : index
    %c0_207 = arith.constant 0 : index
    %435 = vector.load %arg19[%c1_205, %c0_206, %c0_207] : memref<2x1x32xf32, #tpu.memory_space<vmem>>, vector<1x1x32xf32>
    %436 = vector.shape_cast %435 : vector<1x1x32xf32> to vector<1x32xf32>
    %437 = vector.broadcast %436 : vector<1x32xf32> to vector<17x32xf32>
    %438 = arith.addf %434, %437 : vector<17x32xf32>
    %439 = arith.addf %359, %438 : vector<17x32xf32>
    %440 = tpu.iota {dimensions = array<i32: 0>} : vector<17x32xi32>
    %c1_i32 = arith.constant 1 : i32
    %441 = vector.broadcast %c1_i32 : i32 to vector<17x32xi32>
    %442 = arith.cmpi sge, %440, %441 : vector<17x32xi32>
    %443 = arith.extui %442 : vector<17x32xi1> to vector<17x32xi32>
    %444 = arith.sitofp %443 : vector<17x32xi32> to vector<17x32xf32>
    %445 = arith.mulf %439, %444 : vector<17x32xf32>
    %cst_208 = arith.constant dense<0.000000e+00> : vector<32xf32>
    %446 = vector.multi_reduction <add>, %445, %cst_208 [0] : vector<17x32xf32> to vector<32xf32>
    %447 = vector.shape_cast %446 : vector<32xf32> to vector<1x32xf32>
    %cst_209 = arith.constant 6.250000e-02 : f32
    %448 = vector.broadcast %cst_209 : f32 to vector<1x32xf32>
    %449 = arith.mulf %447, %448 : vector<1x32xf32>
    %c0_210 = arith.constant 0 : index
    %c0_211 = arith.constant 0 : index
    %450 = vector.load %arg20[%c0_210, %c0_211] : memref<1x32xf32, #tpu.memory_space<vmem>>, vector<1x32xf32>
    %c0_212 = arith.constant 0 : index
    %c0_213 = arith.constant 0 : index
    %451 = vector.load %arg21[%c0_212, %c0_213] : memref<1x32xf32, #tpu.memory_space<vmem>>, vector<1x32xf32>
    %cst_214 = arith.constant dense<0.000000e+00> : vector<1xf32>
    %452 = vector.multi_reduction <add>, %449, %cst_214 [1] : vector<1x32xf32> to vector<1xf32>
    %453 = vector.shape_cast %452 : vector<1xf32> to vector<1x1xf32>
    %cst_215 = arith.constant 3.200000e+01 : f32
    %454 = vector.broadcast %cst_215 : f32 to vector<1x1xf32>
    %455 = arith.divf %453, %454 : vector<1x1xf32>
    %456 = vector.broadcast %455 : vector<1x1xf32> to vector<1x32xf32>
    %457 = arith.subf %449, %456 : vector<1x32xf32>
    %458 = arith.mulf %457, %457 : vector<1x32xf32>
    %cst_216 = arith.constant dense<0.000000e+00> : vector<1xf32>
    %459 = vector.multi_reduction <add>, %458, %cst_216 [1] : vector<1x32xf32> to vector<1xf32>
    %460 = vector.shape_cast %459 : vector<1xf32> to vector<1x1xf32>
    %cst_217 = arith.constant 3.200000e+01 : f32
    %461 = vector.broadcast %cst_217 : f32 to vector<1x1xf32>
    %462 = arith.divf %460, %461 : vector<1x1xf32>
    %463 = vector.broadcast %455 : vector<1x1xf32> to vector<1x32xf32>
    %464 = arith.subf %449, %463 : vector<1x32xf32>
    %cst_218 = arith.constant 9.99999974E-6 : f32
    %465 = vector.broadcast %cst_218 : f32 to vector<1x1xf32>
    %466 = arith.addf %462, %465 : vector<1x1xf32>
    %467 = math.rsqrt %466 : vector<1x1xf32>
    %468 = vector.broadcast %467 : vector<1x1xf32> to vector<1x32xf32>
    %469 = arith.mulf %464, %468 : vector<1x32xf32>
    %470 = arith.mulf %469, %450 : vector<1x32xf32>
    %471 = arith.addf %470, %451 : vector<1x32xf32>
    %c0_219 = arith.constant 0 : index
    %c0_220 = arith.constant 0 : index
    %c0_221 = arith.constant 0 : index
    %472 = vector.load %arg22[%c0_219, %c0_220, %c0_221] : memref<1x1x32xf32, #tpu.memory_space<vmem>>, vector<1x1x32xf32>
    %473 = vector.shape_cast %472 : vector<1x1x32xf32> to vector<1x32xf32>
    %474 = vector.shape_cast %471 : vector<1x32xf32> to vector<1x1x32xf32>
    tpu.vector_store %arg22[%c0_219, %c0_220, %c0_221], %474 {strides = array<i32>} : memref<1x1x32xf32, #tpu.memory_space<vmem>>, vector<1x1x32xf32>,
    return
  }
  func.func @transform_0(%arg0: i32) -> (i32, i32, i32) {
    %c0_i32 = arith.constant 0 : i32
    %c0_i32_0 = arith.constant 0 : i32
    %c0_i32_1 = arith.constant 0 : i32
    return %arg0, %c0_i32, %c0_i32_0 : i32, i32, i32
  }
  func.func @transform_1(%arg0: i32) -> (i32, i32) {
    %c0_i32 = arith.constant 0 : i32
    %c0_i32_0 = arith.constant 0 : i32
    %c0_i32_1 = arith.constant 0 : i32
    return %c0_i32, %c0_i32_0 : i32, i32
  }
  func.func @transform_2(%arg0: i32) -> (i32, i32) {
    %c0_i32 = arith.constant 0 : i32
    %c0_i32_0 = arith.constant 0 : i32
    %c0_i32_1 = arith.constant 0 : i32
    return %c0_i32, %c0_i32_0 : i32, i32
  }
  func.func @transform_3(%arg0: i32) -> (i32, i32, i32) {
    %c0_i32 = arith.constant 0 : i32
    %c0_i32_0 = arith.constant 0 : i32
    %c0_i32_1 = arith.constant 0 : i32
    %c0_i32_2 = arith.constant 0 : i32
    return %c0_i32, %c0_i32_0, %c0_i32_1 : i32, i32, i32
  }
  func.func @transform_4(%arg0: i32) -> (i32, i32, i32) {
    %c0_i32 = arith.constant 0 : i32
    %c0_i32_0 = arith.constant 0 : i32
    %c0_i32_1 = arith.constant 0 : i32
    %c0_i32_2 = arith.constant 0 : i32
    return %c0_i32, %c0_i32_0, %c0_i32_1 : i32, i32, i32
  }
  func.func @transform_5(%arg0: i32) -> (i32, i32, i32) {
    %c0_i32 = arith.constant 0 : i32
    %c0_i32_0 = arith.constant 0 : i32
    %c0_i32_1 = arith.constant 0 : i32
    %c0_i32_2 = arith.constant 0 : i32
    return %c0_i32, %c0_i32_0, %c0_i32_1 : i32, i32, i32
  }
  func.func @transform_6(%arg0: i32) -> (i32, i32, i32) {
    %c0_i32 = arith.constant 0 : i32
    %c0_i32_0 = arith.constant 0 : i32
    %c0_i32_1 = arith.constant 0 : i32
    %c0_i32_2 = arith.constant 0 : i32
    return %c0_i32, %c0_i32_0, %c0_i32_1 : i32, i32, i32
  }
  func.func @transform_7(%arg0: i32) -> (i32, i32, i32) {
    %c0_i32 = arith.constant 0 : i32
    %c0_i32_0 = arith.constant 0 : i32
    %c0_i32_1 = arith.constant 0 : i32
    %c0_i32_2 = arith.constant 0 : i32
    return %c0_i32, %c0_i32_0, %c0_i32_1 : i32, i32, i32
  }
  func.func @transform_8(%arg0: i32) -> (i32, i32, i32) {
    %c0_i32 = arith.constant 0 : i32
    %c0_i32_0 = arith.constant 0 : i32
    %c0_i32_1 = arith.constant 0 : i32
    %c0_i32_2 = arith.constant 0 : i32
    return %c0_i32, %c0_i32_0, %c0_i32_1 : i32, i32, i32
  }
  func.func @transform_9(%arg0: i32) -> (i32, i32, i32) {
    %c0_i32 = arith.constant 0 : i32
    %c0_i32_0 = arith.constant 0 : i32
    %c0_i32_1 = arith.constant 0 : i32
    %c0_i32_2 = arith.constant 0 : i32
    return %c0_i32, %c0_i32_0, %c0_i32_1 : i32, i32, i32
  }
  func.func @transform_10(%arg0: i32) -> (i32, i32, i32) {
    %c0_i32 = arith.constant 0 : i32
    %c0_i32_0 = arith.constant 0 : i32
    %c0_i32_1 = arith.constant 0 : i32
    %c0_i32_2 = arith.constant 0 : i32
    return %c0_i32, %c0_i32_0, %c0_i32_1 : i32, i32, i32
  }
  func.func @transform_11(%arg0: i32) -> (i32, i32, i32) {
    %c0_i32 = arith.constant 0 : i32
    %c0_i32_0 = arith.constant 0 : i32
    %c0_i32_1 = arith.constant 0 : i32
    %c0_i32_2 = arith.constant 0 : i32
    return %c0_i32, %c0_i32_0, %c0_i32_1 : i32, i32, i32
  }
  func.func @transform_12(%arg0: i32) -> (i32, i32, i32) {
    %c0_i32 = arith.constant 0 : i32
    %c0_i32_0 = arith.constant 0 : i32
    %c0_i32_1 = arith.constant 0 : i32
    %c0_i32_2 = arith.constant 0 : i32
    return %c0_i32, %c0_i32_0, %c0_i32_1 : i32, i32, i32
  }
  func.func @transform_13(%arg0: i32) -> (i32, i32, i32) {
    %c0_i32 = arith.constant 0 : i32
    %c0_i32_0 = arith.constant 0 : i32
    %c0_i32_1 = arith.constant 0 : i32
    %c0_i32_2 = arith.constant 0 : i32
    return %c0_i32, %c0_i32_0, %c0_i32_1 : i32, i32, i32
  }
  func.func @transform_14(%arg0: i32) -> (i32, i32, i32) {
    %c0_i32 = arith.constant 0 : i32
    %c0_i32_0 = arith.constant 0 : i32
    %c0_i32_1 = arith.constant 0 : i32
    %c0_i32_2 = arith.constant 0 : i32
    return %c0_i32, %c0_i32_0, %c0_i32_1 : i32, i32, i32
  }
  func.func @transform_15(%arg0: i32) -> (i32, i32, i32) {
    %c0_i32 = arith.constant 0 : i32
    %c0_i32_0 = arith.constant 0 : i32
    %c0_i32_1 = arith.constant 0 : i32
    %c0_i32_2 = arith.constant 0 : i32
    return %c0_i32, %c0_i32_0, %c0_i32_1 : i32, i32, i32
  }
  func.func @transform_16(%arg0: i32) -> (i32, i32, i32) {
    %c0_i32 = arith.constant 0 : i32
    %c0_i32_0 = arith.constant 0 : i32
    %c0_i32_1 = arith.constant 0 : i32
    %c0_i32_2 = arith.constant 0 : i32
    return %c0_i32, %c0_i32_0, %c0_i32_1 : i32, i32, i32
  }
  func.func @transform_17(%arg0: i32) -> (i32, i32, i32) {
    %c0_i32 = arith.constant 0 : i32
    %c0_i32_0 = arith.constant 0 : i32
    %c0_i32_1 = arith.constant 0 : i32
    %c0_i32_2 = arith.constant 0 : i32
    return %c0_i32, %c0_i32_0, %c0_i32_1 : i32, i32, i32
  }
  func.func @transform_18(%arg0: i32) -> (i32, i32, i32) {
    %c0_i32 = arith.constant 0 : i32
    %c0_i32_0 = arith.constant 0 : i32
    %c0_i32_1 = arith.constant 0 : i32
    %c0_i32_2 = arith.constant 0 : i32
    return %c0_i32, %c0_i32_0, %c0_i32_1 : i32, i32, i32
  }
  func.func @transform_19(%arg0: i32) -> (i32, i32) {
    %c0_i32 = arith.constant 0 : i32
    %c0_i32_0 = arith.constant 0 : i32
    %c0_i32_1 = arith.constant 0 : i32
    return %c0_i32, %c0_i32_0 : i32, i32
  }
  func.func @transform_20(%arg0: i32) -> (i32, i32) {
    %c0_i32 = arith.constant 0 : i32
    %c0_i32_0 = arith.constant 0 : i32
    %c0_i32_1 = arith.constant 0 : i32
    return %c0_i32, %c0_i32_0 : i32, i32
  }
  func.func @transform_21(%arg0: i32) -> (i32, i32, i32) {
    %c0_i32 = arith.constant 0 : i32
    %c0_i32_0 = arith.constant 0 : i32
    %c0_i32_1 = arith.constant 0 : i32
    return %arg0, %c0_i32, %c0_i32_0 : i32, i32, i32
  }
}

</mosaic_0001>

<bundles_post_ra>
// kernel: beit3_backbone_forward.1
= control target key start
LH: loop header
LB: loop body
LE: loop exit
PB: predicated region body
PF: predicated region fallthrough
CT: control target
= control target key end

     0   :  { %s6703_s0 = inlined_call_operand.vmem [shape: f32[2,17,64], index: 0, kind: input, shape index: {}]   ;;  %s6704_s1 = inlined_call_operand.vmem [shape: f32[64,32], index: 1, kind: input, shape index: {}]   ;;  %s6705_s2 = inlined_call_operand.vmem [shape: f32[17,32], index: 2, kind: input, shape index: {}]   ;;  %s6706_s3 = inlined_call_operand.vmem [shape: f32[2,1,32], index: 3, kind: input, shape index: {}]   ;;  %s6707_s4 = inlined_call_operand.vmem [shape: f32[2,1,32], index: 4, kind: input, shape index: {}]   ;;  %s6708_s5 = inlined_call_operand.vmem [shape: f32[2,32,96], index: 5, kind: input, shape index: {}]   ;;  %s6709_s6 = inlined_call_operand.vmem [shape: f32[2,1,96], index: 6, kind: input, shape index: {}]   ;;  %s6710_s7 = inlined_call_operand.vmem [shape: f32[2,1,32], index: 7, kind: input, shape index: {}]   ;;  %s6711_s8 = inlined_call_operand.vmem [shape: f32[2,1,32], index: 8, kind: input, shape index: {}]   ;;  %s6712_s9 = inlined_call_operand.vmem [shape: f32[2,32,32], index: 9, kind: input, shape index: {}]   ;;  %s6713_s10 = inlined_call_operand.vmem [shape: f32[2,1,32], index: 10, kind: input, shape index: {}]   ;;  %s6714_s11 = inlined_call_operand.vmem [shape: f32[2,1,32], index: 11, kind: input, shape index: {}]   ;;  %s6715_s12 = inlined_call_operand.vmem [shape: f32[2,1,32], index: 12, kind: input, shape index: {}]   ;;  %s6716_s13 = inlined_call_operand.vmem [shape: f32[2,32,128], index: 13, kind: input, shape index: {}]   ;;  %s6717_s14 = inlined_call_operand.vmem [shape: f32[2,1,128], index: 14, kind: input, shape index: {}]   ;;  %s6718_s15 = inlined_call_operand.vmem [shape: f32[2,1,128], index: 15, kind: input, shape index: {}]   ;;  %s6719_s16 = inlined_call_operand.vmem [shape: f32[2,1,128], index: 16, kind: input, shape index: {}]   ;;  %s6720_s17 = inlined_call_operand.vmem [shape: f32[2,128,32], index: 17, kind: input, shape index: {}]   ;;  %s6721_s18 = inlined_call_operand.vmem [shape: f32[2,1,32], index: 18, kind: input, shape index: {}]   ;;  %s6722_s19 = inlined_call_operand.vmem [shape: f32[1,32], index: 19, kind: input, shape index: {}]   ;;  %s6723_s20 = inlined_call_operand.vmem [shape: f32[1,32], index: 20, kind: input, shape index: {}]   ;;  %s6724_s21 = inlined_call_operand.hbm [shape: f32[2,1,32], index: 21, kind: output, shape index: {}]  }
   0x1   :  { %6766 = sst [smem:[#allocation12_spill]] %s6703_s0 }
   0x2   :  { %6767 = sst [smem:[#allocation13_spill]] %s6704_s1 }
   0x3   :  { %6768 = sst [smem:[#allocation14_spill]] %s6705_s2 }
   0x4   :  { %6769 = sst [smem:[#allocation15_spill]] %s6706_s3 }
   0x5   :  { %6770 = sst [smem:[#allocation16_spill]] %s6707_s4 }
   0x6   :  { %6771 = sst [smem:[#allocation17_spill]] %s6708_s5 }
   0x7   :  { %6772 = sst [smem:[#allocation18_spill]] %s6709_s6 }
   0x8   :  { %6773 = sst [smem:[#allocation19_spill]] %s6710_s7 }
   0x9   :  { %6774 = sst [smem:[#allocation20_spill]] %s6711_s8 }
   0xa   :  { %26 = vsyncpa [#allocation4], 0 }
   0xb   :  { %28 = vsyncpa [#allocation4 + $0x1], 0  ;;  %s5448_s2 = smov 0   ;;  %s5450_s25 = smov 0  }
   0xc   :  { %s5452_s26 = smov 0   ;;  %s5454_s27 = smov 0  }
   0xd LB: > { %6775 = sst [smem:[#allocation6_spill]] %s5307_s2  ;;  %s5469_s3 = sadd.s32 4294967295, %s5319_s27   ;;  %s5319_s27 = sphi %s5454_s27, %s6810_s27   ;;  %s5315_s26 = sphi %s5452_s26, %s6812_s26   ;;  %s5311_s25 = sphi %s5450_s25, %s6814_s25   ;;  %s5307_s2 = sphi %s5448_s2, %s6813_s2  }
   0xe   : > { %6776 = sst [smem:[#allocation7_spill]] %s5315_s26  ;;  %s4235_s28 = sadd.s32 4294967294, %s5319_s27  }
   0xf   : > { %6777 = sst [smem:[#allocation8_spill]] %s5319_s27  ;;  %s5473_s29 = sadd.s32 1, %s5319_s27  }
  0x10   : > { %6778 = sst [smem:[#allocation9_spill]] %s5473_s29  ;;  %s487_s0 = sadd.s32 1, %s5315_s26 }
  0x11   : > { %s484_s4 = ssub.s32 %s5319_s27, %s5473_s29  ;;  %p497_p0 = scmp.ne.s32.totalorder %s5315_s26, %s5311_s25 }
  0x12   : > { %p485_p1 = scmp.eq.s32.totalorder %s484_s4, 0  ;;  %p498_p2 = scmp.eq.s32.totalorder %s5469_s3, 1 }
  0x13   : > { %p503_p3 = scmp.ne.s32.totalorder %s5311_s25, %s5307_s2  ;;  %p504_p4 = scmp.eq.s32.totalorder %s4235_s28, 1 }
  0x14   : > { %s5484_s30 = scalar_select %p485_p1, %s5315_s26, %s487_s0  }
  0x15   : > { %p5486_p5 = por %p498_p2, %p497_p0  ;;  %p5490_p6 = por %p504_p4, %p503_p3 }
  0x16   : > { %6779 = sst [smem:[#allocation10_spill]] %s5484_s30  ;;  %p4238_p7 = scmp.ge.s32.totalorder %s5319_s27, 1 }
  0x17   : > { %s6781_s22 = scalar_select %p5490_p6, 1, 0 }
  0x18   : > { %p590_p8 = scmp.lt.s32.totalorder %s5319_s27, 3 }
  0x19   : > { %6782 = sst [smem:[#allocation11_spill]] %s6781_s22 }
  0x1a   : > { %p591_p9 = pnand %p4238_p7, %p590_p8 }
  0x1b   : > { %s6783_s24 = sld [smem:[#allocation13_spill]] (!%p591_p9)  ;;  %p649_p10 = scmp.lt.s32.totalorder (!%p591_p9), %s5469_s3, 1 }
  0x1c   : > { %594 = sbr.rel (%p591_p9) target bundleno = 6823 (0x1aa7), region = 104  ;;  %s6784_s27 = sld [smem:[#allocation12_spill]] (!%p591_p9) }
  0x1d   : > { %s6785_s29 = sld [smem:[#allocation14_spill]] (!%p591_p9)  ;;  %s6762_s28 = smov (!%p591_p9), 96  }
  0x1e   : > { %s6786_s30 = sld [smem:[#allocation17_spill]] (!%p591_p9)  ;;  %s6760_s0 = smov (!%p591_p9), 88  }
  0x1f   : > { %s6789_s22 = sld [smem:[#allocation16_spill]] (!%p591_p9)  ;;  %s6736_s2 = smov (!%p591_p9), 80  }
  0x20   : > { %s6790_s6 = sld [smem:[#allocation18_spill]] (!%p591_p9)  ;;  %s6748_s23 = smov (!%p591_p9), 104  }
  0x21   : > { %v664_v0 = vld [vmem:[%s6783_s24 + $0x38] sm:$0xff]  ;;  %v5321_v1 = vmov 0.0   ;;  %v663_v2 = vld [vmem:[%s6783_s24 + $0x30] sm:$0xff]  ;;  %vm5322_vm0 = vmmov 0   ;;  %v662_v3 = vld [vmem:[%s6783_s24 + $0x28] sm:$0xff]  ;;  %s650_s1 = scalar_select %p649_p10, %s5469_s3, 1 }
  0x22   : > { %4596 = vmatprep.subr.mxu0 %v5321_v1  ;;  %4612 = vmatprep.mubr.msk.f32.mxu0 %vm5322_vm0, %v5321_v1  ;;  %v661_v4 = vld [vmem:[%s6783_s24 + $0x20] sm:$0xff]  ;;  %v660_v5 = vld [vmem:[%s6783_s24 + $0x18] sm:$0xff]  ;;  %v659_v6 = vld [vmem:[%s6783_s24 + $0x10] sm:$0xff]  ;;  %vm668_vm1 = vcmask 523264   ;;  %vm760_vm2 = vcmask 261120   ;;  %vm767_vm3 = vcmask 253952  }
  0x23   : > { %4597 = vmatpush3.msra.mxu0 %v664_v0  ;;  %4638 = vmatprep.subr.mxu1 %v5321_v1  ;;  %s5045_s4 = smul.u32 24, %s650_s1  ;;  %v658_v7 = vld [vmem:[%s6783_s24 + $0x8] sm:$0xff]  ;;  %v657_v8 = vld [vmem:[%s6783_s24] sm:$0xff]  ;;  %v667_v21 = vld [vmem:[%s6785_s29 + $0x10] sm:$0x1]  ;;  %vm932_vm4 = vcmask 64512  }
  0x24   : > { %4598 = vmatprep.subr.mxu0 %v5321_v1  ;;  %4644 = vmatprep.mubr.msk.f32.mxu1 %vm5322_vm0, %v5321_v1  ;;  %v665_v12 = vld [vmem:[%s6785_s29] sm:$0xff]  ;;  %v666_v16 = vld [vmem:[%s6785_s29 + $0x8] sm:$0xff]  ;;  %v823_v42 = vld [vmem:[%s6786_s30 + $0x18] sm:$0xff]  ;;  %vm1080_vm5 = vcmask 1040384   ;;  %vm1028_vm6 = vcmask 138240   ;;  %vm1035_vm7 = vcmask 131072  }
  0x25   : > { %4599 = vmatpush3.msra.mxu0 %v663_v2  ;;  %s653_s26 = scalar_lea.vmem %s6784_s27, %s5045_s4  ;;  %v822_v43 = vld [vmem:[%s6786_s30 + $0x10] sm:$0xff]  ;;  %v821_v44 = vld [vmem:[%s6786_s30 + $0x8] sm:$0xff]  ;;  %v820_v45 = vld [vmem:[%s6786_s30] sm:$0xff]  ;;  %s6738_s27 = smov 112   ;;  %vm1165_vm8 = vcmask 57344   ;;  %vm1415_vm9 = vcmask 130112  }
  0x26   : > { %4600 = vmatprep.subr.mxu0 %v5321_v1  ;;  %v654_v9 = vld [vmem:[%s653_s26] sm:$0xff]  ;;  %v655_v10 = vld [vmem:[%s653_s26 + $0x8] sm:$0xff]  ;;  %v656_v11 = vld [vmem:[%s653_s26 + $0x10] sm:$0x1]  ;;  %s6787_s26 = sld [smem:[#allocation15_spill]]  ;;  %s6756_s4 = smov 72  }
  0x27   : > { %4601 = vmatpush3.msra.mxu0 %v662_v3  ;;  %v4244_v58 = vld [vmem:[%s6789_s22] ss:$0 sm:$0xff]  ;;  %vm1668_vm10 = vcmask 195712   ;;  %vm1921_vm11 = vcmask 261312   ;;  %vm1418_vm12 = vcmask 122944   ;;  %vm1671_vm13 = vcmask 188544  }
  0x28   : > { %4602 = vmatprep.subr.mxu0 %v5321_v1  ;;  %vm1924_vm14 = vcmask 254144   ;;  %s6791_s7 = sld [smem:[#allocation19_spill]]  ;;  %s6793_s24 = smov 96  }
  0x29   : > { %4603 = vmatpush3.msra.mxu0 %v661_v4  ;;  %s6792_s8 = sld [smem:[#allocation20_spill]] }
  0x2a   : > { %4604 = vmatprep.subr.mxu0 %v5321_v1 }
  0x2b   : > { %4605 = vmatpush3.msra.mxu0 %v660_v5 }
  0x2c   : > { %4606 = vmatprep.subr.mxu0 %v5321_v1  ;;  %s6788_s1 = smov %s6787_s26  ;;  %v4243_v56 = vld [vmem:[%s6787_s26] ss:$0 sm:$0xff]  ;;  %s6758_s26 = smov 120  }
  0x2d   : > { %4607 = vmatpush3.msra.mxu0 %v659_v6 }
  0x2e   : > { %4608 = vmatprep.subr.mxu0 %v5321_v1 }
  0x2f   : > { %4609 = vmatpush3.msra.mxu0 %v658_v7 }
  0x30   : > { %4610 = vmatprep.subr.mxu0 %v5321_v1 }
  0x31   : > { %4611 = vmatpush3.msra.mxu0 %v657_v8  ;;  %v4245_v8 = vld [vmem:[%s6790_s6] ss:$0 sm:$0xff] }
  0x32   : > { %4613 = vmatmul.mubr.msk.f32.vlgmr.msra.gmra.mxu0 %vm668_vm1, %v654_v9  ;;  %4621 = vmatprep.subr.mxu0 %v5321_v1 }
  0x33   : > { %4615 = vmatprep.mubr.msk.f32.mxu0 %vm5322_vm0, %v5321_v1  ;;  %4622 = vmatpush3.msra.mxu0 %v823_v42 }
  0x34   : > { %4623 = vmatprep.subr.mxu0 %v5321_v1 }
  0x35   : > { %4624 = vmatpush3.msra.mxu0 %v822_v43 }
  0x36   : > { %4616 = vmatmul.mubr.msk.f32.gmra.mxu0 %vm668_vm1, %v655_v10  ;;  %4625 = vmatprep.subr.mxu0 %v5321_v1 }
  0x37   : > { %4618 = vmatprep.mubr.msk.f32.mxu0 %vm5322_vm0, %v5321_v1  ;;  %4626 = vmatpush3.msra.mxu0 %v821_v44 }
  0x38   : > { %4627 = vmatprep.subr.mxu0 %v5321_v1 }
  0x39   : > { %4628 = vmatpush3.msra.mxu0 %v820_v45 }
  0x3a   : > { %4619 = vmatmul.mubr.msk.f32.gmra.mxu0 %vm668_vm1, %v656_v11  ;;  %4653 = vmatprep.subr.mxu0 %v5321_v1 }
  0x3b   : > { %4629 = vmatprep.mubr.msk.f32.mxu0 %vm5322_vm0, %v5321_v1 }
  0xf2   : > { %v744_v13 = vpop.f32.mrf.mxu0 }
  0xf3   : > { %v5548_v14 = vadd.f32 %v744_v13, %v665_v12 }
  0xf4   : > { %v4614_v15 = vpop.f32.mrf.mxu0 }
  0xf5   : > { %v761_v17 = vsel %vm760_vm2, %v5548_v14, 0.0 }
  0xf6   : > { %762 = vadd.xlane.f32.xlu0 %v761_v17  ;;  %v749_v18 = vpop.f32.mrf.mxu0 }
  0xf7   : > { %v5555_v19 = vadd.f32 %v749_v18, %v666_v16 }
  0xf8   : > { %v4617_v20 = vpop.f32.mrf.mxu0 }
  0xf9   : > { %v764_v22 = vsel %vm760_vm2, %v5555_v19, 0.0 }
  0xfa   : > { %765 = vadd.xlane.f32.xlu0 %v764_v22  ;;  %v754_v23 = vpop.f32.mrf.mxu0 }
  0xfb   : > { %v5562_v24 = vadd.f32 %v754_v23, %v667_v21 }
  0xfc   : > { %v4620_v25 = vpop.f32.mrf.mxu0 }
  0xfd   : > { %v768_v26 = vsel %vm767_vm3, %v5562_v24, 0.0 }
  0xfe   : > { %769 = vadd.xlane.f32.xlu1 %v768_v26 }
 0x17f   : > { %v763_v27 = vpop.xlane.xlu0 %762 }
 0x180   : > { %v772_v28 = vmul.f32 0.03125, %v763_v27 }
 0x182   : > { %v775_v29 = vsub.f32 %v5548_v14, %v772_v28 }
 0x183   : > { %v766_v30 = vpop.xlane.xlu0 %765 }
 0x184   : > { %v773_v31 = vmul.f32 0.03125, %v766_v30  ;;  %v778_v32 = vmul.f32 %v775_v29, %v775_v29 }
 0x186   : > { %v776_v33 = vsub.f32 %v5555_v19, %v773_v31  ;;  %v781_v34 = vsel %vm760_vm2, %v778_v32, 0.0 }
 0x187   : > { %782 = vadd.xlane.f32.xlu1 %v781_v34  ;;  %v770_v35 = vpop.xlane.xlu1 %769 }
 0x188   : > { %v774_v36 = vmul.f32 0.03125, %v770_v35  ;;  %v779_v37 = vmul.f32 %v776_v33, %v776_v33 }
 0x18a   : > { %v777_v38 = vsub.f32 %v5562_v24, %v774_v36  ;;  %v784_v39 = vsel %vm760_vm2, %v779_v37, 0.0 }
 0x18b   : > { %785 = vadd.xlane.f32.xlu0 %v784_v39 }
 0x18c   : > { %v780_v40 = vmul.f32 %v777_v38, %v777_v38 }
 0x18e   : > { %v787_v41 = vsel %vm767_vm3, %v780_v40, 0.0 }
 0x18f   : > { %788 = vadd.xlane.f32.xlu1 %v787_v41 }
 0x210   : > { %v783_v46 = vpop.xlane.xlu1 %782 }
 0x211   : > { %v790_v47 = vmul.f32 0.03125, %v783_v46 }
 0x213   : > { %v793_v48 = vadd.f32 1e-05, %v790_v47 }
 0x214   : > { %v786_v49 = vpop.xlane.xlu0 %785 }
 0x215   : > { %5101 = vrsqrt.f32 %v793_v48  ;;  %v791_v50 = vmul.f32 0.03125, %v786_v49 }
 0x217   : > { %v794_v51 = vadd.f32 1e-05, %v791_v50 }
 0x218   : > { %v789_v52 = vpop.xlane.xlu1 %788 }
 0x219   : > { %5103 = vrsqrt.f32 %v794_v51  ;;  %v792_v53 = vmul.f32 0.03125, %v789_v52 }
 0x21b   : > { %v795_v54 = vadd.f32 1e-05, %v792_v53 }
 0x21d   : > { %5105 = vrsqrt.f32 %v795_v54 }
 0x222   : > { %v5102_v55 = vpop.eup %5101 }
 0x223   : > { %v799_v57 = vmul.f32 %v5102_v55, %v775_v29 }
 0x225   : > { %v808_v59 = vmul.f32 %v4243_v56, %v799_v57 }
 0x226   : > { %v5104_v60 = vpop.eup %5103 }
 0x227   : > { %v817_v61 = vadd.f32 %v4244_v58, %v808_v59  ;;  %v800_v62 = vmul.f32 %v5104_v60, %v776_v33 }
 0x229   : > { %4630 = vmatmul.mubr.msk.f32.vlgmr.msra.gmra.mxu0 %vm760_vm2, %v817_v61  ;;  %v809_v63 = vmul.f32 %v4243_v56, %v800_v62 }
 0x22a   : > { %v5106_v0 = vpop.eup %5105  ;;  %4632 = vmatprep.mubr.msk.f32.mxu0 %vm5322_vm0, %v5321_v1 }
 0x22b   : > { %v818_v2 = vadd.f32 %v4244_v58, %v809_v63  ;;  %v801_v3 = vmul.f32 %v5106_v0, %v777_v38 }
 0x22d   : > { %4633 = vmatmul.mubr.msk.f32.gmra.mxu0 %vm760_vm2, %v818_v2  ;;  %v810_v4 = vmul.f32 %v4243_v56, %v801_v3 }
 0x22e   : > { %4635 = vmatprep.mubr.msk.f32.mxu0 %vm5322_vm0, %v5321_v1 }
 0x22f   : > { %v819_v5 = vadd.f32 %v4244_v58, %v810_v4 }
 0x231   : > { %4636 = vmatmul.mubr.msk.f32.gmra.mxu0 %vm760_vm2, %v819_v5 }
 0x232   : > { %4659 = vmatprep.mubr.msk.f32.mxu0 %vm5322_vm0, %v5321_v1 }
 0x2e9   : > { %v906_v6 = vpop.f32.mrf.mxu0 }
 0x2ea   : > { %v5610_v13 = vadd.f32 %v4245_v8, %v906_v6 }
 0x2eb   : > { %v4631_v7 = vpop.f32.mrf.mxu0 }
 0x2ec   : > { %v920_v17 = vmul.f32 0.35355338, %v5610_v13 }
 0x2ed   : > { %v911_v9 = vpop.f32.mrf.mxu0 }
 0x2ee   : > { %v5606_v10 = vadd.f32 %v4245_v8, %v911_v9 }
 0x2ef   : > { %v4634_v11 = vpop.f32.mrf.mxu0 }
 0x2f0   : > { %928 = vrot.lane.b32.xlu1 %v5606_v10, %s6762_s28  ;;  %v921_v18 = vmul.f32 0.35355338, %v5606_v10 }
 0x2f1   : > { %v916_v12 = vpop.f32.mrf.mxu0 }
 0x2f2   : > { %v5612_v15 = vadd.f32 %v4245_v8, %v916_v12 }
 0x2f3   : > { %v4637_v16 = vpop.f32.mrf.mxu0 }
 0x2f4   : > { %926 = vrot.lane.b32.xlu1 %v5610_v13, %s6762_s28  ;;  %930 = vrot.lane.b32.xlu0 %v5612_v15, %s6762_s28  ;;  %v922_v20 = vmul.f32 0.35355338, %v5612_v15  ;;  %s6794_s28 = smov 88  }
 0x2f8   : > { %1177 = vrot.lane.b32.xlu1 %v5612_v15, %s6760_s0  ;;  %1175 = vrot.lane.b32.xlu0 %v5606_v10, %s6760_s0 }
 0x2fc   : > { %1173 = vrot.lane.b32.xlu1 %v5610_v13, %s6760_s0  ;;  %1167 = vrot.lane.b32.xlu0 %v920_v17, %s6758_s26  ;;  %s6795_s0 = smov 120  }
 0x300   : > { %1430 = vrot.lane.b32.xlu1 %v5612_v15, %s6736_s2  ;;  %1169 = vrot.lane.b32.xlu0 %v921_v18, %s6758_s26 }
 0x304   : > { %1428 = vrot.lane.b32.xlu1 %v5606_v10, %s6736_s2  ;;  %1171 = vrot.lane.b32.xlu0 %v922_v20, %s6758_s26  ;;  %s6796_s26 = smov 80  }
 0x308   : > { %1426 = vrot.lane.b32.xlu1 %v5610_v13, %s6736_s2  ;;  %1420 = vrot.lane.b32.xlu0 %v920_v17, %s6738_s27  ;;  %s6740_s2 = smov 64  }
 0x30c   : > { %1683 = vrot.lane.b32.xlu1 %v5612_v15, %s6756_s4  ;;  %1422 = vrot.lane.b32.xlu0 %v921_v18, %s6738_s27 }
 0x310   : > { %1681 = vrot.lane.b32.xlu1 %v5606_v10, %s6756_s4  ;;  %1424 = vrot.lane.b32.xlu0 %v922_v20, %s6738_s27  ;;  %s6746_s27 = smov 56  }
 0x314   : > { %1679 = vrot.lane.b32.xlu1 %v5610_v13, %s6756_s4  ;;  %1673 = vrot.lane.b32.xlu0 %v920_v17, %s6748_s23  ;;  %s6799_s4 = smov 104  }
 0x318   : > { %1675 = vrot.lane.b32.xlu1 %v921_v18, %s6748_s23  ;;  %1677 = vrot.lane.b32.xlu0 %v922_v20, %s6748_s23  ;;  %s6750_s23 = smov 24  }
 0x31c   : > { %1067 = vrot.lane.b32.xlu1 %v5612_v15, %s6740_s2  ;;  %1065 = vrot.lane.b32.xlu0 %v5606_v10, %s6740_s2 }
 0x320   : > { %1063 = vrot.lane.b32.xlu1 %v5610_v13, %s6740_s2  ;;  %s6742_s2 = smov 48  }
 0x324   : > { %1308 = vrot.lane.b32.xlu1 %v5612_v15, %s6746_s27 }
 0x362   : > { %v929_v21 = vpop.permute.xlu1 %928 }
 0x366   : > { %v927_v22 = vpop.permute.xlu1 %926  ;;  %v931_v23 = vpop.permute.xlu0 %930 }
 0x367   : > { %4639 = vmatpush3.xpose.msk.msra.mxu1 %vm932_vm4, %v931_v23 }
 0x368   : > { %4640 = vmatprep.subr.mxu1 %v5321_v1 }
 0x36a   : > { %v1178_v25 = vpop.permute.xlu1 %1177  ;;  %v1176_v26 = vpop.permute.xlu0 %1175 }
 0x36b   : > { %4641 = vmatpush3.xpose.msk.msra.mxu1 %vm932_vm4, %v929_v21 }
 0x36c   : > { %4642 = vmatprep.subr.mxu1 %v5321_v1 }
 0x36e   : > { %v1174_v27 = vpop.permute.xlu1 %1173  ;;  %v1168_v28 = vpop.permute.xlu0 %1167 }
 0x36f   : > { %4643 = vmatpush3.xpose.msk.msra.mxu1 %vm932_vm4, %v927_v22 }
 0x370   : > { %4668 = vmatprep.subr.mxu1 %v5321_v1 }
 0x372   : > { %v1431_v29 = vpop.permute.xlu1 %1430  ;;  %4645 = vmatmul.mubr.msk.f32.vlgmr.msra.gmra.mxu1 %vm932_vm4, %v920_v17  ;;  %v1170_v30 = vpop.permute.xlu0 %1169 }
 0x373   : > { %4669 = vmatpush3.xpose.msk.msra.mxu1 %vm932_vm4, %v1178_v25  ;;  %4647 = vmatprep.mubr.msk.f32.mxu1 %vm5322_vm0, %v5321_v1 }
 0x374   : > { %4670 = vmatprep.subr.mxu1 %v5321_v1 }
 0x376   : > { %v1429_v31 = vpop.permute.xlu1 %1428  ;;  %4648 = vmatmul.mubr.msk.f32.gmra.mxu1 %vm932_vm4, %v921_v18  ;;  %v1172_v32 = vpop.permute.xlu0 %1171 }
 0x377   : > { %4671 = vmatpush3.xpose.msk.msra.mxu1 %vm932_vm4, %v1176_v26  ;;  %4650 = vmatprep.mubr.msk.f32.mxu1 %vm5322_vm0, %v5321_v1 }
 0x378   : > { %4672 = vmatprep.subr.mxu1 %v5321_v1 }
 0x37a   : > { %v1427_v33 = vpop.permute.xlu1 %1426  ;;  %v1421_v34 = vpop.permute.xlu0 %1420  ;;  %4651 = vmatmul.mubr.msk.f32.gmra.mxu1 %vm932_vm4, %v922_v20 }
 0x37b   : > { %4673 = vmatpush3.xpose.msk.msra.mxu1 %vm932_vm4, %v1174_v27  ;;  %4674 = vmatprep.mubr.msk.f32.mxu1 %vm5322_vm0, %v5321_v1 }
 0x37c   : > { %4698 = vmatprep.subr.mxu1 %v5321_v1 }
 0x37e   : > { %v1684_v35 = vpop.permute.xlu1 %1683  ;;  %v1423_v36 = vpop.permute.xlu0 %1422  ;;  %4675 = vmatmul.mubr.msk.f32.vlgmr.msra.gmra.mxu1 %vm932_vm4, %v1168_v28 }
 0x37f   : > { %4699 = vmatpush3.xpose.msk.msra.mxu1 %vm932_vm4, %v1431_v29  ;;  %4677 = vmatprep.mubr.msk.f32.mxu1 %vm5322_vm0, %v5321_v1 }
 0x380   : > { %4700 = vmatprep.subr.mxu1 %v5321_v1 }
 0x382   : > { %v1682_v37 = vpop.permute.xlu1 %1681  ;;  %v1425_v38 = vpop.permute.xlu0 %1424  ;;  %4678 = vmatmul.mubr.msk.f32.gmra.mxu1 %vm932_vm4, %v1170_v30 }
 0x383   : > { %4701 = vmatpush3.xpose.msk.msra.mxu1 %vm932_vm4, %v1429_v31  ;;  %4680 = vmatprep.mubr.msk.f32.mxu1 %vm5322_vm0, %v5321_v1 }
 0x384   : > { %4702 = vmatprep.subr.mxu1 %v5321_v1 }
 0x386   : > { %v1680_v39 = vpop.permute.xlu1 %1679  ;;  %v1674_v40 = vpop.permute.xlu0 %1673  ;;  %4681 = vmatmul.mubr.msk.f32.gmra.mxu1 %vm932_vm4, %v1172_v32 }
 0x387   : > { %4703 = vmatpush3.xpose.msk.msra.mxu1 %vm932_vm4, %v1427_v33  ;;  %4704 = vmatprep.mubr.msk.f32.mxu1 %vm5322_vm0, %v5321_v1 }
 0x388   : > { %4728 = vmatprep.subr.mxu1 %v5321_v1 }
 0x38a   : > { %v1676_v41 = vpop.permute.xlu1 %1675  ;;  %v1678_v42 = vpop.permute.xlu0 %1677  ;;  %4705 = vmatmul.mubr.msk.f32.vlgmr.msra.gmra.mxu1 %vm932_vm4, %v1421_v34 }
 0x38b   : > { %4729 = vmatpush3.xpose.msk.msra.mxu1 %vm932_vm4, %v1684_v35  ;;  %4707 = vmatprep.mubr.msk.f32.mxu1 %vm5322_vm0, %v5321_v1 }
 0x38c   : > { %4730 = vmatprep.subr.mxu1 %v5321_v1 }
 0x38e   : > { %v1068_v43 = vpop.permute.xlu1 %1067  ;;  %4708 = vmatmul.mubr.msk.f32.gmra.mxu1 %vm932_vm4, %v1423_v36  ;;  %v1066_v44 = vpop.permute.xlu0 %1065 }
 0x38f   : > { %4654 = vmatpush3.msk.msra.mxu0 %vm1080_vm5, %v1068_v43  ;;  %4731 = vmatpush3.xpose.msk.msra.mxu1 %vm932_vm4, %v1682_v37 }
 0x390   : > { %4655 = vmatprep.subr.mxu0 %v5321_v1  ;;  %4710 = vmatprep.mubr.msk.f32.mxu1 %vm5322_vm0, %v5321_v1 }
 0x391   : > { %4656 = vmatpush3.msra.mxu0 %v1066_v44  ;;  %4732 = vmatprep.subr.mxu1 %v5321_v1 }
 0x392   : > { %v1064_v45 = vpop.permute.xlu1 %1063  ;;  %4657 = vmatprep.subr.mxu0 %v5321_v1  ;;  %4711 = vmatmul.mubr.msk.f32.gmra.mxu1 %vm932_vm4, %v1425_v38 }
 0x393   : > { %4658 = vmatpush3.msra.mxu0 %v1064_v45  ;;  %4733 = vmatpush3.xpose.msk.msra.mxu1 %vm932_vm4, %v1680_v39 }
 0x394   : > { %4734 = vmatprep.mubr.msk.f32.mxu1 %vm5322_vm0, %v5321_v1  ;;  %4683 = vmatprep.subr.mxu0 %v5321_v1 }
 0x395   : > { %4758 = vmatprep.subr.mxu1 %v5321_v1 }
 0x396   : > { %4735 = vmatmul.mubr.msk.f32.vlgmr.msra.gmra.mxu1 %vm932_vm4, %v1674_v40  ;;  %v5762_v25 = vpop.permute.xlu1 %1308 }
 0x397   : > { %4737 = vmatprep.mubr.msk.f32.mxu1 %vm5322_vm0, %v5321_v1 }
 0x39a   : > { %4738 = vmatmul.mubr.msk.f32.gmra.mxu1 %vm932_vm4, %v1676_v41 }
 0x39b   : > { %4740 = vmatprep.mubr.msk.f32.mxu1 %vm5322_vm0, %v5321_v1 }
 0x39e   : > { %4741 = vmatmul.mubr.msk.f32.gmra.mxu1 %vm932_vm4, %v1678_v42 }
 0x39f   : > { %4766 = vmatprep.mubr.msk.f32.mxu1 %vm5322_vm0, %v5321_v1 }
 0x432   : > { %v1014_v46 = vpop.f32.mrf.mxu1 }
 0x433   : > { %v1029_v47 = vsel %vm1028_vm6, %v1014_v46, -inf }
 0x434   : > { %1030 = vmax.xlane.f32.xlu1 %v1029_v47  ;;  %v4646_v48 = vpop.f32.mrf.mxu1 }
 0x436   : > { %v1019_v49 = vpop.f32.mrf.mxu1 }
 0x437   : > { %v1032_v50 = vsel %vm1028_vm6, %v1019_v49, -inf }
 0x438   : > { %v4649_v51 = vpop.f32.mrf.mxu1  ;;  %1033 = vmax.xlane.f32.xlu0 %v1032_v50 }
 0x43a   : > { %v5722_v52 = vpop.f32.mrf.mxu1 }
 0x43b   : > { %v1036_v53 = vsel %vm1035_vm7, %v5722_v52, -inf }
 0x43c   : > { %1037 = vmax.xlane.f32.xlu0 %v1036_v53  ;;  %v4652_v54 = vpop.f32.mrf.mxu1 }
 0x43e   : > { %v5726_v55 = vpop.f32.mrf.mxu1 }
 0x43f   : > { %v1271_v56 = vsel %vm1028_vm6, %v5726_v55, -inf }
 0x440   : > { %1272 = vmax.xlane.f32.xlu0 %v1271_v56  ;;  %v4676_v57 = vpop.f32.mrf.mxu1 }
 0x442   : > { %v5730_v58 = vpop.f32.mrf.mxu1 }
 0x443   : > { %v1274_v59 = vsel %vm1028_vm6, %v5730_v58, -inf }
 0x444   : > { %1275 = vmax.xlane.f32.xlu1 %v1274_v59  ;;  %v4679_v60 = vpop.f32.mrf.mxu1 }
 0x446   : > { %v5734_v61 = vpop.f32.mrf.mxu1 }
 0x447   : > { %v1277_v62 = vsel %vm1035_vm7, %v5734_v61, -inf }
 0x448   : > { %1278 = vmax.xlane.f32.xlu0 %v1277_v62  ;;  %v4682_v63 = vpop.f32.mrf.mxu1 }
 0x44a   : > { %v5738_v0 = vpop.f32.mrf.mxu1 }
 0x44b   : > { %v1524_v2 = vsel %vm1028_vm6, %v5738_v0, -inf }
 0x44c   : > { %1525 = vmax.xlane.f32.xlu1 %v1524_v2  ;;  %v4706_v3 = vpop.f32.mrf.mxu1 }
 0x44e   : > { %v5742_v4 = vpop.f32.mrf.mxu1 }
 0x44f   : > { %v1527_v5 = vsel %vm1028_vm6, %v5742_v4, -inf }
 0x450   : > { %1528 = vmax.xlane.f32.xlu0 %v1527_v5  ;;  %v4709_v6 = vpop.f32.mrf.mxu1 }
 0x452   : > { %v1520_v7 = vpop.f32.mrf.mxu1 }
 0x453   : > { %v1530_v8 = vsel %vm1035_vm7, %v1520_v7, -inf }
 0x454   : > { %1531 = vmax.xlane.f32.xlu1 %v1530_v8  ;;  %v4712_v9 = vpop.f32.mrf.mxu1 }
 0x456   : > { %v1763_v11 = vpop.f32.mrf.mxu1 }
 0x457   : > { %v1777_v12 = vsel %vm1028_vm6, %v1763_v11, -inf }
 0x458   : > { %1778 = vmax.xlane.f32.xlu0 %v1777_v12  ;;  %v4736_v16 = vpop.f32.mrf.mxu1 }
 0x45a   : > { %v5748_v17 = vpop.f32.mrf.mxu1 }
 0x45b   : > { %v1780_v22 = vsel %vm1028_vm6, %v5748_v17, -inf }
 0x45c   : > { %v4739_v18 = vpop.f32.mrf.mxu1 }
 0x45e   : > { %v5750_v20 = vpop.f32.mrf.mxu1 }
 0x45f   : > { %v1783_v23 = vsel %vm1035_vm7, %v5750_v20, -inf }
 0x460   : > { %v4742_v21 = vpop.f32.mrf.mxu1 }
 0x465   : > { %1304 = vrot.lane.b32.xlu1 %v5610_v13, %s6746_s27 }
 0x469   : > { %1561 = vrot.lane.b32.xlu1 %v5612_v15, %s6742_s2 }
 0x46e   : > { %1306 = vrot.lane.b32.xlu0 %v5606_v10, %s6746_s27  ;;  %s6752_s27 = smov 16  }
 0x48d   : > { %1781 = vmax.xlane.f32.xlu1 %v1780_v22  ;;  %1784 = vmax.xlane.f32.xlu0 %v1783_v23 }
 0x4bd   : > { %v1031_v26 = vpop.xlane.xlu1 %1030 }
 0x4be   : > { %v1039_v27 = vsub.f32 %v1014_v46, %v1031_v26 }
 0x4c0   : > { %v1042_v28 = vmul.f32 1.442695, %v1039_v27 }
 0x4c1   : > { %v1034_v29 = vpop.xlane.xlu0 %1033 }
 0x4c2   : > { %5107 = vpow2.f32 %v1042_v28  ;;  %v1040_v30 = vsub.f32 %v1019_v49, %v1034_v29 }
 0x4c4   : > { %v1044_v31 = vmul.f32 1.442695, %v1040_v30 }
 0x4c5   : > { %v1038_v36 = vpop.xlane.xlu0 %1037 }
 0x4c6   : > { %5109 = vpow2.f32 %v1044_v31  ;;  %v1041_v37 = vsub.f32 %v5722_v52, %v1038_v36 }
 0x4c8   : > { %v1046_v41 = vmul.f32 1.442695, %v1041_v37 }
 0x4c9   : > { %v1273_v38 = vpop.xlane.xlu0 %1272 }
 0x4ca   : > { %v1280_v40 = vsub.f32 %v5726_v55, %v1273_v38  ;;  %5111 = vpow2.f32 %v1046_v41 }
 0x4cc   : > { %v1283_v44 = vmul.f32 1.442695, %v1280_v40 }
 0x4cd   : > { %v1276_v39 = vpop.xlane.xlu1 %1275 }
 0x4ce   : > { %v1281_v42 = vsub.f32 %v5730_v58, %v1276_v39  ;;  %5113 = vpow2.f32 %v1283_v44 }
 0x4cf   : > { %v5764_v32 = vpop.eup %5107 }
 0x4d0   : > { %v1048_v33 = vsel %vm1028_vm6, %v5764_v32, 0.0  ;;  %v1285_v45 = vmul.f32 1.442695, %v1281_v42 }
 0x4d1   : > { %1049 = vadd.xlane.f32.xlu1 %v1048_v33  ;;  %v1279_v43 = vpop.xlane.xlu0 %1278 }
 0x4d2   : > { %v1282_v46 = vsub.f32 %v5734_v61, %v1279_v43  ;;  %5115 = vpow2.f32 %v1285_v45 }
 0x4d3   : > { %v5768_v34 = vpop.eup %5109 }
 0x4d4   : > { %v1051_v35 = vsel %vm1028_vm6, %v5768_v34, 0.0  ;;  %v1287_v48 = vmul.f32 1.442695, %v1282_v46 }
 0x4d5   : > { %1052 = vadd.xlane.f32.xlu0 %v1051_v35  ;;  %v1526_v47 = vpop.xlane.xlu1 %1525 }
 0x4d6   : > { %v1533_v49 = vsub.f32 %v5738_v0, %v1526_v47  ;;  %5117 = vpow2.f32 %v1287_v48 }
 0x4d7   : > { %v5781_v57 = vpop.eup %5111 }
 0x4d8   : > { %v1536_v52 = vmul.f32 1.442695, %v1533_v49  ;;  %v1054_v60 = vsel %vm1035_vm7, %v5781_v57, 0.0 }
 0x4d9   : > { %v1529_v50 = vpop.xlane.xlu0 %1528 }
 0x4da   : > { %5119 = vpow2.f32 %v1536_v52  ;;  %v1534_v23 = vsub.f32 %v5742_v4, %v1529_v50 }
 0x4db   : > { %v5783_v58 = vpop.eup %5113 }
 0x4dc   : > { %v1289_v63 = vsel %vm1028_vm6, %v5783_v58, 0.0  ;;  %v1538_v28 = vmul.f32 1.442695, %v1534_v23 }
 0x4dd   : > { %v1532_v51 = vpop.xlane.xlu1 %1531 }
 0x4de   : > { %v1535_v53 = vsub.f32 %v1520_v7, %v1532_v51 }
 0x4df   : > { %v5787_v61 = vpop.eup %5115 }
 0x4e0   : > { %v1540_v55 = vmul.f32 1.442695, %v1535_v53  ;;  %v1292_v62 = vsel %vm1028_vm6, %v5787_v61, 0.0 }
 0x4e1   : > { %v1779_v54 = vpop.xlane.xlu0 %1778  ;;  %v1305_v21 = vpop.permute.xlu1 %1304 }
 0x4e2   : > { %1557 = vrot.lane.b32.xlu1 %v5610_v13, %s6742_s2  ;;  %v1786_v56 = vsub.f32 %v1763_v11, %v1779_v54  ;;  %5121 = vpow2.f32 %v1540_v55 }
 0x4e3   : > { %v5793_v0 = vpop.eup %5117 }
 0x4e4   : > { %v1789_v59 = vmul.f32 1.442695, %v1786_v56  ;;  %v1295_v2 = vsel %vm1035_vm7, %v5793_v0, 0.0 }
 0x4e5   : > { %v1307_v7 = vpop.permute.xlu0 %1306  ;;  %v1562_v22 = vpop.permute.xlu1 %1561 }
 0x4e6   : > { %5123 = vpow2.f32 %v1789_v59 }
 0x4e7   : > { %v5797_v3 = vpop.eup %5119 }
 0x4e8   : > { %v1542_v5 = vsel %vm1028_vm6, %v5797_v3, 0.0 }
 0x4eb   : > { %1559 = vrot.lane.b32.xlu0 %v5606_v10, %s6742_s2  ;;  %s6744_s2 = smov 40  }
 0x4ef   : > { %v5801_v6 = vpop.eup %5121 }
 0x4f0   : > { %v1548_v8 = vsel %vm1035_vm7, %v5801_v6, 0.0 }
 0x4f3   : > { %v5805_v9 = vpop.eup %5123 }
 0x4f4   : > { %v1795_v18 = vsel %vm1028_vm6, %v5805_v9, 0.0 }
 0x506   : > { %1055 = vadd.xlane.f32.xlu1 %v1054_v60 }
 0x50a   : > { %1293 = vadd.xlane.f32.xlu1 %v1292_v62  ;;  %1290 = vadd.xlane.f32.xlu0 %v1289_v63 }
 0x50e   : > { %1296 = vadd.xlane.f32.xlu0 %v1295_v2 }
 0x512   : > { %1543 = vadd.xlane.f32.xlu0 %v1542_v5 }
 0x516   : > { %1549 = vadd.xlane.f32.xlu0 %v1548_v8  ;;  %v1785_v11 = vpop.xlane.xlu0 %1784  ;;  %v1782_v26 = vpop.xlane.xlu1 %1781 }
 0x517   : > { %v1788_v12 = vsub.f32 %v5750_v20, %v1785_v11  ;;  %v1787_v20 = vsub.f32 %v5748_v17, %v1782_v26 }
 0x519   : > { %v1793_v16 = vmul.f32 1.442695, %v1788_v12  ;;  %v1791_v30 = vmul.f32 1.442695, %v1787_v20 }
 0x51a   : > { %1796 = vadd.xlane.f32.xlu0 %v1795_v18 }
 0x51b   : > { %1814 = vrot.lane.b32.xlu1 %v5612_v15, %s6744_s2  ;;  %5125 = vpow2.f32 %v1793_v16 }
 0x51c   : > { %5127 = vpow2.f32 %v1538_v28 }
 0x51d   : > { %5129 = vpow2.f32 %v1791_v30 }
 0x528   : > { %v5813_v27 = vpop.eup %5125 }
 0x529   : > { %v1801_v29 = vsel %vm1035_vm7, %v5813_v27, 0.0  ;;  %v5818_v31 = vpop.eup %5127 }
 0x52a   : > { %1802 = vadd.xlane.f32.xlu0 %v1801_v29  ;;  %v1545_v15 = vsel %vm1028_vm6, %v5818_v31, 0.0  ;;  %v5822_v33 = vpop.eup %5129 }
 0x52b   : > { %v1798_v4 = vsel %vm1028_vm6, %v5822_v33, 0.0 }
 0x53f   : > { %1546 = vadd.xlane.f32.xlu1 %v1545_v15 }
 0x540   : > { %1810 = vrot.lane.b32.xlu0 %v5610_v13, %s6744_s2 }
 0x543   : > { %1799 = vadd.xlane.f32.xlu1 %v1798_v4 }
 0x554   : > { %1812 = vrot.lane.b32.xlu1 %v5606_v10, %s6744_s2  ;;  %s6754_s2 = smov 8  }
 0x55a   : > { %v1050_v17 = vpop.xlane.xlu1 %1049 }
 0x55b   : > { %5131 = vrcp.f32 %v1050_v17 }
 0x55e   : > { %v1053_v35 = vpop.xlane.xlu0 %1052  ;;  %v1558_v13 = vpop.permute.xlu1 %1557 }
 0x55f   : > { %5133 = vrcp.f32 %v1053_v35 }
 0x568   : > { %v5132_v36 = vpop.eup %5131 }
 0x569   : > { %v1060_v37 = vmul.f32 %v5132_v36, %v5764_v32 }
 0x56b   : > { %4660 = vmatmul.mubr.msk.f32.vlgmr.msra.gmra.mxu0 %vm1028_vm6, %v1060_v37 }
 0x56c   : > { %v5134_v38 = vpop.eup %5133  ;;  %4684 = vmatpush3.msk.msra.mxu0 %vm1080_vm5, %v5762_v25  ;;  %4662 = vmatprep.mubr.msk.f32.mxu0 %vm5322_vm0, %v5321_v1  ;;  %v1560_v25 = vpop.permute.xlu0 %1559 }
 0x56d   : > { %4685 = vmatprep.subr.mxu0 %v5321_v1  ;;  %v1061_v10 = vmul.f32 %v5134_v38, %v5768_v34 }
 0x56e   : > { %4686 = vmatpush3.msra.mxu0 %v1307_v7 }
 0x56f   : > { %4687 = vmatprep.subr.mxu0 %v5321_v1  ;;  %4663 = vmatmul.mubr.msk.f32.gmra.mxu0 %vm1028_vm6, %v1061_v10 }
 0x570   : > { %4688 = vmatpush3.msra.mxu0 %v1305_v21  ;;  %4665 = vmatprep.mubr.msk.f32.mxu0 %vm5322_vm0, %v5321_v1 }
 0x571   : > { %4713 = vmatprep.subr.mxu0 %v5321_v1 }
 0x58f   : > { %v1056_v32 = vpop.xlane.xlu1 %1055 }
 0x590   : > { %5135 = vrcp.f32 %v1056_v32 }
 0x593   : > { %v1291_v39 = vpop.xlane.xlu0 %1290  ;;  %v1294_v40 = vpop.xlane.xlu1 %1293 }
 0x594   : > { %5137 = vrcp.f32 %v1291_v39 }
 0x595   : > { %5139 = vrcp.f32 %v1294_v40 }
 0x597   : > { %v1297_v34 = vpop.xlane.xlu0 %1296  ;;  %v1815_v52 = vpop.permute.xlu1 %1814 }
 0x598   : > { %5141 = vrcp.f32 %v1297_v34 }
 0x59b   : > { %v1544_v41 = vpop.xlane.xlu0 %1543 }
 0x59c   : > { %5143 = vrcp.f32 %v1544_v41 }
 0x59d   : > { %v5136_v42 = vpop.eup %5135 }
 0x59e   : > { %v1062_v43 = vmul.f32 %v5136_v42, %v5781_v57 }
 0x59f   : > { %v1550_v53 = vpop.xlane.xlu0 %1549 }
 0x5a0   : > { %4666 = vmatmul.mubr.msk.f32.gmra.mxu0 %vm1028_vm6, %v1062_v43 }
 0x5a1   : > { %4689 = vmatprep.mubr.msk.f32.mxu0 %vm5322_vm0, %v5321_v1  ;;  %v5138_v44 = vpop.eup %5137 }
 0x5a2   : > { %v1301_v45 = vmul.f32 %v5138_v44, %v5783_v58  ;;  %v5140_v46 = vpop.eup %5139 }
 0x5a3   : > { %v1302_v47 = vmul.f32 %v5140_v46, %v5787_v61  ;;  %v1797_v54 = vpop.xlane.xlu0 %1796 }
 0x5a4   : > { %4690 = vmatmul.mubr.msk.f32.vlgmr.msra.gmra.mxu0 %vm1028_vm6, %v1301_v45 }
 0x5a5   : > { %4714 = vmatpush3.msk.msra.mxu0 %vm1080_vm5, %v1562_v22  ;;  %4692 = vmatprep.mubr.msk.f32.mxu0 %vm5322_vm0, %v5321_v1  ;;  %v5142_v48 = vpop.eup %5141 }
 0x5a6   : > { %4715 = vmatprep.subr.mxu0 %v5321_v1  ;;  %v1303_v49 = vmul.f32 %v5142_v48, %v5793_v0 }
 0x5a7   : > { %4716 = vmatpush3.msra.mxu0 %v1560_v25 }
 0x5a8   : > { %4717 = vmatprep.subr.mxu0 %v5321_v1  ;;  %4693 = vmatmul.mubr.msk.f32.gmra.mxu0 %vm1028_vm6, %v1302_v47 }
 0x5a9   : > { %4718 = vmatpush3.msra.mxu0 %v1558_v13  ;;  %4695 = vmatprep.mubr.msk.f32.mxu0 %vm5322_vm0, %v5321_v1  ;;  %v5144_v50 = vpop.eup %5143 }
 0x5aa   : > { %4743 = vmatprep.subr.mxu0 %v5321_v1  ;;  %v1554_v51 = vmul.f32 %v5144_v50, %v5797_v3 }
 0x5ac   : > { %4696 = vmatmul.mubr.msk.f32.gmra.mxu0 %vm1028_vm6, %v1303_v49 }
 0x5ad   : > { %4719 = vmatprep.mubr.msk.f32.mxu0 %vm5322_vm0, %v5321_v1 }
 0x5b0   : > { %4720 = vmatmul.mubr.msk.f32.vlgmr.msra.gmra.mxu0 %vm1028_vm6, %v1554_v51 }
 0x5b1   : > { %4744 = vmatpush3.msk.msra.mxu0 %vm1080_vm5, %v1815_v52  ;;  %4722 = vmatprep.mubr.msk.f32.mxu0 %vm5322_vm0, %v5321_v1 }
 0x5b2   : > { %4745 = vmatprep.subr.mxu0 %v5321_v1 }
 0x5b3   : > { %v1803_v56 = vpop.xlane.xlu0 %1802 }
 0x5b7   : > { %v1811_v59 = vpop.permute.xlu0 %1810 }
 0x5c8   : > { %v1547_v55 = vpop.xlane.xlu1 %1546 }
 0x5c9   : > { %5145 = vrcp.f32 %v1547_v55 }
 0x5ca   : > { %5147 = vrcp.f32 %v1550_v53 }
 0x5cb   : > { %5149 = vrcp.f32 %v1797_v54 }
 0x5cc   : > { %v1800_v57 = vpop.xlane.xlu1 %1799 }
 0x5cd   : > { %5151 = vrcp.f32 %v1800_v57 }
 0x5ce   : > { %5153 = vrcp.f32 %v1803_v56 }
 0x5d0   : > { %v1813_v58 = vpop.permute.xlu1 %1812 }
 0x5d1   : > { %4746 = vmatpush3.msra.mxu0 %v1813_v58 }
 0x5d2   : > { %4747 = vmatprep.subr.mxu0 %v5321_v1 }
 0x5d3   : > { %4748 = vmatpush3.msra.mxu0 %v1811_v59 }
 0x5d4   : > { %4775 = vmatprep.subr.mxu0 %v5321_v1 }
 0x5d6   : > { %v5146_v60 = vpop.eup %5145 }
 0x5d7   : > { %v1555_v61 = vmul.f32 %v5146_v60, %v5818_v31  ;;  %v5148_v62 = vpop.eup %5147 }
 0x5d8   : > { %v1556_v63 = vmul.f32 %v5148_v62, %v5801_v6  ;;  %v5150_v0 = vpop.eup %5149 }
 0x5d9   : > { %4723 = vmatmul.mubr.msk.f32.gmra.mxu0 %vm1028_vm6, %v1555_v61  ;;  %v1807_v2 = vmul.f32 %v5150_v0, %v5805_v9  ;;  %v1991_v0 = vld [vmem:[%s6712_s9 + $0x18] sm:$0xff] }
 0x5da   : > { %4725 = vmatprep.mubr.msk.f32.mxu0 %vm5322_vm0, %v5321_v1  ;;  %v5152_v3 = vpop.eup %5151  ;;  %4759 = vmatpush3.msra.mxu1 %v1991_v0 }
 0x5db   : > { %v1808_v5 = vmul.f32 %v5152_v3, %v5822_v33  ;;  %v5154_v7 = vpop.eup %5153  ;;  %4760 = vmatprep.subr.mxu1 %v5321_v1  ;;  %v1989_v3 = vld [vmem:[%s6712_s9 + $0x8] sm:$0xff] }
 0x5dc   : > { %v1809_v6 = vmul.f32 %v5154_v7, %v5813_v27 }
 0x5dd   : > { %4726 = vmatmul.mubr.msk.f32.gmra.mxu0 %vm1028_vm6, %v1556_v63 }
 0x5de   : > { %4749 = vmatprep.mubr.msk.f32.mxu0 %vm5322_vm0, %v5321_v1 }
 0x5e1   : > { %4750 = vmatmul.mubr.msk.f32.vlgmr.msra.gmra.mxu0 %vm1028_vm6, %v1807_v2  ;;  %v1990_v2 = vld [vmem:[%s6712_s9 + $0x10] sm:$0xff] }
 0x5e2   : > { %4752 = vmatprep.mubr.msk.f32.mxu0 %vm5322_vm0, %v5321_v1  ;;  %4761 = vmatpush3.msra.mxu1 %v1990_v2 }
 0x5e3   : > { %4762 = vmatprep.subr.mxu1 %v5321_v1 }
 0x5e4   : > { %4763 = vmatpush3.msra.mxu1 %v1989_v3 }
 0x5e5   : > { %4753 = vmatmul.mubr.msk.f32.gmra.mxu0 %vm1028_vm6, %v1808_v5  ;;  %v1988_v5 = vld [vmem:[%s6712_s9] sm:$0xff]  ;;  %4764 = vmatprep.subr.mxu1 %v5321_v1 }
 0x5e6   : > { %4755 = vmatprep.mubr.msk.f32.mxu0 %vm5322_vm0, %v5321_v1  ;;  %4765 = vmatpush3.msra.mxu1 %v1988_v5 }
 0x5e7   : > { %4792 = vmatprep.subr.mxu1 %v5321_v1 }
 0x5e9   : > { %4756 = vmatmul.mubr.msk.f32.gmra.mxu0 %vm1028_vm6, %v1809_v6 }
 0x5ea   : > { %4783 = vmatprep.mubr.msk.f32.mxu0 %vm5322_vm0, %v5321_v1 }
 0x62b   : > { %v1149_v8 = vpop.f32.mrf.mxu0 }
 0x62c   : > { %1163 = vst.msk [vmem:[#allocation2] sm:$0xff] %vm932_vm4, %v1149_v8 }
 0x62d   : > { %v4661_v9 = vpop.f32.mrf.mxu0 }
 0x62f   : > { %v1154_v11 = vpop.f32.mrf.mxu0 }
 0x630   : > { %1164 = vst.msk [vmem:[#allocation2 + $0x8] sm:$0xff] %vm932_vm4, %v1154_v11 }
 0x631   : > { %v4664_v12 = vpop.f32.mrf.mxu0 }
 0x660   : > { %v1159_v16 = vpop.f32.mrf.mxu0 }
 0x661   : > { %1166 = vst.msk [vmem:[#allocation2 + $0x10] sm:$0x1] %vm1165_vm8, %v1159_v16 }
 0x662   : > { %v4667_v18 = vpop.f32.mrf.mxu0 }
 0x664   : > { %v1389_v21 = vpop.f32.mrf.mxu0 }
 0x665   : > { %1406 = vrot.lane.b32.xlu1 %v1389_v21, %s6754_s2 }
 0x666   : > { %v4691_v22 = vpop.f32.mrf.mxu0 }
 0x668   : > { %v1394_v23 = vpop.f32.mrf.mxu0 }
 0x669   : > { %1408 = vrot.lane.b32.xlu0 %v1394_v23, %s6754_s2  ;;  %v4289_v23 = vld [vmem:[%s6791_s7] ss:$0 sm:$0xff] }
 0x66a   : > { %v4694_v26 = vpop.f32.mrf.mxu0 }
 0x66c   : > { %v1399_v27 = vpop.f32.mrf.mxu0 }
 0x66e   : > { %v4697_v28 = vpop.f32.mrf.mxu0 }
 0x670   : > { %v1642_v20 = vpop.f32.mrf.mxu0 }
 0x671   : > { %1659 = vrot.lane.b32.xlu0 %v1642_v20, %s6752_s27 }
 0x672   : > { %v4721_v29 = vpop.f32.mrf.mxu0 }
 0x699   : > { %v1647_v30 = vpop.f32.mrf.mxu0 }
 0x69a   : > { %1661 = vrot.lane.b32.xlu1 %v1647_v30, %s6752_s27 }
 0x69b   : > { %v4724_v31 = vpop.f32.mrf.mxu0 }
 0x69d   : > { %v1652_v15 = vpop.f32.mrf.mxu0 }
 0x69f   : > { %v4727_v33 = vpop.f32.mrf.mxu0 }
 0x6a1   : > { %v1895_v4 = vpop.f32.mrf.mxu0 }
 0x6a2   : > { %1912 = vrot.lane.b32.xlu1 %v1895_v4, %s6750_s23 }
 0x6a3   : > { %v4751_v17 = vpop.f32.mrf.mxu0 }
 0x6a5   : > { %v1900_v35 = vpop.f32.mrf.mxu0 }
 0x6a6   : > { %1410 = vrot.lane.b32.xlu1 %v1399_v27, %s6754_s2  ;;  %1914 = vrot.lane.b32.xlu0 %v1900_v35, %s6750_s23  ;;  %v4290_v27 = vld [vmem:[%s6792_s8] ss:$0 sm:$0xff]  ;;  %s6797_s2 = smov 112  }
 0x6a7   : > { %v4754_v36 = vpop.f32.mrf.mxu0 }
 0x6a8   : > { %v4291_v36 = vld [vmem:[%s6713_s10] ss:$0 sm:$0xff] }
 0x6a9   : > { %v1905_v37 = vpop.f32.mrf.mxu0 }
 0x6aa   : > { %1663 = vrot.lane.b32.xlu0 %v1652_v15, %s6752_s27  ;;  %1916 = vrot.lane.b32.xlu1 %v1905_v37, %s6750_s23  ;;  %s6798_s27 = smov 72   ;;  %s6800_s23 = smov 64  }
 0x6ab   : > { %v4757_v38 = vpop.f32.mrf.mxu0 }
 0x6d7   : > { %v1407_v10 = vpop.permute.xlu1 %1406 }
 0x6d8   : > { %1416 = vst.msk [vmem:[#allocation2] sm:$0xff] %vm1415_vm9, %v1407_v10 }
 0x6db   : > { %v1409_v13 = vpop.permute.xlu0 %1408 }
 0x6dc   : > { %1417 = vst.msk [vmem:[#allocation2 + $0x8] sm:$0xff] %vm1415_vm9, %v1409_v13 }
 0x6e3   : > { %v1660_v25 = vpop.permute.xlu0 %1659 }
 0x6e4   : > { %1669 = vst.msk [vmem:[#allocation2] sm:$0xff] %vm1668_vm10, %v1660_v25 }
 0x70c   : > { %v1662_v32 = vpop.permute.xlu1 %1661 }
 0x70d   : > { %1670 = vst.msk [vmem:[#allocation2 + $0x8] sm:$0xff] %vm1668_vm10, %v1662_v32 }
 0x714   : > { %v1913_v39 = vpop.permute.xlu1 %1912 }
 0x715   : > { %1922 = vst.msk [vmem:[#allocation2] sm:$0xff] %vm1921_vm11, %v1913_v39 }
 0x718   : > { %v1411_v40 = vpop.permute.xlu1 %1410  ;;  %v1915_v34 = vpop.permute.xlu0 %1914 }
 0x719   : > { %1419 = vst.msk [vmem:[#allocation2 + $0x10] sm:$0x1] %vm1418_vm12, %v1411_v40 }
 0x71a   : > { %1923 = vst.msk [vmem:[#allocation2 + $0x8] sm:$0xff] %vm1921_vm11, %v1915_v34 }
 0x71c   : > { %v1664_v41 = vpop.permute.xlu0 %1663  ;;  %v1917_v42 = vpop.permute.xlu1 %1916  ;;  %v1926_v43 = vld [vmem:[#allocation2] sm:$0xff] }
 0x71d   : > { %1672 = vst.msk [vmem:[#allocation2 + $0x10] sm:$0x1] %vm1671_vm13, %v1664_v41  ;;  %v1931_v44 = vsel %vm760_vm2, %v1926_v43, 0.0 }
 0x71e   : > { %1925 = vst.msk [vmem:[#allocation2 + $0x10] sm:$0x1] %vm1924_vm14, %v1917_v42  ;;  %1932 = vadd.xlane.f32.xlu0 %v1931_v44 }
 0x721   : > { %v1927_v45 = vld [vmem:[#allocation2 + $0x8] sm:$0xff] }
 0x722   : > { %v1934_v46 = vsel %vm760_vm2, %v1927_v45, 0.0 }
 0x723   : > { %1935 = vadd.xlane.f32.xlu1 %v1934_v46 }
 0x725   : > { %v1928_v47 = vld [vmem:[#allocation2 + $0x10] sm:$0x1] }
 0x726   : > { %v1937_v48 = vsel %vm767_vm3, %v1928_v47, 0.0 }
 0x727   : > { %1938 = vadd.xlane.f32.xlu0 %v1937_v48 }
 0x7a7   : > { %v1933_v49 = vpop.xlane.xlu0 %1932 }
 0x7a8   : > { %v1940_v50 = vmul.f32 0.03125, %v1933_v49 }
 0x7aa   : > { %v1943_v51 = vsub.f32 %v1926_v43, %v1940_v50 }
 0x7ac   : > { %v1936_v52 = vpop.xlane.xlu1 %1935  ;;  %v1946_v54 = vmul.f32 %v1943_v51, %v1943_v51 }
 0x7ad   : > { %v1941_v53 = vmul.f32 0.03125, %v1936_v52 }
 0x7ae   : > { %v1949_v56 = vsel %vm760_vm2, %v1946_v54, 0.0 }
 0x7af   : > { %v1944_v55 = vsub.f32 %v1927_v45, %v1941_v53  ;;  %1950 = vadd.xlane.f32.xlu0 %v1949_v56 }
 0x7b0   : > { %v1939_v57 = vpop.xlane.xlu0 %1938 }
 0x7b1   : > { %v1947_v58 = vmul.f32 %v1944_v55, %v1944_v55  ;;  %v1942_v59 = vmul.f32 0.03125, %v1939_v57 }
 0x7b3   : > { %v1952_v60 = vsel %vm760_vm2, %v1947_v58, 0.0  ;;  %v1945_v61 = vsub.f32 %v1928_v47, %v1942_v59  ;;  %v2153_v59 = vld [vmem:[%s6716_s13 + $0x18] sm:$0xff] }
 0x7b4   : > { %1953 = vadd.xlane.f32.xlu0 %v1952_v60  ;;  %4776 = vmatpush3.msra.mxu0 %v2153_v59  ;;  %v2152_v60 = vld [vmem:[%s6716_s13 + $0x10] sm:$0xff] }
 0x7b5   : > { %v1948_v62 = vmul.f32 %v1945_v61, %v1945_v61  ;;  %4777 = vmatprep.subr.mxu0 %v5321_v1 }
 0x7b6   : > { %4778 = vmatpush3.msra.mxu0 %v2152_v60 }
 0x7b7   : > { %v1955_v63 = vsel %vm767_vm3, %v1948_v62, 0.0  ;;  %4779 = vmatprep.subr.mxu0 %v5321_v1  ;;  %v2150_v62 = vld [vmem:[%s6716_s13] sm:$0xff] }
 0x7b8   : > { %1956 = vadd.xlane.f32.xlu1 %v1955_v63 }
 0x838   : > { %v1951_v7 = vpop.xlane.xlu0 %1950 }
 0x839   : > { %v1958_v6 = vmul.f32 0.03125, %v1951_v7 }
 0x83b   : > { %v1961_v8 = vadd.f32 1e-05, %v1958_v6 }
 0x83d   : > { %v1954_v9 = vpop.xlane.xlu0 %1953  ;;  %5155 = vrsqrt.f32 %v1961_v8 }
 0x83e   : > { %v1959_v11 = vmul.f32 0.03125, %v1954_v9 }
 0x840   : > { %v1962_v12 = vadd.f32 1e-05, %v1959_v11 }
 0x841   : > { %v1957_v16 = vpop.xlane.xlu1 %1956 }
 0x842   : > { %5157 = vrsqrt.f32 %v1962_v12  ;;  %v1960_v18 = vmul.f32 0.03125, %v1957_v16  ;;  %v4295_v12 = vld [vmem:[%s6714_s11] ss:$0 sm:$0xff] }
 0x844   : > { %v1963_v21 = vadd.f32 1e-05, %v1960_v18  ;;  %v4296_v18 = vld [vmem:[%s6715_s12] ss:$0 sm:$0xff] }
 0x846   : > { %5159 = vrsqrt.f32 %v1963_v21 }
 0x84a   : > { %v5156_v22 = vpop.eup %5155 }
 0x84b   : > { %v1967_v26 = vmul.f32 %v5156_v22, %v1943_v51 }
 0x84d   : > { %v1976_v28 = vmul.f32 %v4289_v23, %v1967_v26 }
 0x84f   : > { %v5158_v20 = vpop.eup %5157  ;;  %v1985_v29 = vadd.f32 %v4290_v27, %v1976_v28 }
 0x850   : > { %v1968_v30 = vmul.f32 %v5158_v20, %v1944_v55 }
 0x851   : > { %4767 = vmatmul.mubr.msk.f32.vlgmr.msra.gmra.mxu1 %vm760_vm2, %v1985_v29 }
 0x852   : > { %v1977_v31 = vmul.f32 %v4289_v23, %v1968_v30  ;;  %4769 = vmatprep.mubr.msk.f32.mxu1 %vm5322_vm0, %v5321_v1 }
 0x853   : > { %v5160_v15 = vpop.eup %5159 }
 0x854   : > { %v1986_v33 = vadd.f32 %v4290_v27, %v1977_v31  ;;  %v1969_v4 = vmul.f32 %v5160_v15, %v1945_v61  ;;  %v2151_v61 = vld [vmem:[%s6716_s13 + $0x8] sm:$0xff]  ;;  %v4297_v15 = vld [vmem:[%s6717_s14] ss:$0 sm:$0xff] }
 0x855   : > { %4780 = vmatpush3.msra.mxu0 %v2151_v61 }
 0x856   : > { %4770 = vmatmul.mubr.msk.f32.gmra.mxu1 %vm760_vm2, %v1986_v33  ;;  %v1978_v17 = vmul.f32 %v4289_v23, %v1969_v4  ;;  %4781 = vmatprep.subr.mxu0 %v5321_v1 }
 0x857   : > { %4772 = vmatprep.mubr.msk.f32.mxu1 %vm5322_vm0, %v5321_v1  ;;  %4782 = vmatpush3.msra.mxu0 %v2150_v62 }
 0x858   : > { %v1987_v35 = vadd.f32 %v4290_v27, %v1978_v17  ;;  %4833 = vmatprep.subr.mxu0 %v5321_v1 }
 0x85a   : > { %4773 = vmatmul.mubr.msk.f32.gmra.mxu1 %vm760_vm2, %v1987_v35 }
 0x85b   : > { %4824 = vmatprep.mubr.msk.f32.mxu1 %vm5322_vm0, %v5321_v1 }
 0x911   : > { %v2074_v37 = vpop.f32.mrf.mxu1 }
 0x912   : > { %v2075_v38 = vadd.f32 %v4291_v36, %v2074_v37 }
 0x913   : > { %v4768_v10 = vpop.f32.mrf.mxu1 }
 0x914   : > { %v5953_v13 = vadd.f32 %v2075_v38, %v5548_v14 }
 0x916   : > { %v2079_v25 = vpop.f32.mrf.mxu1  ;;  %v2093_v39 = vsel %vm760_vm2, %v5953_v13, 0.0 }
 0x917   : > { %v2080_v32 = vadd.f32 %v4291_v36, %v2079_v25  ;;  %2094 = vadd.xlane.f32.xlu0 %v2093_v39 }
 0x918   : > { %v4771_v40 = vpop.f32.mrf.mxu1 }
 0x919   : > { %v5958_v34 = vadd.f32 %v2080_v32, %v5555_v19 }
 0x91a   : > { %v2084_v41 = vpop.f32.mrf.mxu1 }
 0x91b   : > { %v2096_v42 = vsel %vm760_vm2, %v5958_v34, 0.0  ;;  %v2085_v43 = vadd.f32 %v4291_v36, %v2084_v41 }
 0x91c   : > { %2097 = vadd.xlane.f32.xlu1 %v2096_v42  ;;  %v4774_v44 = vpop.f32.mrf.mxu1 }
 0x91d   : > { %v5963_v14 = vadd.f32 %v2085_v43, %v5562_v24 }
 0x91f   : > { %v2099_v45 = vsel %vm767_vm3, %v5963_v14, 0.0 }
 0x920   : > { %2100 = vadd.xlane.f32.xlu0 %v2099_v45 }
 0x9a0   : > { %v2095_v46 = vpop.xlane.xlu0 %2094 }
 0x9a1   : > { %v2102_v47 = vmul.f32 0.03125, %v2095_v46 }
 0x9a3   : > { %v2105_v48 = vsub.f32 %v5953_v13, %v2102_v47 }
 0x9a5   : > { %v2098_v19 = vpop.xlane.xlu1 %2097  ;;  %v2108_v50 = vmul.f32 %v2105_v48, %v2105_v48 }
 0x9a6   : > { %v2103_v49 = vmul.f32 0.03125, %v2098_v19 }
 0x9a7   : > { %v2111_v52 = vsel %vm760_vm2, %v2108_v50, 0.0 }
 0x9a8   : > { %v2106_v51 = vsub.f32 %v5958_v34, %v2103_v49  ;;  %2112 = vadd.xlane.f32.xlu1 %v2111_v52 }
 0x9a9   : > { %v2101_v53 = vpop.xlane.xlu0 %2100 }
 0x9aa   : > { %v2109_v54 = vmul.f32 %v2106_v51, %v2106_v51  ;;  %v2104_v24 = vmul.f32 0.03125, %v2101_v53 }
 0x9ac   : > { %v2114_v55 = vsel %vm760_vm2, %v2109_v54, 0.0  ;;  %v2107_v56 = vsub.f32 %v5963_v14, %v2104_v24 }
 0x9ad   : > { %2115 = vadd.xlane.f32.xlu0 %v2114_v55 }
 0x9ae   : > { %v2110_v57 = vmul.f32 %v2107_v56, %v2107_v56 }
 0x9b0   : > { %v2117_v58 = vsel %vm767_vm3, %v2110_v57, 0.0 }
 0x9b1   : > { %2118 = vadd.xlane.f32.xlu1 %v2117_v58 }
 0xa31   : > { %v2113_v63 = vpop.xlane.xlu1 %2112 }
 0xa32   : > { %v2120_v0 = vmul.f32 0.03125, %v2113_v63 }
 0xa34   : > { %v2123_v2 = vadd.f32 1e-05, %v2120_v0  ;;  %v2348_v0 = vld [vmem:[%s6720_s17 + $0x78] sm:$0xff] }
 0xa35   : > { %4793 = vmatpush3.msra.mxu1 %v2348_v0 }
 0xa36   : > { %v2116_v3 = vpop.xlane.xlu0 %2115  ;;  %5161 = vrsqrt.f32 %v2123_v2  ;;  %v2347_v2 = vld [vmem:[%s6720_s17 + $0x70] sm:$0xff]  ;;  %4794 = vmatprep.subr.mxu1 %v5321_v1 }
 0xa37   : > { %v2121_v5 = vmul.f32 0.03125, %v2116_v3  ;;  %v2346_v3 = vld [vmem:[%s6720_s17 + $0x68] sm:$0xff]  ;;  %4795 = vmatpush3.msra.mxu1 %v2347_v2 }
 0xa38   : > { %4796 = vmatprep.subr.mxu1 %v5321_v1 }
 0xa39   : > { %v2124_v7 = vadd.f32 1e-05, %v2121_v5  ;;  %v2345_v5 = vld [vmem:[%s6720_s17 + $0x60] sm:$0xff]  ;;  %4797 = vmatpush3.msra.mxu1 %v2346_v3 }
 0xa3a   : > { %v2119_v6 = vpop.xlane.xlu1 %2118  ;;  %4798 = vmatprep.subr.mxu1 %v5321_v1 }
 0xa3b   : > { %5163 = vrsqrt.f32 %v2124_v7  ;;  %v2122_v8 = vmul.f32 0.03125, %v2119_v6  ;;  %4799 = vmatpush3.msra.mxu1 %v2345_v5 }
 0xa3c   : > { %4800 = vmatprep.subr.mxu1 %v5321_v1 }
 0xa3d   : > { %v2125_v9 = vadd.f32 1e-05, %v2122_v8 }
 0xa3f   : > { %5165 = vrsqrt.f32 %v2125_v9 }
 0xa43   : > { %v5162_v11 = vpop.eup %5161 }
 0xa44   : > { %v2129_v16 = vmul.f32 %v5162_v11, %v2105_v48 }
 0xa46   : > { %v2138_v21 = vmul.f32 %v4295_v12, %v2129_v16 }
 0xa48   : > { %v5164_v22 = vpop.eup %5163  ;;  %v2147_v23 = vadd.f32 %v4296_v18, %v2138_v21 }
 0xa49   : > { %v2130_v26 = vmul.f32 %v5164_v22, %v2106_v51 }
 0xa4a   : > { %4784 = vmatmul.mubr.msk.f32.vlgmr.msra.gmra.mxu0 %vm760_vm2, %v2147_v23 }
 0xa4b   : > { %v2139_v27 = vmul.f32 %v4295_v12, %v2130_v26  ;;  %4786 = vmatprep.mubr.msk.f32.mxu0 %vm5322_vm0, %v5321_v1 }
 0xa4c   : > { %v5166_v28 = vpop.eup %5165 }
 0xa4d   : > { %v2148_v20 = vadd.f32 %v4296_v18, %v2139_v27  ;;  %v2131_v29 = vmul.f32 %v5166_v28, %v2107_v56  ;;  %v2344_v28 = vld [vmem:[%s6720_s17 + $0x58] sm:$0xff] }
 0xa4e   : > { %4801 = vmatpush3.msra.mxu1 %v2344_v28 }
 0xa4f   : > { %4787 = vmatmul.mubr.msk.f32.gmra.mxu0 %vm760_vm2, %v2148_v20  ;;  %v2140_v30 = vmul.f32 %v4295_v12, %v2131_v29  ;;  %4802 = vmatprep.subr.mxu1 %v5321_v1  ;;  %v2343_v20 = vld [vmem:[%s6720_s17 + $0x50] sm:$0xff]  ;;  %v2342_v29 = vld [vmem:[%s6720_s17 + $0x48] sm:$0xff] }
 0xa50   : > { %4789 = vmatprep.mubr.msk.f32.mxu0 %vm5322_vm0, %v5321_v1  ;;  %4803 = vmatpush3.msra.mxu1 %v2343_v20 }
 0xa51   : > { %v2149_v31 = vadd.f32 %v4296_v18, %v2140_v30  ;;  %4804 = vmatprep.subr.mxu1 %v5321_v1  ;;  %v2341_v30 = vld [vmem:[%s6720_s17 + $0x40] sm:$0xff] }
 0xa52   : > { %4805 = vmatpush3.msra.mxu1 %v2342_v29 }
 0xa53   : > { %4790 = vmatmul.mubr.msk.f32.gmra.mxu0 %vm760_vm2, %v2149_v31  ;;  %4806 = vmatprep.subr.mxu1 %v5321_v1  ;;  %v2340_v31 = vld [vmem:[%s6720_s17 + $0x38] sm:$0xff] }
 0xa54   : > { %4841 = vmatprep.mubr.msk.f32.mxu0 %vm5322_vm0, %v5321_v1  ;;  %4807 = vmatpush3.msra.mxu1 %v2341_v30  ;;  %v4311_v30 = vld [vmem:[%s6786_s30 + $0x38] sm:$0xff] }
 0xa55   : > { %4808 = vmatprep.subr.mxu1 %v5321_v1  ;;  %4834 = vmatpush3.msra.mxu0 %v4311_v30 }
 0xa56   : > { %4809 = vmatpush3.msra.mxu1 %v2340_v31  ;;  %4835 = vmatprep.subr.mxu0 %v5321_v1  ;;  %v4310_v31 = vld [vmem:[%s6786_s30 + $0x30] sm:$0xff] }
 0xa57   : > { %4810 = vmatprep.subr.mxu1 %v5321_v1  ;;  %4836 = vmatpush3.msra.mxu0 %v4310_v31 }
 0xa58   : > { %4837 = vmatprep.subr.mxu0 %v5321_v1 }
 0xb0a   : > { %v2236_v33 = vpop.f32.mrf.mxu0 }
 0xb0b   : > { %v2237_v4 = vadd.f32 %v4297_v15, %v2236_v33  ;;  %v2338_v33 = vld [vmem:[%s6720_s17 + $0x28] sm:$0xff] }
 0xb0c   : > { %v4785_v17 = vpop.f32.mrf.mxu0 }
 0xb0d   : > { %v2253_v35 = vmul.f32 0.044715, %v2237_v4  ;;  %v2256_v36 = vmul.f32 %v2237_v4, %v2237_v4  ;;  %v2250_v53 = vmul.f32 0.5, %v2237_v4  ;;  %v2336_v17 = vld [vmem:[%s6720_s17 + $0x18] sm:$0xff] }
 0xb0f   : > { %v2241_v37 = vpop.f32.mrf.mxu0  ;;  %v2259_v10 = vmul.f32 %v2256_v36, %v2253_v35  ;;  %v2335_v35 = vld [vmem:[%s6720_s17 + $0x10] sm:$0xff]  ;;  %v2334_v36 = vld [vmem:[%s6720_s17 + $0x8] sm:$0xff] }
 0xb10   : > { %v2242_v38 = vadd.f32 %v4297_v15, %v2241_v37  ;;  %v2333_v37 = vld [vmem:[%s6720_s17] sm:$0xff] }
 0xb11   : > { %v4788_v25 = vpop.f32.mrf.mxu0  ;;  %v2262_v40 = vadd.f32 %v2259_v10, %v2237_v4  ;;  %v2337_v4 = vld [vmem:[%s6720_s17 + $0x20] sm:$0xff] }
 0xb12   : > { %v2254_v32 = vmul.f32 0.044715, %v2242_v38  ;;  %v2257_v39 = vmul.f32 %v2242_v38, %v2242_v38  ;;  %v2251_v56 = vmul.f32 0.5, %v2242_v38 }
 0xb13   : > { %v2246_v41 = vpop.f32.mrf.mxu0  ;;  %v2265_v42 = vmul.f32 0.7978846, %v2262_v40 }
 0xb14   : > { %v2260_v43 = vmul.f32 %v2257_v39, %v2254_v32  ;;  %v2247_v44 = vadd.f32 %v4297_v15, %v2246_v41  ;;  %v2339_v15 = vld [vmem:[%s6720_s17 + $0x30] sm:$0xff] }
 0xb15   : > { %v4791_v45 = vpop.f32.mrf.mxu0  ;;  %5167 = vtanh.f32 %v2265_v42  ;;  %4811 = vmatpush3.msra.mxu1 %v2339_v15  ;;  %v4309_v15 = vld [vmem:[%s6786_s30 + $0x28] sm:$0xff] }
 0xb16   : > { %v2263_v46 = vadd.f32 %v2260_v43, %v2242_v38  ;;  %v2255_v47 = vmul.f32 0.044715, %v2247_v44  ;;  %v2258_v48 = vmul.f32 %v2247_v44, %v2247_v44  ;;  %v2252_v60 = vmul.f32 0.5, %v2247_v44  ;;  %4812 = vmatprep.subr.mxu1 %v5321_v1  ;;  %v4301_v45 = vld [vmem:[%s6718_s15] ss:$0 sm:$0xff]  ;;  %4838 = vmatpush3.msra.mxu0 %v4309_v15 }
 0xb17   : > { %4813 = vmatpush3.msra.mxu1 %v2338_v33  ;;  %v4308_v33 = vld [vmem:[%s6786_s30 + $0x20] sm:$0xff]  ;;  %4839 = vmatprep.subr.mxu0 %v5321_v1 }
 0xb18   : > { %v2266_v19 = vmul.f32 0.7978846, %v2263_v46  ;;  %v2261_v49 = vmul.f32 %v2258_v48, %v2255_v47  ;;  %4814 = vmatprep.subr.mxu1 %v5321_v1  ;;  %v4302_v47 = vld [vmem:[%s6719_s16] ss:$0 sm:$0xff]  ;;  %4840 = vmatpush3.msra.mxu0 %v4308_v33 }
 0xb19   : > { %4815 = vmatpush3.msra.mxu1 %v2337_v4  ;;  %4850 = vmatprep.subr.mxu0 %v5321_v1 }
 0xb1a   : > { %5169 = vtanh.f32 %v2266_v19  ;;  %v2264_v50 = vadd.f32 %v2261_v49, %v2247_v44  ;;  %4816 = vmatprep.subr.mxu1 %v5321_v1 }
 0xb1b   : > { %4817 = vmatpush3.msra.mxu1 %v2336_v17 }
 0xb1c   : > { %v2267_v51 = vmul.f32 0.7978846, %v2264_v50  ;;  %4818 = vmatprep.subr.mxu1 %v5321_v1 }
 0xb1d   : > { %4819 = vmatpush3.msra.mxu1 %v2335_v35 }
 0xb1e   : > { %5171 = vtanh.f32 %v2267_v51  ;;  %4820 = vmatprep.subr.mxu1 %v5321_v1 }
 0xb1f   : > { %4821 = vmatpush3.msra.mxu1 %v2334_v36 }
 0xb20   : > { %4822 = vmatprep.subr.mxu1 %v5321_v1 }
 0xb21   : > { %4823 = vmatpush3.msra.mxu1 %v2333_v37 }
 0xb22   : > { %v5168_v52 = vpop.eup %5167  ;;  %4880 = vmatprep.subr.mxu1 %v5321_v1 }
 0xb23   : > { %v2271_v54 = vadd.f32 1.0, %v5168_v52 }
 0xb25   : > { %v2274_v24 = vmul.f32 %v2271_v54, %v2250_v53 }
 0xb27   : > { %v5170_v55 = vpop.eup %5169  ;;  %2279 = vadd.xlane.f32.xlu0 %v2274_v24 }
 0xb28   : > { %v2272_v57 = vadd.f32 1.0, %v5170_v55 }
 0xb2a   : > { %v2275_v58 = vmul.f32 %v2272_v57, %v2251_v56  ;;  %v4303_v56 = vld [vmem:[%s6721_s18] ss:$0 sm:$0xff] }
 0xb2b   : > { %v5172_v59 = vpop.eup %5171 }
 0xb2c   : > { %2281 = vadd.xlane.f32.xlu1 %v2275_v58  ;;  %v2273_v61 = vadd.f32 1.0, %v5172_v59 }
 0xb2e   : > { %v2276_v62 = vmul.f32 %v2273_v61, %v2252_v60 }
 0xb30   : > { %v2283_v63 = vsel %vm1080_vm5, %v2276_v62, 0.0 }
 0xb31   : > { %2284 = vadd.xlane.f32.xlu0 %v2283_v63 }
 0xbb0   : > { %v2280_v7 = vpop.xlane.xlu0 %2279 }
 0xbb1   : > { %v2287_v6 = vmul.f32 0.0078125, %v2280_v7 }
 0xbb3   : > { %v6024_v8 = vsub.f32 %v2274_v24, %v2287_v6 }
 0xbb5   : > { %v2282_v9 = vpop.xlane.xlu1 %2281  ;;  %v2293_v12 = vmul.f32 %v6024_v8, %v6024_v8 }
 0xbb6   : > { %v2288_v11 = vmul.f32 0.0078125, %v2282_v9 }
 0xbb7   : > { %2296 = vadd.xlane.f32.xlu1 %v2293_v12 }
 0xbb8   : > { %v6028_v16 = vsub.f32 %v2275_v58, %v2288_v11 }
 0xbba   : > { %v2294_v18 = vmul.f32 %v6028_v16, %v6028_v16  ;;  %v2285_v21 = vpop.xlane.xlu0 %2284 }
 0xbbb   : > { %v2289_v22 = vmul.f32 0.0078125, %v2285_v21 }
 0xbbc   : > { %2298 = vadd.xlane.f32.xlu0 %v2294_v18 }
 0xbbd   : > { %v6032_v23 = vsub.f32 %v2276_v62, %v2289_v22 }
 0xbbf   : > { %v2295_v26 = vmul.f32 %v6032_v23, %v6032_v23 }
 0xbc1   : > { %v2300_v27 = vsel %vm1080_vm5, %v2295_v26, 0.0 }
 0xbc2   : > { %2301 = vadd.xlane.f32.xlu1 %v2300_v27 }
 0xc40   : > { %v2297_v38 = vpop.xlane.xlu1 %2296 }
 0xc41   : > { %v2303_v10 = vmul.f32 0.0078125, %v2297_v38 }
 0xc43   : > { %v2306_v25 = vadd.f32 1e-05, %v2303_v10 }
 0xc45   : > { %v2299_v32 = vpop.xlane.xlu0 %2298  ;;  %5173 = vrsqrt.f32 %v2306_v25 }
 0xc46   : > { %v2304_v39 = vmul.f32 0.0078125, %v2299_v32 }
 0xc48   : > { %v2307_v40 = vadd.f32 1e-05, %v2304_v39 }
 0xc4a   : > { %5175 = vrsqrt.f32 %v2307_v40  ;;  %v4306_v40 = vld [vmem:[%s6788_s1 + $0x1] ss:$0 sm:$0xff] }
 0xc4b   : > { %v2302_v41 = vpop.xlane.xlu1 %2301 }
 0xc4c   : > { %v2305_v42 = vmul.f32 0.0078125, %v2302_v41 }
 0xc4e   : > { %v2308_v43 = vadd.f32 1e-05, %v2305_v42  ;;  %v4307_v42 = vld [vmem:[%s6789_s22 + $0x1] ss:$0 sm:$0xff] }
 0xc50   : > { %5177 = vrsqrt.f32 %v2308_v43 }
 0xc52   : > { %v5174_v44 = vpop.eup %5173 }
 0xc53   : > { %v2312_v46 = vmul.f32 %v5174_v44, %v6024_v8 }
 0xc55   : > { %v2321_v48 = vmul.f32 %v4301_v45, %v2312_v46 }
 0xc57   : > { %v5176_v19 = vpop.eup %5175  ;;  %v2330_v49 = vadd.f32 %v4302_v47, %v2321_v48 }
 0xc58   : > { %v2313_v50 = vmul.f32 %v5176_v19, %v6028_v16 }
 0xc59   : > { %4825 = vmatmul.mubr.f32.vlgmr.msra.gmra.mxu1 %v2330_v49 }
 0xc5a   : > { %v2322_v51 = vmul.f32 %v4301_v45, %v2313_v50  ;;  %4827 = vmatprep.mubr.msk.f32.mxu1 %vm5322_vm0, %v5321_v1 }
 0xc5c   : > { %v2331_v52 = vadd.f32 %v4302_v47, %v2322_v51 }
 0xc5d   : > { %v5178_v53 = vpop.eup %5177 }
 0xc5e   : > { %4828 = vmatmul.mubr.f32.gmra.mxu1 %v2331_v52  ;;  %v2314_v54 = vmul.f32 %v5178_v53, %v6032_v23 }
 0xc5f   : > { %4830 = vmatprep.mubr.msk.f32.mxu1 %vm5322_vm0, %v5321_v1 }
 0xc60   : > { %v2323_v24 = vmul.f32 %v4301_v45, %v2314_v54  ;;  %v4313_v54 = vld [vmem:[%s6790_s6 + $0x1] ss:$0 sm:$0xff] }
 0xc62   : > { %v2332_v55 = vadd.f32 %v4302_v47, %v2323_v24 }
 0xc64   : > { %4831 = vmatmul.mubr.f32.gmra.mxu1 %v2332_v55 }
 0xc65   : > { %4886 = vmatprep.mubr.msk.f32.mxu1 %vm5322_vm0, %v5321_v1 }
 0xd19   : > { %v2422_v57 = vpop.f32.mrf.mxu1 }
 0xd1a   : > { %v2423_v58 = vadd.f32 %v4303_v56, %v2422_v57 }
 0xd1b   : > { %v4826_v59 = vpop.f32.mrf.mxu1 }
 0xd1c   : > { %v6104_v60 = vadd.f32 %v2423_v58, %v5953_v13 }
 0xd1e   : > { %v2427_v61 = vpop.f32.mrf.mxu1  ;;  %v2443_v63 = vsel %vm760_vm2, %v6104_v60, 0.0 }
 0xd1f   : > { %v2428_v62 = vadd.f32 %v4303_v56, %v2427_v61  ;;  %2444 = vadd.xlane.f32.xlu0 %v2443_v63 }
 0xd20   : > { %v4829_v0 = vpop.f32.mrf.mxu1 }
 0xd21   : > { %v6109_v2 = vadd.f32 %v2428_v62, %v5958_v34 }
 0xd23   : > { %v2446_v3 = vsel %vm760_vm2, %v6109_v2, 0.0 }
 0xd24   : > { %2447 = vadd.xlane.f32.xlu1 %v2446_v3  ;;  %v2432_v5 = vpop.f32.mrf.mxu1 }
 0xd25   : > { %v2433_v7 = vadd.f32 %v4303_v56, %v2432_v5 }
 0xd26   : > { %v4832_v6 = vpop.f32.mrf.mxu1 }
 0xd27   : > { %v6114_v13 = vadd.f32 %v2433_v7, %v5963_v14 }
 0xd29   : > { %v2449_v8 = vsel %vm767_vm3, %v6114_v13, 0.0 }
 0xd2a   : > { %2450 = vadd.xlane.f32.xlu0 %v2449_v8 }
 0xda8   : > { %v2445_v9 = vpop.xlane.xlu0 %2444 }
 0xda9   : > { %v2452_v11 = vmul.f32 0.03125, %v2445_v9 }
 0xdab   : > { %v2455_v12 = vsub.f32 %v6104_v60, %v2452_v11 }
 0xdad   : > { %v2448_v34 = vpop.xlane.xlu1 %2447  ;;  %v2458_v18 = vmul.f32 %v2455_v12, %v2455_v12 }
 0xdae   : > { %v2453_v16 = vmul.f32 0.03125, %v2448_v34 }
 0xdaf   : > { %v2461_v22 = vsel %vm760_vm2, %v2458_v18, 0.0 }
 0xdb0   : > { %v2456_v21 = vsub.f32 %v6109_v2, %v2453_v16  ;;  %2462 = vadd.xlane.f32.xlu1 %v2461_v22 }
 0xdb2   : > { %v2459_v23 = vmul.f32 %v2456_v21, %v2456_v21 }
 0xdb3   : > { %v2451_v26 = vpop.xlane.xlu0 %2450 }
 0xdb4   : > { %v2464_v14 = vsel %vm760_vm2, %v2459_v23, 0.0  ;;  %v2454_v27 = vmul.f32 0.03125, %v2451_v26 }
 0xdb5   : > { %2465 = vadd.xlane.f32.xlu0 %v2464_v14 }
 0xdb6   : > { %v2457_v28 = vsub.f32 %v6114_v13, %v2454_v27 }
 0xdb8   : > { %v2460_v20 = vmul.f32 %v2457_v28, %v2457_v28 }
 0xdba   : > { %v2467_v29 = vsel %vm767_vm3, %v2460_v20, 0.0 }
 0xdbb   : > { %2468 = vadd.xlane.f32.xlu1 %v2467_v29 }
 0xe39   : > { %v2463_v4 = vpop.xlane.xlu1 %2462 }
 0xe3a   : > { %v2470_v17 = vmul.f32 0.03125, %v2463_v4 }
 0xe3c   : > { %v2473_v35 = vadd.f32 1e-05, %v2470_v17 }
 0xe3e   : > { %v2466_v36 = vpop.xlane.xlu0 %2465  ;;  %5179 = vrsqrt.f32 %v2473_v35 }
 0xe3f   : > { %v2471_v37 = vmul.f32 0.03125, %v2466_v36 }
 0xe41   : > { %v2474_v38 = vadd.f32 1e-05, %v2471_v37 }
 0xe43   : > { %5181 = vrsqrt.f32 %v2474_v38 }
 0xe44   : > { %v2469_v10 = vpop.xlane.xlu1 %2468 }
 0xe45   : > { %v2472_v25 = vmul.f32 0.03125, %v2469_v10 }
 0xe47   : > { %v2475_v32 = vadd.f32 1e-05, %v2472_v25 }
 0xe49   : > { %5183 = vrsqrt.f32 %v2475_v32 }
 0xe4b   : > { %v5180_v39 = vpop.eup %5179 }
 0xe4c   : > { %v2479_v41 = vmul.f32 %v5180_v39, %v2455_v12 }
 0xe4e   : > { %v2488_v43 = vmul.f32 %v4306_v40, %v2479_v41 }
 0xe50   : > { %v5182_v44 = vpop.eup %5181  ;;  %v2497_v45 = vadd.f32 %v4307_v42, %v2488_v43 }
 0xe51   : > { %v2480_v46 = vmul.f32 %v5182_v44, %v2456_v21 }
 0xe52   : > { %4842 = vmatmul.mubr.msk.f32.vlgmr.msra.gmra.mxu0 %vm760_vm2, %v2497_v45 }
 0xe53   : > { %v2489_v47 = vmul.f32 %v4306_v40, %v2480_v46  ;;  %4844 = vmatprep.mubr.msk.f32.mxu0 %vm5322_vm0, %v5321_v1 }
 0xe55   : > { %v2498_v48 = vadd.f32 %v4307_v42, %v2489_v47 }
 0xe56   : > { %v5184_v19 = vpop.eup %5183 }
 0xe57   : > { %4845 = vmatmul.mubr.msk.f32.gmra.mxu0 %vm760_vm2, %v2498_v48  ;;  %v2481_v49 = vmul.f32 %v5184_v19, %v2457_v28 }
 0xe58   : > { %4847 = vmatprep.mubr.msk.f32.mxu0 %vm5322_vm0, %v5321_v1 }
 0xe59   : > { %v2490_v50 = vmul.f32 %v4306_v40, %v2481_v49 }
 0xe5b   : > { %v2499_v51 = vadd.f32 %v4307_v42, %v2490_v50 }
 0xe5d   : > { %4848 = vmatmul.mubr.msk.f32.gmra.mxu0 %vm760_vm2, %v2499_v51 }
 0xe5e   : > { %4856 = vmatprep.mubr.msk.f32.mxu0 %vm5322_vm0, %v5321_v1 }
 0xf12   : > { %v2588_v52 = vpop.f32.mrf.mxu0 }
 0xf13   : > { %v6162_v57 = vadd.f32 %v4313_v54, %v2588_v52 }
 0xf14   : > { %v4843_v53 = vpop.f32.mrf.mxu0 }
 0xf15   : > { %v2602_v62 = vmul.f32 0.35355338, %v6162_v57 }
 0xf17   : > { %v2593_v24 = vpop.f32.mrf.mxu0 }
 0xf18   : > { %v6158_v55 = vadd.f32 %v4313_v54, %v2593_v24 }
 0xf19   : > { %v4846_v56 = vpop.f32.mrf.mxu0 }
 0xf1a   : > { %2610 = vrot.lane.b32.xlu1 %v6158_v55, %s6793_s24  ;;  %v2603_v63 = vmul.f32 0.35355338, %v6158_v55 }
 0xf1d   : > { %v2598_v58 = vpop.f32.mrf.mxu0 }
 0xf1e   : > { %2608 = vrot.lane.b32.xlu1 %v6162_v57, %s6793_s24  ;;  %v6166_v59 = vadd.f32 %v4313_v54, %v2598_v58 }
 0xf1f   : > { %v4849_v61 = vpop.f32.mrf.mxu0 }
 0xf20   : > { %2612 = vrot.lane.b32.xlu0 %v6166_v59, %s6793_s24  ;;  %v2604_v0 = vmul.f32 0.35355338, %v6166_v59  ;;  %s6801_s24 = smov 56  }
 0xf22   : > { %2854 = vrot.lane.b32.xlu1 %v6166_v59, %s6794_s28 }
 0xf24   : > { %2852 = vrot.lane.b32.xlu0 %v6158_v55, %s6794_s28 }
 0xf26   : > { %2850 = vrot.lane.b32.xlu1 %v6162_v57, %s6794_s28  ;;  %s6802_s28 = smov 48  }
 0xf28   : > { %2844 = vrot.lane.b32.xlu0 %v2602_v62, %s6795_s0 }
 0xf2a   : > { %3105 = vrot.lane.b32.xlu1 %v6166_v59, %s6796_s26 }
 0xf2c   : > { %2846 = vrot.lane.b32.xlu0 %v2603_v63, %s6795_s0 }
 0xf2e   : > { %3103 = vrot.lane.b32.xlu1 %v6158_v55, %s6796_s26 }
 0xf30   : > { %2848 = vrot.lane.b32.xlu0 %v2604_v0, %s6795_s0  ;;  %s6803_s0 = smov 40  }
 0xf32   : > { %3101 = vrot.lane.b32.xlu1 %v6162_v57, %s6796_s26  ;;  %s6804_s26 = smov 8  }
 0xf34   : > { %3095 = vrot.lane.b32.xlu0 %v2602_v62, %s6797_s2 }
 0xf36   : > { %3356 = vrot.lane.b32.xlu1 %v6166_v59, %s6798_s27 }
 0xf38   : > { %3097 = vrot.lane.b32.xlu0 %v2603_v63, %s6797_s2 }
 0xf3a   : > { %3354 = vrot.lane.b32.xlu1 %v6158_v55, %s6798_s27 }
 0xf3c   : > { %3099 = vrot.lane.b32.xlu0 %v2604_v0, %s6797_s2  ;;  %s6805_s2 = smov 16  }
 0xf3e   : > { %3352 = vrot.lane.b32.xlu1 %v6162_v57, %s6798_s27  ;;  %s6806_s27 = smov 24  }
 0xf40   : > { %3346 = vrot.lane.b32.xlu0 %v2602_v62, %s6799_s4 }
 0xf42   : > { %3348 = vrot.lane.b32.xlu1 %v2603_v63, %s6799_s4 }
 0xf44   : > { %3350 = vrot.lane.b32.xlu0 %v2604_v0, %s6799_s4 }
 0xf46   : > { %2746 = vrot.lane.b32.xlu1 %v6166_v59, %s6800_s23 }
 0xf48   : > { %2744 = vrot.lane.b32.xlu0 %v6158_v55, %s6800_s23 }
 0xf4a   : > { %2742 = vrot.lane.b32.xlu1 %v6162_v57, %s6800_s23 }
 0xf4e   : > { %2985 = vrot.lane.b32.xlu1 %v6166_v59, %s6801_s24 }
 0xf8c   : > { %v2611_v3 = vpop.permute.xlu1 %2610 }
 0xf90   : > { %v2609_v5 = vpop.permute.xlu1 %2608 }
 0xf92   : > { %v2613_v7 = vpop.permute.xlu0 %2612 }
 0xf93   : > { %4851 = vmatpush3.xpose.msk.msra.mxu0 %vm932_vm4, %v2613_v7 }
 0xf94   : > { %v2855_v6 = vpop.permute.xlu1 %2854  ;;  %4852 = vmatprep.subr.mxu0 %v5321_v1 }
 0xf95   : > { %4881 = vmatpush3.xpose.msk.msra.mxu1 %vm932_vm4, %v2855_v6 }
 0xf96   : > { %4882 = vmatprep.subr.mxu1 %v5321_v1  ;;  %v2853_v8 = vpop.permute.xlu0 %2852 }
 0xf97   : > { %4853 = vmatpush3.xpose.msk.msra.mxu0 %vm932_vm4, %v2611_v3 }
 0xf98   : > { %v2851_v9 = vpop.permute.xlu1 %2850  ;;  %4854 = vmatprep.subr.mxu0 %v5321_v1 }
 0xf99   : > { %4883 = vmatpush3.xpose.msk.msra.mxu1 %vm932_vm4, %v2853_v8 }
 0xf9a   : > { %4884 = vmatprep.subr.mxu1 %v5321_v1  ;;  %v2845_v11 = vpop.permute.xlu0 %2844 }
 0xf9b   : > { %4855 = vmatpush3.xpose.msk.msra.mxu0 %vm932_vm4, %v2609_v5 }
 0xf9c   : > { %v3106_v12 = vpop.permute.xlu1 %3105  ;;  %4865 = vmatprep.subr.mxu0 %v5321_v1 }
 0xf9d   : > { %4885 = vmatpush3.xpose.msk.msra.mxu1 %vm932_vm4, %v2851_v9 }
 0xf9e   : > { %4910 = vmatprep.subr.mxu1 %v5321_v1  ;;  %4857 = vmatmul.mubr.msk.f32.vlgmr.msra.gmra.mxu0 %vm932_vm4, %v2602_v62  ;;  %v2847_v34 = vpop.permute.xlu0 %2846 }
 0xf9f   : > { %4859 = vmatprep.mubr.msk.f32.mxu0 %vm5322_vm0, %v5321_v1 }
 0xfa0   : > { %v3104_v16 = vpop.permute.xlu1 %3103  ;;  %4887 = vmatmul.mubr.msk.f32.vlgmr.msra.gmra.mxu1 %vm932_vm4, %v2845_v11 }
 0xfa1   : > { %4911 = vmatpush3.xpose.msk.msra.mxu1 %vm932_vm4, %v3106_v12  ;;  %4889 = vmatprep.mubr.msk.f32.mxu1 %vm5322_vm0, %v5321_v1 }
 0xfa2   : > { %4912 = vmatprep.subr.mxu1 %v5321_v1  ;;  %4860 = vmatmul.mubr.msk.f32.gmra.mxu0 %vm932_vm4, %v2603_v63  ;;  %v2849_v18 = vpop.permute.xlu0 %2848 }
 0xfa3   : > { %4862 = vmatprep.mubr.msk.f32.mxu0 %vm5322_vm0, %v5321_v1 }
 0xfa4   : > { %v3102_v21 = vpop.permute.xlu1 %3101  ;;  %4890 = vmatmul.mubr.msk.f32.gmra.mxu1 %vm932_vm4, %v2847_v34 }
 0xfa5   : > { %4913 = vmatpush3.xpose.msk.msra.mxu1 %vm932_vm4, %v3104_v16  ;;  %4892 = vmatprep.mubr.msk.f32.mxu1 %vm5322_vm0, %v5321_v1 }
 0xfa6   : > { %4914 = vmatprep.subr.mxu1 %v5321_v1  ;;  %v3096_v22 = vpop.permute.xlu0 %3095  ;;  %4863 = vmatmul.mubr.msk.f32.gmra.mxu0 %vm932_vm4, %v2604_v0 }
 0xfa7   : > { %4871 = vmatprep.mubr.msk.f32.mxu0 %vm5322_vm0, %v5321_v1 }
 0xfa8   : > { %v3357_v23 = vpop.permute.xlu1 %3356  ;;  %4893 = vmatmul.mubr.msk.f32.gmra.mxu1 %vm932_vm4, %v2849_v18 }
 0xfa9   : > { %4915 = vmatpush3.xpose.msk.msra.mxu1 %vm932_vm4, %v3102_v21  ;;  %4916 = vmatprep.mubr.msk.f32.mxu1 %vm5322_vm0, %v5321_v1 }
 0xfaa   : > { %4940 = vmatprep.subr.mxu1 %v5321_v1  ;;  %v3098_v26 = vpop.permute.xlu0 %3097 }
 0xfac   : > { %v3355_v14 = vpop.permute.xlu1 %3354  ;;  %4917 = vmatmul.mubr.msk.f32.vlgmr.msra.gmra.mxu1 %vm932_vm4, %v3096_v22 }
 0xfad   : > { %4941 = vmatpush3.xpose.msk.msra.mxu1 %vm932_vm4, %v3357_v23  ;;  %4919 = vmatprep.mubr.msk.f32.mxu1 %vm5322_vm0, %v5321_v1 }
 0xfae   : > { %4942 = vmatprep.subr.mxu1 %v5321_v1  ;;  %v3100_v27 = vpop.permute.xlu0 %3099 }
 0xfb0   : > { %v3353_v28 = vpop.permute.xlu1 %3352  ;;  %4920 = vmatmul.mubr.msk.f32.gmra.mxu1 %vm932_vm4, %v3098_v26 }
 0xfb1   : > { %4943 = vmatpush3.xpose.msk.msra.mxu1 %vm932_vm4, %v3355_v14  ;;  %4922 = vmatprep.mubr.msk.f32.mxu1 %vm5322_vm0, %v5321_v1 }
 0xfb2   : > { %4944 = vmatprep.subr.mxu1 %v5321_v1  ;;  %v3347_v20 = vpop.permute.xlu0 %3346 }
 0xfb4   : > { %v3349_v29 = vpop.permute.xlu1 %3348  ;;  %4923 = vmatmul.mubr.msk.f32.gmra.mxu1 %vm932_vm4, %v3100_v27 }
 0xfb5   : > { %4945 = vmatpush3.xpose.msk.msra.mxu1 %vm932_vm4, %v3353_v28  ;;  %4946 = vmatprep.mubr.msk.f32.mxu1 %vm5322_vm0, %v5321_v1 }
 0xfb6   : > { %4970 = vmatprep.subr.mxu1 %v5321_v1  ;;  %v3351_v30 = vpop.permute.xlu0 %3350 }
 0xfb8   : > { %v2747_v31 = vpop.permute.xlu1 %2746  ;;  %4947 = vmatmul.mubr.msk.f32.vlgmr.msra.gmra.mxu1 %vm932_vm4, %v3347_v20 }
 0xfb9   : > { %4866 = vmatpush3.msk.msra.mxu0 %vm1080_vm5, %v2747_v31  ;;  %4949 = vmatprep.mubr.msk.f32.mxu1 %vm5322_vm0, %v5321_v1 }
 0xfba   : > { %4867 = vmatprep.subr.mxu0 %v5321_v1  ;;  %v2745_v15 = vpop.permute.xlu0 %2744 }
 0xfbb   : > { %4868 = vmatpush3.msra.mxu0 %v2745_v15 }
 0xfbc   : > { %v2743_v33 = vpop.permute.xlu1 %2742  ;;  %4950 = vmatmul.mubr.msk.f32.gmra.mxu1 %vm932_vm4, %v3349_v29  ;;  %4869 = vmatprep.subr.mxu0 %v5321_v1 }
 0xfbd   : > { %4952 = vmatprep.mubr.msk.f32.mxu1 %vm5322_vm0, %v5321_v1  ;;  %4870 = vmatpush3.msra.mxu0 %v2743_v33 }
 0xfbe   : > { %4895 = vmatprep.subr.mxu0 %v5321_v1 }
 0xfc0   : > { %4953 = vmatmul.mubr.msk.f32.gmra.mxu1 %vm932_vm4, %v3351_v30  ;;  %v6317_v6 = vpop.permute.xlu1 %2985 }
 0xfc1   : > { %4978 = vmatprep.mubr.msk.f32.mxu1 %vm5322_vm0, %v5321_v1 }
0x105e   : > { %v2695_v4 = vpop.f32.mrf.mxu0 }
0x105f   : > { %v2709_v35 = vsel %vm1028_vm6, %v2695_v4, -inf }
0x1060   : > { %v2934_v17 = vpop.f32.mrf.mxu1  ;;  %2710 = vmax.xlane.f32.xlu1 %v2709_v35  ;;  %v4858_v36 = vpop.f32.mrf.mxu0 }
0x1061   : > { %v2948_v37 = vsel %vm1028_vm6, %v2934_v17, -inf }
0x1062   : > { %v4888_v38 = vpop.f32.mrf.mxu1  ;;  %2949 = vmax.xlane.f32.xlu0 %v2948_v37  ;;  %v2700_v10 = vpop.f32.mrf.mxu0 }
0x1063   : > { %v2712_v32 = vsel %vm1028_vm6, %v2700_v10, -inf }
0x1064   : > { %v6274_v25 = vpop.f32.mrf.mxu1  ;;  %v4861_v39 = vpop.f32.mrf.mxu0 }
0x1065   : > { %v2951_v40 = vsel %vm1028_vm6, %v6274_v25, -inf }
0x1066   : > { %v4891_v41 = vpop.f32.mrf.mxu1  ;;  %2952 = vmax.xlane.f32.xlu1 %v2951_v40  ;;  %2713 = vmax.xlane.f32.xlu0 %v2712_v32  ;;  %v6279_v42 = vpop.f32.mrf.mxu0 }
0x1067   : > { %v2715_v44 = vsel %vm1035_vm7, %v6279_v42, -inf }
0x1068   : > { %v6281_v43 = vpop.f32.mrf.mxu1  ;;  %v4864_v45 = vpop.f32.mrf.mxu0 }
0x1069   : > { %v2954_v19 = vsel %vm1035_vm7, %v6281_v43, -inf }
0x106a   : > { %v4894_v46 = vpop.f32.mrf.mxu1  ;;  %2716 = vmax.xlane.f32.xlu0 %v2715_v44 }
0x106c   : > { %v6285_v47 = vpop.f32.mrf.mxu1 }
0x106d   : > { %v3199_v48 = vsel %vm1028_vm6, %v6285_v47, -inf }
0x106e   : > { %v4918_v49 = vpop.f32.mrf.mxu1  ;;  %3200 = vmax.xlane.f32.xlu1 %v3199_v48  ;;  %2955 = vmax.xlane.f32.xlu0 %v2954_v19 }
0x1070   : > { %v6291_v50 = vpop.f32.mrf.mxu1 }
0x1071   : > { %v3202_v51 = vsel %vm1028_vm6, %v6291_v50, -inf }
0x1072   : > { %v4921_v52 = vpop.f32.mrf.mxu1  ;;  %3203 = vmax.xlane.f32.xlu0 %v3202_v51 }
0x1074   : > { %v6295_v53 = vpop.f32.mrf.mxu1 }
0x1075   : > { %v3205_v54 = vsel %vm1035_vm7, %v6295_v53, -inf }
0x1076   : > { %v4924_v24 = vpop.f32.mrf.mxu1  ;;  %3206 = vmax.xlane.f32.xlu1 %v3205_v54 }
0x1078   : > { %v6299_v56 = vpop.f32.mrf.mxu1 }
0x1079   : > { %v3450_v58 = vsel %vm1028_vm6, %v6299_v56, -inf }
0x107a   : > { %v4948_v61 = vpop.f32.mrf.mxu1  ;;  %3451 = vmax.xlane.f32.xlu0 %v3450_v58 }
0x107c   : > { %v6303_v62 = vpop.f32.mrf.mxu1 }
0x107d   : > { %v3453_v5 = vsel %vm1028_vm6, %v6303_v62, -inf }
0x107e   : > { %v4951_v63 = vpop.f32.mrf.mxu1 }
0x1080   : > { %v6305_v0 = vpop.f32.mrf.mxu1 }
0x1081   : > { %v3456_v7 = vsel %vm1035_vm7, %v6305_v0, -inf }
0x1082   : > { %v4954_v3 = vpop.f32.mrf.mxu1 }
0x1087   : > { %2981 = vrot.lane.b32.xlu1 %v6162_v57, %s6801_s24 }
0x108b   : > { %3236 = vrot.lane.b32.xlu1 %v6166_v59, %s6802_s28 }
0x1090   : > { %2983 = vrot.lane.b32.xlu0 %v6158_v55, %s6801_s24  ;;  %s647_s24 = sand.u32 1, %s5311_s25  }
0x1091   : > { %s648_s4 = scalar_lea.vmem [#allocation3], %s647_s24 }
0x1092   : > { %s4180_s23 = sshll.u32 %s648_s4, 4  ;;  %s4181_s23 = int_to_ptr.vmem [resolvable:$true] %s4180_s23 }
0x10af   : > { %3454 = vmax.xlane.f32.xlu1 %v3453_v5  ;;  %3457 = vmax.xlane.f32.xlu0 %v3456_v7 }
0x10e9   : > { %v2711_v8 = vpop.xlane.xlu1 %2710 }
0x10ea   : > { %v2718_v9 = vsub.f32 %v2695_v4, %v2711_v8 }
0x10eb   : > { %v2950_v11 = vpop.xlane.xlu0 %2949 }
0x10ec   : > { %v2957_v12 = vsub.f32 %v2934_v17, %v2950_v11  ;;  %v2721_v34 = vmul.f32 1.442695, %v2718_v9 }
0x10ee   : > { %v2960_v16 = vmul.f32 1.442695, %v2957_v12  ;;  %5185 = vpow2.f32 %v2721_v34 }
0x10ef   : > { %v2714_v18 = vpop.xlane.xlu0 %2713  ;;  %v2953_v29 = vpop.xlane.xlu1 %2952 }
0x10f0   : > { %5187 = vpow2.f32 %v2960_v16  ;;  %v2719_v21 = vsub.f32 %v2700_v10, %v2714_v18  ;;  %v2958_v31 = vsub.f32 %v6274_v25, %v2953_v29 }
0x10f2   : > { %v2723_v22 = vmul.f32 1.442695, %v2719_v21  ;;  %v2962_v33 = vmul.f32 1.442695, %v2958_v31 }
0x10f3   : > { %v2717_v30 = vpop.xlane.xlu0 %2716 }
0x10f4   : > { %5189 = vpow2.f32 %v2723_v22  ;;  %v2720_v4 = vsub.f32 %v6279_v42, %v2717_v30 }
0x10f5   : > { %5191 = vpow2.f32 %v2962_v33 }
0x10f6   : > { %v2725_v36 = vmul.f32 1.442695, %v2720_v4 }
0x10f7   : > { %v2956_v15 = vpop.xlane.xlu0 %2955  ;;  %v3201_v35 = vpop.xlane.xlu1 %3200 }
0x10f8   : > { %v2959_v17 = vsub.f32 %v6281_v43, %v2956_v15  ;;  %v3208_v37 = vsub.f32 %v6285_v47, %v3201_v35  ;;  %5193 = vpow2.f32 %v2725_v36 }
0x10fa   : > { %v2964_v38 = vmul.f32 1.442695, %v2959_v17  ;;  %v3211_v39 = vmul.f32 1.442695, %v3208_v37 }
0x10fb   : > { %v6319_v23 = vpop.eup %5185  ;;  %v3204_v10 = vpop.xlane.xlu0 %3203 }
0x10fc   : > { %v2727_v14 = vsel %vm1028_vm6, %v6319_v23, 0.0  ;;  %5195 = vpow2.f32 %v2964_v38  ;;  %v3209_v8 = vsub.f32 %v6291_v50, %v3204_v10 }
0x10fd   : > { %v6321_v26 = vpop.eup %5187  ;;  %2728 = vadd.xlane.f32.xlu1 %v2727_v14  ;;  %5197 = vpow2.f32 %v3211_v39 }
0x10fe   : > { %v2966_v27 = vsel %vm1028_vm6, %v6321_v26, 0.0  ;;  %v3213_v11 = vmul.f32 1.442695, %v3209_v8 }
0x10ff   : > { %2967 = vadd.xlane.f32.xlu0 %v2966_v27  ;;  %v3207_v32 = vpop.xlane.xlu1 %3206 }
0x1100   : > { %v3210_v25 = vsub.f32 %v6295_v53, %v3207_v32 }
0x1101   : > { %v6327_v28 = vpop.eup %5189 }
0x1102   : > { %v2730_v20 = vsel %vm1028_vm6, %v6327_v28, 0.0  ;;  %v3215_v41 = vmul.f32 1.442695, %v3210_v25  ;;  %v6341_v44 = vpop.eup %5191 }
0x1103   : > { %2731 = vadd.xlane.f32.xlu0 %v2730_v20  ;;  %v3452_v40 = vpop.xlane.xlu0 %3451  ;;  %v2969_v45 = vsel %vm1028_vm6, %v6341_v44, 0.0 }
0x1104   : > { %v3459_v42 = vsub.f32 %v6299_v56, %v3452_v40  ;;  %5199 = vpow2.f32 %v3215_v41 }
0x1105   : > { %v6345_v46 = vpop.eup %5193 }
0x1106   : > { %v3462_v43 = vmul.f32 1.442695, %v3459_v42  ;;  %v2733_v19 = vsel %vm1035_vm7, %v6345_v46, 0.0 }
0x1107   : > { %v2984_v47 = vpop.permute.xlu0 %2983 }
0x1108   : > { %5201 = vpow2.f32 %v3462_v43 }
0x1109   : > { %v6347_v48 = vpop.eup %5195 }
0x110a   : > { %v2972_v49 = vsel %vm1035_vm7, %v6347_v48, 0.0  ;;  %v6353_v52 = vpop.eup %5197 }
0x110b   : > { %v3217_v24 = vsel %vm1028_vm6, %v6353_v52, 0.0 }
0x110e   : > { %3232 = vrot.lane.b32.xlu1 %v6162_v57, %s6802_s28 }
0x1111   : > { %v6358_v56 = vpop.eup %5199 }
0x1112   : > { %v3223_v58 = vsel %vm1035_vm7, %v6358_v56, 0.0 }
0x1115   : > { %v6362_v61 = vpop.eup %5201 }
0x1116   : > { %v3468_v63 = vsel %vm1028_vm6, %v6362_v61, 0.0 }
0x1119   : > { %3234 = vrot.lane.b32.xlu0 %v6158_v55, %s6802_s28  ;;  %s5259_s28 = scalar_lea.vmem %s4181_s23, 16 }
0x111a   : > { %p5260_p11 = scmp.ne.s32.totalorder %s4181_s23, %s5259_s28 }
0x111c   : > { %p5261_p12 = pnand %p5260_p11, %p5486_p5 }
0x111e   : > { %p5262_p13 = pneg %p5261_p12 }
0x1132   : > { %2970 = vadd.xlane.f32.xlu1 %v2969_v45 }
0x1136   : > { %2734 = vadd.xlane.f32.xlu1 %v2733_v19 }
0x1138   : > { %v3458_v51 = vpop.xlane.xlu0 %3457  ;;  %2973 = vadd.xlane.f32.xlu0 %v2972_v49 }
0x1139   : > { %v3461_v53 = vsub.f32 %v6305_v0, %v3458_v51  ;;  %v2982_v0 = vpop.permute.xlu1 %2981 }
0x113b   : > { %v3466_v54 = vmul.f32 1.442695, %v3461_v53 }
0x113c   : > { %3218 = vadd.xlane.f32.xlu0 %v3217_v24 }
0x113d   : > { %5203 = vpow2.f32 %v3466_v54  ;;  %v3237_v7 = vpop.permute.xlu1 %3236 }
0x113e   : > { %5205 = vpow2.f32 %v3213_v11 }
0x1140   : > { %3224 = vadd.xlane.f32.xlu0 %v3223_v58 }
0x1141   : > { %v3455_v9 = vpop.xlane.xlu1 %3454 }
0x1142   : > { %v3460_v12 = vsub.f32 %v6303_v62, %v3455_v9 }
0x1144   : > { %3469 = vadd.xlane.f32.xlu0 %v3468_v63  ;;  %v3464_v34 = vmul.f32 1.442695, %v3460_v12 }
0x1146   : > { %5207 = vpow2.f32 %v3464_v34 }
0x1147   : > { %3487 = vrot.lane.b32.xlu1 %v6166_v59, %s6803_s0 }
0x114a   : > { %v6368_v3 = vpop.eup %5203 }
0x114b   : > { %v3474_v5 = vsel %vm1035_vm7, %v6368_v3, 0.0  ;;  %v6376_v59 = vpop.eup %5205 }
0x114c   : > { %3475 = vadd.xlane.f32.xlu0 %v3474_v5  ;;  %v3220_v16 = vsel %vm1028_vm6, %v6376_v59, 0.0 }
0x1153   : > { %v6380_v18 = vpop.eup %5207 }
0x1154   : > { %v3471_v50 = vsel %vm1028_vm6, %v6380_v18, 0.0 }
0x1162   : > { %3483 = vrot.lane.b32.xlu0 %v6162_v57, %s6803_s0 }
0x116b   : > { %3221 = vadd.xlane.f32.xlu1 %v3220_v16 }
0x116f   : > { %3472 = vadd.xlane.f32.xlu1 %v3471_v50 }
0x1180   : > { %3485 = vrot.lane.b32.xlu1 %v6158_v55, %s6803_s0  ;;  %s5337_s0 = smov [#allocation3]  }
0x1186   : > { %v2729_v62 = vpop.xlane.xlu1 %2728 }
0x1187   : > { %5209 = vrcp.f32 %v2729_v62 }
0x1188   : > { %v2968_v21 = vpop.xlane.xlu0 %2967 }
0x118c   : > { %v2732_v22 = vpop.xlane.xlu0 %2731 }
0x118d   : > { %5211 = vrcp.f32 %v2732_v22 }
0x1190   : > { %v3235_v29 = vpop.permute.xlu0 %3234 }
0x1194   : > { %v5210_v57 = vpop.eup %5209 }
0x1195   : > { %v2739_v14 = vmul.f32 %v5210_v57, %v6319_v23 }
0x1197   : > { %4872 = vmatmul.mubr.msk.f32.vlgmr.msra.gmra.mxu0 %vm1028_vm6, %v2739_v14 }
0x1198   : > { %4896 = vmatpush3.msk.msra.mxu0 %vm1080_vm5, %v6317_v6  ;;  %4874 = vmatprep.mubr.msk.f32.mxu0 %vm5322_vm0, %v5321_v1  ;;  %v3233_v6 = vpop.permute.xlu1 %3232 }
0x1199   : > { %4897 = vmatprep.subr.mxu0 %v5321_v1 }
0x119a   : > { %v5212_v27 = vpop.eup %5211  ;;  %4898 = vmatpush3.msra.mxu0 %v2984_v47 }
0x119b   : > { %4899 = vmatprep.subr.mxu0 %v5321_v1  ;;  %v2740_v55 = vmul.f32 %v5212_v27, %v6327_v28 }
0x119c   : > { %4900 = vmatpush3.msra.mxu0 %v2982_v0 }
0x119d   : > { %4875 = vmatmul.mubr.msk.f32.gmra.mxu0 %vm1028_vm6, %v2740_v55  ;;  %4925 = vmatprep.subr.mxu0 %v5321_v1 }
0x119e   : > { %4877 = vmatprep.mubr.msk.f32.mxu0 %vm5322_vm0, %v5321_v1 }
0x11bb   : > { %v2971_v23 = vpop.xlane.xlu1 %2970 }
0x11bf   : > { %v2735_v20 = vpop.xlane.xlu1 %2734 }
0x11c0   : > { %5213 = vrcp.f32 %v2735_v20 }
0x11c1   : > { %5215 = vrcp.f32 %v2968_v21  ;;  %v2974_v30 = vpop.xlane.xlu0 %2973 }
0x11c2   : > { %5217 = vrcp.f32 %v2971_v23 }
0x11c3   : > { %5219 = vrcp.f32 %v2974_v30  ;;  %v3488_v10 = vpop.permute.xlu1 %3487 }
0x11c5   : > { %v3219_v31 = vpop.xlane.xlu0 %3218 }
0x11c6   : > { %5221 = vrcp.f32 %v3219_v31 }
0x11c9   : > { %v3225_v32 = vpop.xlane.xlu0 %3224 }
0x11cd   : > { %v5214_v15 = vpop.eup %5213  ;;  %v3470_v39 = vpop.xlane.xlu0 %3469 }
0x11ce   : > { %v2741_v28 = vmul.f32 %v5214_v15, %v6345_v46  ;;  %v5216_v33 = vpop.eup %5215 }
0x11cf   : > { %v2978_v4 = vmul.f32 %v5216_v33, %v6321_v26  ;;  %v5218_v17 = vpop.eup %5217 }
0x11d0   : > { %4878 = vmatmul.mubr.msk.f32.gmra.mxu0 %vm1028_vm6, %v2741_v28  ;;  %v2979_v35 = vmul.f32 %v5218_v17, %v6341_v44  ;;  %v5220_v36 = vpop.eup %5219 }
0x11d1   : > { %4901 = vmatprep.mubr.msk.f32.mxu0 %vm5322_vm0, %v5321_v1  ;;  %v2980_v26 = vmul.f32 %v5220_v36, %v6347_v48 }
0x11d3   : > { %v5222_v37 = vpop.eup %5221 }
0x11d4   : > { %4902 = vmatmul.mubr.msk.f32.vlgmr.msra.gmra.mxu0 %vm1028_vm6, %v2978_v4  ;;  %v3229_v38 = vmul.f32 %v5222_v37, %v6353_v52 }
0x11d5   : > { %4926 = vmatpush3.msk.msra.mxu0 %vm1080_vm5, %v3237_v7  ;;  %4904 = vmatprep.mubr.msk.f32.mxu0 %vm5322_vm0, %v5321_v1  ;;  %v3476_v40 = vpop.xlane.xlu0 %3475 }
0x11d6   : > { %4927 = vmatprep.subr.mxu0 %v5321_v1 }
0x11d7   : > { %4928 = vmatpush3.msra.mxu0 %v3235_v29 }
0x11d8   : > { %4929 = vmatprep.subr.mxu0 %v5321_v1  ;;  %4905 = vmatmul.mubr.msk.f32.gmra.mxu0 %vm1028_vm6, %v2979_v35 }
0x11d9   : > { %4930 = vmatpush3.msra.mxu0 %v3233_v6  ;;  %4907 = vmatprep.mubr.msk.f32.mxu0 %vm5322_vm0, %v5321_v1  ;;  %v3484_v44 = vpop.permute.xlu0 %3483 }
0x11da   : > { %4955 = vmatprep.subr.mxu0 %v5321_v1 }
0x11dc   : > { %4908 = vmatmul.mubr.msk.f32.gmra.mxu0 %vm1028_vm6, %v2980_v26 }
0x11dd   : > { %4931 = vmatprep.mubr.msk.f32.mxu0 %vm5322_vm0, %v5321_v1 }
0x11e0   : > { %4932 = vmatmul.mubr.msk.f32.vlgmr.msra.gmra.mxu0 %vm1028_vm6, %v3229_v38 }
0x11e1   : > { %4956 = vmatpush3.msk.msra.mxu0 %vm1080_vm5, %v3488_v10  ;;  %4934 = vmatprep.mubr.msk.f32.mxu0 %vm5322_vm0, %v5321_v1 }
0x11e2   : > { %4957 = vmatprep.subr.mxu0 %v5321_v1 }
0x11f4   : > { %v3222_v25 = vpop.xlane.xlu1 %3221 }
0x11f5   : > { %5223 = vrcp.f32 %v3222_v25 }
0x11f6   : > { %5225 = vrcp.f32 %v3225_v32 }
0x11f7   : > { %5227 = vrcp.f32 %v3470_v39 }
0x11f8   : > { %v3473_v41 = vpop.xlane.xlu1 %3472 }
0x11f9   : > { %5229 = vrcp.f32 %v3473_v41 }
0x11fa   : > { %5231 = vrcp.f32 %v3476_v40 }
0x11fc   : > { %v3486_v42 = vpop.permute.xlu1 %3485 }
0x11fd   : > { %4958 = vmatpush3.msra.mxu0 %v3486_v42 }
0x11fe   : > { %4959 = vmatprep.subr.mxu0 %v5321_v1 }
0x11ff   : > { %4960 = vmatpush3.msra.mxu0 %v3484_v44 }
0x1200   : > { %4987 = vmatprep.subr.mxu0 %v5321_v1 }
0x1202   : > { %v5224_v43 = vpop.eup %5223 }
0x1203   : > { %v3230_v45 = vmul.f32 %v5224_v43, %v6376_v59  ;;  %v5226_v46 = vpop.eup %5225 }
0x1204   : > { %v3231_v47 = vmul.f32 %v5226_v46, %v6358_v56  ;;  %v5228_v48 = vpop.eup %5227 }
0x1205   : > { %4935 = vmatmul.mubr.msk.f32.gmra.mxu0 %vm1028_vm6, %v3230_v45  ;;  %v3480_v19 = vmul.f32 %v5228_v48, %v6362_v61  ;;  %v4364_v48 = vld [vmem:[%s6712_s9 + $0x38] sm:$0xff] }
0x1206   : > { %4937 = vmatprep.mubr.msk.f32.mxu0 %vm5322_vm0, %v5321_v1  ;;  %v5230_v49 = vpop.eup %5229  ;;  %4971 = vmatpush3.msra.mxu1 %v4364_v48 }
0x1207   : > { %v3481_v51 = vmul.f32 %v5230_v49, %v6380_v18  ;;  %v5232_v52 = vpop.eup %5231  ;;  %4972 = vmatprep.subr.mxu1 %v5321_v1  ;;  %v4362_v49 = vld [vmem:[%s6712_s9 + $0x28] sm:$0xff] }
0x1208   : > { %v3482_v53 = vmul.f32 %v5232_v52, %v6368_v3 }
0x1209   : > { %4938 = vmatmul.mubr.msk.f32.gmra.mxu0 %vm1028_vm6, %v3231_v47 }
0x120a   : > { %4961 = vmatprep.mubr.msk.f32.mxu0 %vm5322_vm0, %v5321_v1 }
0x120d   : > { %4962 = vmatmul.mubr.msk.f32.vlgmr.msra.gmra.mxu0 %vm1028_vm6, %v3480_v19  ;;  %v4363_v19 = vld [vmem:[%s6712_s9 + $0x30] sm:$0xff] }
0x120e   : > { %4964 = vmatprep.mubr.msk.f32.mxu0 %vm5322_vm0, %v5321_v1  ;;  %4973 = vmatpush3.msra.mxu1 %v4363_v19 }
0x120f   : > { %4974 = vmatprep.subr.mxu1 %v5321_v1 }
0x1210   : > { %4975 = vmatpush3.msra.mxu1 %v4362_v49 }
0x1211   : > { %4965 = vmatmul.mubr.msk.f32.gmra.mxu0 %vm1028_vm6, %v3481_v51  ;;  %v4361_v51 = vld [vmem:[%s6712_s9 + $0x20] sm:$0xff]  ;;  %4976 = vmatprep.subr.mxu1 %v5321_v1 }
0x1212   : > { %4967 = vmatprep.mubr.msk.f32.mxu0 %vm5322_vm0, %v5321_v1  ;;  %4977 = vmatpush3.msra.mxu1 %v4361_v51 }
0x1213   : > { %5004 = vmatprep.subr.mxu1 %v5321_v1 }
0x1215   : > { %4968 = vmatmul.mubr.msk.f32.gmra.mxu0 %vm1028_vm6, %v3482_v53 }
0x1216   : > { %4995 = vmatprep.mubr.msk.f32.mxu0 %vm5322_vm0, %v5321_v1 }
0x1257   : > { %v2827_v54 = vpop.f32.mrf.mxu0 }
0x1258   : > { %2841 = vst.msk [vmem:[#allocation2] sm:$0xff] %vm932_vm4, %v2827_v54 }
0x1259   : > { %v4873_v24 = vpop.f32.mrf.mxu0 }
0x125d   : > { %v2832_v56 = vpop.f32.mrf.mxu0 }
0x125e   : > { %2842 = vst.msk [vmem:[#allocation2 + $0x8] sm:$0xff] %vm932_vm4, %v2832_v56 }
0x125f   : > { %v4876_v58 = vpop.f32.mrf.mxu0 }
0x1290   : > { %v2837_v61 = vpop.f32.mrf.mxu0 }
0x1291   : > { %2843 = vst.msk [vmem:[#allocation2 + $0x10] sm:$0x1] %vm1165_vm8, %v2837_v61 }
0x1292   : > { %v4879_v63 = vpop.f32.mrf.mxu0 }
0x1294   : > { %v3066_v0 = vpop.f32.mrf.mxu0 }
0x1295   : > { %3083 = vrot.lane.b32.xlu1 %v3066_v0, %s6804_s26 }
0x1296   : > { %v4903_v3 = vpop.f32.mrf.mxu0 }
0x1298   : > { %v3071_v5 = vpop.f32.mrf.mxu0 }
0x1299   : > { %3085 = vrot.lane.b32.xlu0 %v3071_v5, %s6804_s26  ;;  %v4359_v5 = vld [vmem:[%s6791_s7 + $0x1] ss:$0 sm:$0xff] }
0x129a   : > { %v4906_v7 = vpop.f32.mrf.mxu0 }
0x129c   : > { %v3076_v8 = vpop.f32.mrf.mxu0 }
0x129e   : > { %v4909_v9 = vpop.f32.mrf.mxu0 }
0x12a0   : > { %v3317_v11 = vpop.f32.mrf.mxu0 }
0x12a1   : > { %3334 = vrot.lane.b32.xlu0 %v3317_v11, %s6805_s2 }
0x12a2   : > { %v4933_v12 = vpop.f32.mrf.mxu0 }
0x12c5   : > { %v3322_v34 = vpop.f32.mrf.mxu0 }
0x12c6   : > { %3336 = vrot.lane.b32.xlu1 %v3322_v34, %s6805_s2 }
0x12c7   : > { %v4936_v59 = vpop.f32.mrf.mxu0 }
0x12c9   : > { %v3327_v16 = vpop.f32.mrf.mxu0 }
0x12cb   : > { %v4939_v18 = vpop.f32.mrf.mxu0 }
0x12cd   : > { %v3568_v50 = vpop.f32.mrf.mxu0 }
0x12ce   : > { %3585 = vrot.lane.b32.xlu1 %v3568_v50, %s6806_s27 }
0x12cf   : > { %v4963_v62 = vpop.f32.mrf.mxu0 }
0x12d1   : > { %v3573_v21 = vpop.f32.mrf.mxu0 }
0x12d2   : > { %3087 = vrot.lane.b32.xlu1 %v3076_v8, %s6804_s26  ;;  %3587 = vrot.lane.b32.xlu0 %v3573_v21, %s6806_s27  ;;  %v4360_v8 = vld [vmem:[%s6792_s8 + $0x1] ss:$0 sm:$0xff]  ;;  %s4168_s8 = scalar_lea.sflag [#allocation4], %s647_s24  ;;  %s5263_s26 = sshll.u32 %s5337_s0, 4  ;;  %s5264_s26 = int_to_ptr.vmem [resolvable:$false] %s5263_s26 }
0x12d3   : > { %v4966_v22 = vpop.f32.mrf.mxu0  ;;  %p5266_p0 = scmp.lt.s32.totalorder %s4181_s23, %s5264_s26 }
0x12d4   : > { %v4366_v22 = vld [vmem:[%s6713_s10 + $0x1] ss:$0 sm:$0xff] }
0x12d5   : > { %v3578_v57 = vpop.f32.mrf.mxu0 }
0x12d6   : > { %3338 = vrot.lane.b32.xlu0 %v3327_v16, %s6805_s2  ;;  %3589 = vrot.lane.b32.xlu1 %v3578_v57, %s6806_s27  ;;  %s4406_s27 = sshll.u32 %s5469_s3, 4  ;;  %s5265_s3 = scalar_lea.vmem %s5264_s26, 32 }
0x12d7   : > { %v4969_v14 = vpop.f32.mrf.mxu0  ;;  %s4178_s7 = scalar_lea.hbm %s6724_s21, %s4406_s27  ;;  %p5267_p1 = scmp.lt.s32.totalorder %s5265_s3, %s5259_s28 }
0x12d9   : > { %p5268_p2 = por %p5267_p1, %p5266_p0 }
0x12db   : > { %p5269_p3 = pnand %p5268_p2, %p5262_p13 }
0x1307   : > { %v3084_v27 = vpop.permute.xlu1 %3083 }
0x1308   : > { %3092 = vst.msk [vmem:[#allocation2] sm:$0xff] %vm1415_vm9, %v3084_v27 }
0x130b   : > { %v3086_v55 = vpop.permute.xlu0 %3085 }
0x130c   : > { %3093 = vst.msk [vmem:[#allocation2 + $0x8] sm:$0xff] %vm1415_vm9, %v3086_v55 }
0x1313   : > { %v3335_v6 = vpop.permute.xlu0 %3334 }
0x1314   : > { %3343 = vst.msk [vmem:[#allocation2] sm:$0xff] %vm1668_vm10, %v3335_v6 }
0x1338   : > { %v3337_v23 = vpop.permute.xlu1 %3336 }
0x1339   : > { %3344 = vst.msk [vmem:[#allocation2 + $0x8] sm:$0xff] %vm1668_vm10, %v3337_v23 }
0x1340   : > { %v3586_v20 = vpop.permute.xlu1 %3585 }
0x1341   : > { %3594 = vst.msk [vmem:[#allocation2] sm:$0xff] %vm1921_vm11, %v3586_v20 }
0x1344   : > { %v3088_v29 = vpop.permute.xlu1 %3087  ;;  %v3588_v30 = vpop.permute.xlu0 %3587 }
0x1345   : > { %3094 = vst.msk [vmem:[#allocation2 + $0x10] sm:$0x1] %vm1418_vm12, %v3088_v29 }
0x1346   : > { %3595 = vst.msk [vmem:[#allocation2 + $0x8] sm:$0xff] %vm1921_vm11, %v3588_v30 }
0x1348   : > { %v3339_v31 = vpop.permute.xlu0 %3338  ;;  %v3590_v15 = vpop.permute.xlu1 %3589  ;;  %v3597_v28 = vld [vmem:[#allocation2] sm:$0xff] }
0x1349   : > { %3345 = vst.msk [vmem:[#allocation2 + $0x10] sm:$0x1] %vm1671_vm13, %v3339_v31  ;;  %v3604_v33 = vsel %vm760_vm2, %v3597_v28, 0.0 }
0x134a   : > { %3596 = vst.msk [vmem:[#allocation2 + $0x10] sm:$0x1] %vm1924_vm14, %v3590_v15  ;;  %3605 = vadd.xlane.f32.xlu0 %v3604_v33 }
0x134d   : > { %v3598_v4 = vld [vmem:[#allocation2 + $0x8] sm:$0xff] }
0x134e   : > { %v3607_v17 = vsel %vm760_vm2, %v3598_v4, 0.0 }
0x134f   : > { %3608 = vadd.xlane.f32.xlu1 %v3607_v17 }
0x1351   : > { %v3599_v35 = vld [vmem:[#allocation2 + $0x10] sm:$0x1] }
0x1352   : > { %v3610_v36 = vsel %vm767_vm3, %v3599_v35, 0.0 }
0x1353   : > { %3611 = vadd.xlane.f32.xlu0 %v3610_v36 }
0x13d3   : > { %v3606_v26 = vpop.xlane.xlu0 %3605 }
0x13d4   : > { %v3613_v37 = vmul.f32 0.03125, %v3606_v26 }
0x13d6   : > { %v3616_v38 = vsub.f32 %v3597_v28, %v3613_v37 }
0x13d8   : > { %v3609_v10 = vpop.xlane.xlu1 %3608  ;;  %v3619_v39 = vmul.f32 %v3616_v38, %v3616_v38 }
0x13d9   : > { %v3614_v32 = vmul.f32 0.03125, %v3609_v10 }
0x13da   : > { %v3622_v40 = vsel %vm760_vm2, %v3619_v39, 0.0 }
0x13db   : > { %v3617_v25 = vsub.f32 %v3598_v4, %v3614_v32  ;;  %3623 = vadd.xlane.f32.xlu0 %v3622_v40 }
0x13dc   : > { %v3612_v41 = vpop.xlane.xlu0 %3611 }
0x13dd   : > { %v3620_v42 = vmul.f32 %v3617_v25, %v3617_v25  ;;  %v3615_v44 = vmul.f32 0.03125, %v3612_v41 }
0x13df   : > { %v3625_v43 = vsel %vm760_vm2, %v3620_v42, 0.0  ;;  %v3618_v45 = vsub.f32 %v3599_v35, %v3615_v44  ;;  %v4377_v44 = vld [vmem:[%s6716_s13 + $0x38] sm:$0xff] }
0x13e0   : > { %3626 = vadd.xlane.f32.xlu0 %v3625_v43  ;;  %4988 = vmatpush3.msra.mxu0 %v4377_v44  ;;  %v4376_v43 = vld [vmem:[%s6716_s13 + $0x30] sm:$0xff] }
0x13e1   : > { %v3621_v46 = vmul.f32 %v3618_v45, %v3618_v45  ;;  %4989 = vmatprep.subr.mxu0 %v5321_v1 }
0x13e2   : > { %4990 = vmatpush3.msra.mxu0 %v4376_v43 }
0x13e3   : > { %v3628_v47 = vsel %vm767_vm3, %v3621_v46, 0.0  ;;  %4991 = vmatprep.subr.mxu0 %v5321_v1  ;;  %v4374_v46 = vld [vmem:[%s6716_s13 + $0x20] sm:$0xff] }
0x13e4   : > { %3629 = vadd.xlane.f32.xlu1 %v3628_v47 }
0x1464   : > { %v3624_v52 = vpop.xlane.xlu0 %3623 }
0x1465   : > { %v3631_v53 = vmul.f32 0.03125, %v3624_v52 }
0x1467   : > { %v3634_v54 = vadd.f32 1e-05, %v3631_v53 }
0x1469   : > { %v3627_v24 = vpop.xlane.xlu0 %3626  ;;  %5233 = vrsqrt.f32 %v3634_v54 }
0x146a   : > { %v3632_v56 = vmul.f32 0.03125, %v3627_v24 }
0x146c   : > { %v3635_v58 = vadd.f32 1e-05, %v3632_v56 }
0x146d   : > { %v3630_v61 = vpop.xlane.xlu1 %3629 }
0x146e   : > { %5235 = vrsqrt.f32 %v3635_v58  ;;  %v3633_v63 = vmul.f32 0.03125, %v3630_v61  ;;  %v4372_v58 = vld [vmem:[%s6714_s11 + $0x1] ss:$0 sm:$0xff] }
0x1470   : > { %v3636_v0 = vadd.f32 1e-05, %v3633_v63  ;;  %v4373_v63 = vld [vmem:[%s6715_s12 + $0x1] ss:$0 sm:$0xff] }
0x1472   : > { %5237 = vrsqrt.f32 %v3636_v0 }
0x1476   : > { %v5234_v3 = vpop.eup %5233 }
0x1477   : > { %v3640_v7 = vmul.f32 %v5234_v3, %v3616_v38 }
0x1479   : > { %v3649_v9 = vmul.f32 %v4359_v5, %v3640_v7 }
0x147b   : > { %v5236_v11 = vpop.eup %5235  ;;  %v3658_v12 = vadd.f32 %v4360_v8, %v3649_v9 }
0x147c   : > { %v3641_v34 = vmul.f32 %v5236_v11, %v3617_v25 }
0x147d   : > { %4979 = vmatmul.mubr.msk.f32.vlgmr.msra.gmra.mxu1 %vm760_vm2, %v3658_v12 }
0x147e   : > { %v3650_v59 = vmul.f32 %v4359_v5, %v3641_v34  ;;  %4981 = vmatprep.mubr.msk.f32.mxu1 %vm5322_vm0, %v5321_v1 }
0x147f   : > { %v5238_v16 = vpop.eup %5237 }
0x1480   : > { %v3659_v18 = vadd.f32 %v4360_v8, %v3650_v59  ;;  %v3642_v50 = vmul.f32 %v5238_v16, %v3618_v45  ;;  %v4375_v45 = vld [vmem:[%s6716_s13 + $0x28] sm:$0xff]  ;;  %v4379_v16 = vld [vmem:[%s6717_s14 + $0x1] ss:$0 sm:$0xff] }
0x1481   : > { %4992 = vmatpush3.msra.mxu0 %v4375_v45 }
0x1482   : > { %4982 = vmatmul.mubr.msk.f32.gmra.mxu1 %vm760_vm2, %v3659_v18  ;;  %v3651_v62 = vmul.f32 %v4359_v5, %v3642_v50  ;;  %4993 = vmatprep.subr.mxu0 %v5321_v1 }
0x1483   : > { %4984 = vmatprep.mubr.msk.f32.mxu1 %vm5322_vm0, %v5321_v1  ;;  %4994 = vmatpush3.msra.mxu0 %v4374_v46 }
0x1484   : > { %v3660_v21 = vadd.f32 %v4360_v8, %v3651_v62 }
0x1486   : > { %4985 = vmatmul.mubr.msk.f32.gmra.mxu1 %vm760_vm2, %v3660_v21 }
0x1487   : > { %5036 = vmatprep.mubr.msk.f32.mxu1 %vm5322_vm0, %v5321_v1 }
0x153d   : > { %v3749_v57 = vpop.f32.mrf.mxu1 }
0x153e   : > { %v3750_v14 = vadd.f32 %v4366_v22, %v3749_v57 }
0x153f   : > { %v4980_v27 = vpop.f32.mrf.mxu1 }
0x1540   : > { %v6509_v55 = vadd.f32 %v3750_v14, %v6104_v60 }
0x1542   : > { %v3754_v6 = vpop.f32.mrf.mxu1  ;;  %v3770_v20 = vsel %vm760_vm2, %v6509_v55, 0.0 }
0x1543   : > { %v3755_v23 = vadd.f32 %v4366_v22, %v3754_v6  ;;  %3771 = vadd.xlane.f32.xlu0 %v3770_v20 }
0x1544   : > { %v4983_v29 = vpop.f32.mrf.mxu1 }
0x1545   : > { %v6514_v30 = vadd.f32 %v3755_v23, %v6109_v2 }
0x1546   : > { %v3759_v31 = vpop.f32.mrf.mxu1 }
0x1547   : > { %v3773_v15 = vsel %vm760_vm2, %v6514_v30, 0.0  ;;  %v3760_v28 = vadd.f32 %v4366_v22, %v3759_v31 }
0x1548   : > { %3774 = vadd.xlane.f32.xlu1 %v3773_v15  ;;  %v4986_v33 = vpop.f32.mrf.mxu1 }
0x1549   : > { %v6519_v60 = vadd.f32 %v3760_v28, %v6114_v13 }
0x154b   : > { %v3776_v4 = vsel %vm767_vm3, %v6519_v60, 0.0 }
0x154c   : > { %3777 = vadd.xlane.f32.xlu0 %v3776_v4 }
0x15cc   : > { %v3772_v17 = vpop.xlane.xlu0 %3771 }
0x15cd   : > { %v3779_v35 = vmul.f32 0.03125, %v3772_v17 }
0x15cf   : > { %v3782_v36 = vsub.f32 %v6509_v55, %v3779_v35 }
0x15d1   : > { %v3775_v2 = vpop.xlane.xlu1 %3774  ;;  %v3785_v37 = vmul.f32 %v3782_v36, %v3782_v36 }
0x15d2   : > { %v3780_v26 = vmul.f32 0.03125, %v3775_v2 }
0x15d3   : > { %v3788_v10 = vsel %vm760_vm2, %v3785_v37, 0.0 }
0x15d4   : > { %v3783_v38 = vsub.f32 %v6514_v30, %v3780_v26  ;;  %3789 = vadd.xlane.f32.xlu1 %v3788_v10 }
0x15d5   : > { %v3778_v32 = vpop.xlane.xlu0 %3777 }
0x15d6   : > { %v3786_v39 = vmul.f32 %v3783_v38, %v3783_v38  ;;  %v3781_v13 = vmul.f32 0.03125, %v3778_v32 }
0x15d8   : > { %v3791_v25 = vsel %vm760_vm2, %v3786_v39, 0.0  ;;  %v3784_v40 = vsub.f32 %v6519_v60, %v3781_v13 }
0x15d9   : > { %3792 = vadd.xlane.f32.xlu0 %v3791_v25 }
0x15da   : > { %v3787_v41 = vmul.f32 %v3784_v40, %v3784_v40 }
0x15dc   : > { %v3794_v42 = vsel %vm767_vm3, %v3787_v41, 0.0 }
0x15dd   : > { %3795 = vadd.xlane.f32.xlu1 %v3794_v42 }
0x165d   : > { %v3790_v47 = vpop.xlane.xlu1 %3789 }
0x165e   : > { %v3797_v48 = vmul.f32 0.03125, %v3790_v47 }
0x1660   : > { %v3800_v19 = vadd.f32 1e-05, %v3797_v48  ;;  %v4402_v48 = vld [vmem:[%s6720_s17 + $0xf8] sm:$0xff] }
0x1661   : > { %5005 = vmatpush3.msra.mxu1 %v4402_v48 }
0x1662   : > { %v3793_v49 = vpop.xlane.xlu0 %3792  ;;  %5239 = vrsqrt.f32 %v3800_v19  ;;  %v4401_v19 = vld [vmem:[%s6720_s17 + $0xf0] sm:$0xff]  ;;  %5006 = vmatprep.subr.mxu1 %v5321_v1 }
0x1663   : > { %v3798_v51 = vmul.f32 0.03125, %v3793_v49  ;;  %v4400_v49 = vld [vmem:[%s6720_s17 + $0xe8] sm:$0xff]  ;;  %5007 = vmatpush3.msra.mxu1 %v4401_v19 }
0x1664   : > { %5008 = vmatprep.subr.mxu1 %v5321_v1 }
0x1665   : > { %v3801_v52 = vadd.f32 1e-05, %v3798_v51  ;;  %v4399_v51 = vld [vmem:[%s6720_s17 + $0xe0] sm:$0xff]  ;;  %5009 = vmatpush3.msra.mxu1 %v4400_v49 }
0x1666   : > { %v3796_v53 = vpop.xlane.xlu1 %3795  ;;  %5010 = vmatprep.subr.mxu1 %v5321_v1 }
0x1667   : > { %5241 = vrsqrt.f32 %v3801_v52  ;;  %v3799_v54 = vmul.f32 0.03125, %v3796_v53  ;;  %5011 = vmatpush3.msra.mxu1 %v4399_v51 }
0x1668   : > { %5012 = vmatprep.subr.mxu1 %v5321_v1 }
0x1669   : > { %v3802_v24 = vadd.f32 1e-05, %v3799_v54 }
0x166b   : > { %5243 = vrsqrt.f32 %v3802_v24 }
0x166f   : > { %v5240_v56 = vpop.eup %5239 }
0x1670   : > { %v3806_v61 = vmul.f32 %v5240_v56, %v3782_v36 }
0x1672   : > { %v3815_v0 = vmul.f32 %v4372_v58, %v3806_v61 }
0x1674   : > { %v5242_v3 = vpop.eup %5241  ;;  %v3824_v5 = vadd.f32 %v4373_v63, %v3815_v0 }
0x1675   : > { %v3807_v7 = vmul.f32 %v5242_v3, %v3783_v38 }
0x1676   : > { %4996 = vmatmul.mubr.msk.f32.vlgmr.msra.gmra.mxu0 %vm760_vm2, %v3824_v5 }
0x1677   : > { %v3816_v8 = vmul.f32 %v4372_v58, %v3807_v7  ;;  %4998 = vmatprep.mubr.msk.f32.mxu0 %vm5322_vm0, %v5321_v1 }
0x1678   : > { %v5244_v9 = vpop.eup %5243 }
0x1679   : > { %v3825_v11 = vadd.f32 %v4373_v63, %v3816_v8  ;;  %v3808_v12 = vmul.f32 %v5244_v9, %v3784_v40  ;;  %v4398_v9 = vld [vmem:[%s6720_s17 + $0xd8] sm:$0xff] }
0x167a   : > { %5013 = vmatpush3.msra.mxu1 %v4398_v9 }
0x167b   : > { %4999 = vmatmul.mubr.msk.f32.gmra.mxu0 %vm760_vm2, %v3825_v11  ;;  %v3817_v34 = vmul.f32 %v4372_v58, %v3808_v12  ;;  %5014 = vmatprep.subr.mxu1 %v5321_v1  ;;  %v4397_v11 = vld [vmem:[%s6720_s17 + $0xd0] sm:$0xff]  ;;  %v4396_v12 = vld [vmem:[%s6720_s17 + $0xc8] sm:$0xff] }
0x167c   : > { %5001 = vmatprep.mubr.msk.f32.mxu0 %vm5322_vm0, %v5321_v1  ;;  %5015 = vmatpush3.msra.mxu1 %v4397_v11 }
0x167d   : > { %v3826_v59 = vadd.f32 %v4373_v63, %v3817_v34  ;;  %5016 = vmatprep.subr.mxu1 %v5321_v1  ;;  %v4395_v34 = vld [vmem:[%s6720_s17 + $0xc0] sm:$0xff] }
0x167e   : > { %5017 = vmatpush3.msra.mxu1 %v4396_v12 }
0x167f   : > { %5002 = vmatmul.mubr.msk.f32.gmra.mxu0 %vm760_vm2, %v3826_v59  ;;  %5018 = vmatprep.subr.mxu1 %v5321_v1  ;;  %v4394_v59 = vld [vmem:[%s6720_s17 + $0xb8] sm:$0xff] }
0x1680   : > { %5019 = vmatpush3.msra.mxu1 %v4395_v34 }
0x1681   : > { %5020 = vmatprep.subr.mxu1 %v5321_v1 }
0x1682   : > { %5021 = vmatpush3.msra.mxu1 %v4394_v59 }
0x1683   : > { %5022 = vmatprep.subr.mxu1 %v5321_v1 }
0x1736   : > { %v3915_v18 = vpop.f32.mrf.mxu0 }
0x1737   : > { %v3916_v50 = vadd.f32 %v4379_v16, %v3915_v18  ;;  %v4392_v18 = vld [vmem:[%s6720_s17 + $0xa8] sm:$0xff] }
0x1738   : > { %v4997_v62 = vpop.f32.mrf.mxu0 }
0x1739   : > { %v3932_v21 = vmul.f32 0.044715, %v3916_v50  ;;  %v3935_v22 = vmul.f32 %v3916_v50, %v3916_v50  ;;  %v3929_v32 = vmul.f32 0.5, %v3916_v50  ;;  %v4390_v62 = vld [vmem:[%s6720_s17 + $0x98] sm:$0xff] }
0x173b   : > { %v3920_v57 = vpop.f32.mrf.mxu0  ;;  %v3938_v14 = vmul.f32 %v3935_v22, %v3932_v21  ;;  %v4389_v21 = vld [vmem:[%s6720_s17 + $0x90] sm:$0xff]  ;;  %v4388_v22 = vld [vmem:[%s6720_s17 + $0x88] sm:$0xff] }
0x173c   : > { %v3921_v27 = vadd.f32 %v4379_v16, %v3920_v57  ;;  %v4387_v57 = vld [vmem:[%s6720_s17 + $0x80] sm:$0xff] }
0x173d   : > { %v5000_v6 = vpop.f32.mrf.mxu0  ;;  %v3941_v23 = vadd.f32 %v3938_v14, %v3916_v50  ;;  %v4391_v50 = vld [vmem:[%s6720_s17 + $0xa0] sm:$0xff] }
0x173e   : > { %v3933_v20 = vmul.f32 0.044715, %v3921_v27  ;;  %v3936_v29 = vmul.f32 %v3921_v27, %v3921_v27  ;;  %v3930_v40 = vmul.f32 0.5, %v3921_v27 }
0x173f   : > { %v3944_v31 = vmul.f32 0.7978846, %v3941_v23  ;;  %v3925_v28 = vpop.f32.mrf.mxu0 }
0x1740   : > { %v3939_v15 = vmul.f32 %v3936_v29, %v3933_v20  ;;  %v3926_v33 = vadd.f32 %v4379_v16, %v3925_v28  ;;  %v4393_v16 = vld [vmem:[%s6720_s17 + $0xb0] sm:$0xff] }
0x1741   : > { %v5003_v17 = vpop.f32.mrf.mxu0  ;;  %5245 = vtanh.f32 %v3944_v31  ;;  %5023 = vmatpush3.msra.mxu1 %v4393_v16 }
0x1742   : > { %v3942_v4 = vadd.f32 %v3939_v15, %v3921_v27  ;;  %v3934_v35 = vmul.f32 0.044715, %v3926_v33  ;;  %v3937_v36 = vmul.f32 %v3926_v33, %v3926_v33  ;;  %v3931_v43 = vmul.f32 0.5, %v3926_v33  ;;  %5024 = vmatprep.subr.mxu1 %v5321_v1 }
0x1743   : > { %5025 = vmatpush3.msra.mxu1 %v4392_v18 }
0x1744   : > { %v3945_v2 = vmul.f32 0.7978846, %v3942_v4  ;;  %v3940_v26 = vmul.f32 %v3937_v36, %v3934_v35  ;;  %5026 = vmatprep.subr.mxu1 %v5321_v1  ;;  %v4385_v4 = vld [vmem:[%s6718_s15 + $0x1] ss:$0 sm:$0xff] }
0x1745   : > { %5027 = vmatpush3.msra.mxu1 %v4391_v50  ;;  %v4386_v35 = vld [vmem:[%s6719_s16 + $0x1] ss:$0 sm:$0xff] }
0x1746   : > { %5247 = vtanh.f32 %v3945_v2  ;;  %v3943_v37 = vadd.f32 %v3940_v26, %v3926_v33  ;;  %5028 = vmatprep.subr.mxu1 %v5321_v1 }
0x1747   : > { %5029 = vmatpush3.msra.mxu1 %v4390_v62 }
0x1748   : > { %v3946_v38 = vmul.f32 0.7978846, %v3943_v37  ;;  %5030 = vmatprep.subr.mxu1 %v5321_v1 }
0x1749   : > { %5031 = vmatpush3.msra.mxu1 %v4389_v21 }
0x174a   : > { %5249 = vtanh.f32 %v3946_v38  ;;  %5032 = vmatprep.subr.mxu1 %v5321_v1 }
0x174b   : > { %5033 = vmatpush3.msra.mxu1 %v4388_v22  ;;  %v4149_v22 = vld [vmem:[%s6722_s19] sm:$0x1] }
0x174c   : > { %5034 = vmatprep.subr.mxu1 %v5321_v1 }
0x174d   : > { %5035 = vmatpush3.msra.mxu1 %v4387_v57 }
0x174e   : > { %v5246_v10 = vpop.eup %5245 }
0x174f   : > { %v3950_v39 = vadd.f32 1.0, %v5246_v10 }
0x1751   : > { %v3953_v13 = vmul.f32 %v3950_v39, %v3929_v32 }
0x1753   : > { %v5248_v25 = vpop.eup %5247  ;;  %3960 = vadd.xlane.f32.xlu0 %v3953_v13 }
0x1754   : > { %v3951_v41 = vadd.f32 1.0, %v5248_v25 }
0x1756   : > { %v3954_v42 = vmul.f32 %v3951_v41, %v3930_v40  ;;  %v4121_v40 = vlaneseq  ;;  %v4404_v41 = vld [vmem:[%s6721_s18 + $0x1] ss:$0 sm:$0xff] }
0x1757   : > { %v5250_v44 = vpop.eup %5249 }
0x1758   : > { %3962 = vadd.xlane.f32.xlu1 %v3954_v42  ;;  %v3952_v45 = vadd.f32 1.0, %v5250_v44  ;;  %v4122_v44 = vshrl.u32 %v4121_v40, 7 }
0x175a   : > { %v3955_v46 = vmul.f32 %v3952_v45, %v3931_v43  ;;  %vm4125_vm15 = vcmp.ge.s32.totalorder %v4122_v44, 1 }
0x175b   : > { %v4405_v49 = vsel %vm4125_vm15, 1.0, %v5321_v1 }
0x175c   : > { %v3964_v47 = vsel %vm1080_vm5, %v3955_v46, 0.0 }
0x175d   : > { %3965 = vadd.xlane.f32.xlu0 %v3964_v47 }
0x17dc   : > { %v3961_v52 = vpop.xlane.xlu0 %3960 }
0x17dd   : > { %v3967_v53 = vmul.f32 0.0078125, %v3961_v52 }
0x17df   : > { %v6577_v54 = vsub.f32 %v3953_v13, %v3967_v53 }
0x17e1   : > { %v3963_v24 = vpop.xlane.xlu1 %3962  ;;  %v3973_v58 = vmul.f32 %v6577_v54, %v6577_v54 }
0x17e2   : > { %v3968_v56 = vmul.f32 0.0078125, %v3963_v24 }
0x17e3   : > { %3976 = vadd.xlane.f32.xlu1 %v3973_v58 }
0x17e4   : > { %v6581_v61 = vsub.f32 %v3954_v42, %v3968_v56 }
0x17e6   : > { %v3974_v63 = vmul.f32 %v6581_v61, %v6581_v61  ;;  %v3966_v0 = vpop.xlane.xlu0 %3965 }
0x17e7   : > { %v3969_v3 = vmul.f32 0.0078125, %v3966_v0 }
0x17e8   : > { %3978 = vadd.xlane.f32.xlu0 %v3974_v63 }
0x17e9   : > { %v6585_v5 = vsub.f32 %v3955_v46, %v3969_v3 }
0x17eb   : > { %v3975_v7 = vmul.f32 %v6585_v5, %v6585_v5 }
0x17ed   : > { %v3980_v8 = vsel %vm1080_vm5, %v3975_v7, 0.0 }
0x17ee   : > { %3981 = vadd.xlane.f32.xlu1 %v3980_v8 }
0x186c   : > { %v3977_v14 = vpop.xlane.xlu1 %3976 }
0x186d   : > { %v3983_v27 = vmul.f32 0.0078125, %v3977_v14  ;;  %v4150_v14 = vld [vmem:[%s6723_s20] sm:$0x1] }
0x186f   : > { %v3986_v6 = vadd.f32 1e-05, %v3983_v27 }
0x1871   : > { %v3979_v23 = vpop.xlane.xlu0 %3978  ;;  %5251 = vrsqrt.f32 %v3986_v6 }
0x1872   : > { %v3984_v20 = vmul.f32 0.0078125, %v3979_v23 }
0x1874   : > { %v3987_v29 = vadd.f32 1e-05, %v3984_v20 }
0x1876   : > { %5253 = vrsqrt.f32 %v3987_v29 }
0x1877   : > { %v3982_v31 = vpop.xlane.xlu1 %3981 }
0x1878   : > { %v3985_v15 = vmul.f32 0.0078125, %v3982_v31 }
0x187a   : > { %v3988_v28 = vadd.f32 1e-05, %v3985_v15 }
0x187c   : > { %5255 = vrsqrt.f32 %v3988_v28 }
0x187e   : > { %v5252_v33 = vpop.eup %5251 }
0x187f   : > { %v3992_v17 = vmul.f32 %v5252_v33, %v6577_v54 }
0x1881   : > { %v4001_v36 = vmul.f32 %v4385_v4, %v3992_v17 }
0x1883   : > { %v5254_v2 = vpop.eup %5253  ;;  %v4010_v26 = vadd.f32 %v4386_v35, %v4001_v36 }
0x1884   : > { %v3993_v37 = vmul.f32 %v5254_v2, %v6581_v61 }
0x1885   : > { %5037 = vmatmul.mubr.f32.vlgmr.msra.gmra.mxu1 %v4010_v26 }
0x1886   : > { %v4002_v38 = vmul.f32 %v4385_v4, %v3993_v37  ;;  %5039 = vmatprep.mubr.msk.f32.mxu1 %vm5322_vm0, %v5321_v1 }
0x1888   : > { %v4011_v10 = vadd.f32 %v4386_v35, %v4002_v38 }
0x1889   : > { %v5256_v32 = vpop.eup %5255 }
0x188a   : > { %5040 = vmatmul.mubr.f32.gmra.mxu1 %v4011_v10  ;;  %v3994_v39 = vmul.f32 %v5256_v32, %v6585_v5 }
0x188b   : > { %5042 = vmatprep.mubr.msk.f32.mxu1 %vm5322_vm0, %v5321_v1 }
0x188c   : > { %v4003_v13 = vmul.f32 %v4385_v4, %v3994_v39 }
0x188e   : > { %v4012_v25 = vadd.f32 %v4386_v35, %v4003_v13 }
0x1890   : > { %5043 = vmatmul.mubr.f32.gmra.mxu1 %v4012_v25 }
0x1945   : > { %v4104_v42 = vpop.f32.mrf.mxu1 }
0x1946   : > { %v4105_v43 = vadd.f32 %v4404_v41, %v4104_v42 }
0x1947   : > { %v5038_v45 = vpop.f32.mrf.mxu1 }
0x1948   : > { %v4118_v48 = vadd.f32 %v4105_v43, %v6509_v55 }
0x194a   : > { %v4109_v46 = vpop.f32.mrf.mxu1  ;;  %v4134_v52 = vmul.f32 %v4405_v49, %v4118_v48 }
0x194b   : > { %v4110_v47 = vadd.f32 %v4404_v41, %v4109_v46 }
0x194c   : > { %v5041_v19 = vpop.f32.mrf.mxu1  ;;  %v4137_v58 = vsel %vm760_vm2, %v4134_v52, 0.0 }
0x194d   : > { %v4119_v51 = vadd.f32 %v4110_v47, %v6514_v30 }
0x194f   : > { %v4138_v54 = vsel %vm760_vm2, %v4119_v51, 0.0 }
0x1950   : > { %v4114_v53 = vpop.f32.mrf.mxu1  ;;  %v4139_v63 = vadd.f32 %v4138_v54, %v4137_v58 }
0x1951   : > { %v4115_v24 = vadd.f32 %v4404_v41, %v4114_v53 }
0x1952   : > { %v5044_v56 = vpop.f32.mrf.mxu1 }
0x1953   : > { %v4120_v61 = vadd.f32 %v4115_v24, %v6519_v60 }
0x1955   : > { %v4140_v0 = vsel %vm767_vm3, %v4120_v61, 0.0 }
0x1956   : > { %v4141_v3 = vadd.f32 %v4140_v0, %v4139_v63 }
0x1958   : > { %v4142_v55 = vrot.slane %v4141_v3, 4 }
0x195a   : > { %v4143_v5 = vadd.f32 %v4142_v55, %v4141_v3 }
0x195c   : > { %v4144_v7 = vrot.slane %v4143_v5, 2 }
0x195e   : > { %v4145_v1 = vadd.f32 %v4144_v7, %v4143_v5 }
0x1960   : > { %v4146_v30 = vrot.slane %v4145_v1, 1 }
0x1962   : > { %v4147_v8 = vadd.f32 %v4146_v30, %v4145_v1 }
0x1964   : > { %v4148_v9 = vmul.f32 0.0625, %v4147_v8 }
0x1966   : > { %v4151_v11 = vsel %vm760_vm2, %v4148_v9, 0.0 }
0x1967   : > { %4152 = vadd.xlane.f32.xlu0 %v4151_v11 }
0x19f0   : > { %v4153_v12 = vpop.xlane.xlu0 %4152 }
0x19f1   : > { %v4154_v34 = vmul.f32 0.03125, %v4153_v12 }
0x19f3   : > { %v4155_v59 = vsub.f32 %v4148_v9, %v4154_v34 }
0x19f5   : > { %v4156_v60 = vmul.f32 %v4155_v59, %v4155_v59 }
0x19f7   : > { %v4157_v16 = vsel %vm760_vm2, %v4156_v60, 0.0 }
0x19f8   : > { %4158 = vadd.xlane.f32.xlu1 %v4157_v16 }
0x1a81   : > { %v4159_v18 = vpop.xlane.xlu1 %4158 }
0x1a82   : > { %v4160_v50 = vmul.f32 0.03125, %v4159_v18 }
0x1a84   : > { %v4161_v62 = vadd.f32 1e-05, %v4160_v50 }
0x1a86   : > { %5257 = vrsqrt.f32 %v4161_v62 }
0x1a93   : > { %v5258_v21 = vpop.eup %5257 }
0x1a94   : > { %v4163_v57 = vmul.f32 %v5258_v21, %v4155_v59 }
0x1a96   : > { %v4164_v27 = vmul.f32 %v4163_v57, %v4149_v22 }
0x1a98   : > { %v4165_v6 = vadd.f32 %v4164_v27, %v4150_v14 }
0x1a9a   : > { %4166 = vst.msk [vmem:[%s648_s4] sm:$0x1] %vm767_vm3, %v4165_v6 }
0x1a9b   : > { %5272 = shalt.err (!%p5269_p3)
}
0x1a9c   : > { %s5273_s6 = scalar_lea.hbm %s4178_s7, 16  ;;  %s5277_s2 = scalar_lea.hbm %s6724_s21, 32 }
0x1a9d   : > { %p5274_p4 = scmp.ne.s32.totalorder %s4178_s7, %s5273_s6  ;;  %p5278_p9 = scmp.lt.s32.totalorder %s4178_s7, %s6724_s21 }
0x1a9e   : > { %p5279_p10 = scmp.lt.s32.totalorder %s5277_s2, %s5273_s6 }
0x1a9f   : > { %p5275_p7 = pnand %p5274_p4, %p5486_p5 }
0x1aa0   : > { %p5280_p11 = por %p5279_p10, %p5278_p9 }
0x1aa1   : > { %p5276_p8 = pneg %p5275_p7 }
0x1aa3   : > { %p5281_p12 = pnand %p5280_p11, %p5276_p8 }
0x1aa5   : > { %5284 = shalt.err (!%p5281_p12)
}
0x1aa6   : > { %5046 = dma.vmem_to_hbm [thread:$0]  (%p5486_p5), %s4181_s23, 16, %s4178_s7, %s4168_s8  }
0x1aa7 PF: > { %s6807_s28 = sld [smem:[#allocation8_spill]] }
0x1aa8   : > { %s6808_s0 = sld [smem:[#allocation6_spill]] }
0x1aad   : > { %p5052_p13 = scmp.ge.s32.totalorder %s6807_s28, 2 }
0x1aae   : > { %s4192_s3 = sand.u32 1, %s6808_s0  }
0x1aaf   : > { %p5049_p0 = pnand %p5052_p13, %p5490_p6  ;;  %s4193_s1 = scalar_lea.sflag [#allocation4], %s4192_s3 }
0x1ab1   : > { %p5050_p1 = pneg %p5049_p0 }
0x1ab3   : > { %5302 = dma.done.wait (%p5050_p1), %s4193_s1, 16  }
0x1ab4   : > { %5304 = vsyncadd (%p5050_p1), %s4193_s1, 4294967280  ;;  %s6810_s27 = sld [smem:[#allocation9_spill]]  ;;  %s6813_s2 = smov %s5311_s25 }
0x1ab5   : > { %s6811_s6 = sld [smem:[#allocation7_spill]] }
0x1ab6   : > { %s6812_s26 = sld [smem:[#allocation10_spill]] }
0x1aba   : > { %p31_p2 = scmp.ge.s32.totalorder %s6810_s27, 4  }
0x1abb   : > { %s6814_s25 = smov %s6811_s6 }
0x1abc   :  { %33 = sbr.rel (!%p31_p2) target bundleno = 13 (0xd), region = 155 }
0x1ac1   :  { %4197 = vsyncpa [#allocation4], 1 }
0x1ac2   :  { %4199 = vsyncpa [#allocation4 + $0x1], 1 }

</bundles_post_ra>
